<compile_context>
chip_gen: v7x
topology: tpu7x:2x2x1
jax: 0.10.0
libtpu: 0.0.40
codegen_flags: <defaults>
</compile_context>

<pallas_src>
import jax
import jax.numpy as jnp
import numpy as np
from jax.experimental import pallas as pl
from jax.experimental.pallas import tpu as pltpu


def resblock_kernel(x_ref, bw1_ref, bw2_ref, bnp_ref, o_ref, xpad_ref):
    # x_ref   : (N*H, W*C)       unpadded input, lane-dense NHWC
    # bw*_ref : (3, Wp*C, W*C)   banded conv weights, one slab per kernel row ky
    # bnp_ref : (4, W*C)         [g1, b1, g2, b2], each pre-tiled over W
    # o_ref   : (N*H, W*C)
    # xpad_ref: (N, H+2, Wp*C)   VMEM scratch: zero-padded activation
    NH, WC = x_ref.shape
    N, Hp, WpC = xpad_ref.shape
    H = Hp - 2
    C = (WpC - WC) // 2
    W = WC // C
    P = NH * W                   # BN population (N*H*W)
    inv_p = 1.0 / P
    eps = 1e-5

    # ---- fused zero padding: zero only the halo ring ----------------------
    xpad_ref[:, 0:1, :] = jnp.zeros((N, 1, WpC), jnp.float32)
    xpad_ref[:, Hp - 1:Hp, :] = jnp.zeros((N, 1, WpC), jnp.float32)
    xpad_ref[:, :, 0:C] = jnp.zeros((N, Hp, C), jnp.float32)
    xpad_ref[:, :, WpC - C:WpC] = jnp.zeros((N, Hp, C), jnp.float32)
    xpad_ref[:, 1:H + 1, C:C + WC] = (
        x_ref[...].astype(jnp.float32).reshape(N, H, WC))

    def conv3x3(bw_ref):
        # 3x3 conv, stride 1, pad 1 == 3 banded matmuls (one per kernel row).
        acc = jnp.zeros((NH, WC), jnp.float32)
        for ky in range(3):
            lhs = xpad_ref[:, ky:ky + H, :].reshape(NH, WpC)
            acc = acc + jnp.dot(lhs, bw_ref[ky],
                                preferred_element_type=jnp.float32)
        return acc

    def group_total(v):
        # v: (1, W*C). Per-channel totals (summed across the W lane groups),
        # replicated back into every group -> stays lane-dense.
        total = v
        if W & (W - 1) == 0:
            sh = C
            while sh < WC:
                total = total + pltpu.roll(total, sh, axis=1)
                sh *= 2
        else:
            rolled = v
            for _ in range(W - 1):
                rolled = pltpu.roll(rolled, C, axis=1)
                total = total + rolled
        return total

    def batchnorm(y, g_t, b_t):
        # training-mode BN folded to a single scale/shift (rsqrt on the EUP)
        colsum = jnp.sum(y, axis=0, keepdims=True)        # (1, WC)
        colsq = jnp.sum(y * y, axis=0, keepdims=True)     # (1, WC)
        mean_t = group_total(colsum) * inv_p
        var_t = group_total(colsq) * inv_p - mean_t * mean_t
        scale_t = g_t * jax.lax.rsqrt(var_t + eps)
        shift_t = b_t - mean_t * scale_t
        return y * scale_t + shift_t

    bnp = bnp_ref[...].astype(jnp.float32)                # (4, WC)
    g1_t, b1_t = bnp[0:1, :], bnp[1:2, :]
    g2_t, b2_t = bnp[2:3, :], bnp[3:4, :]

    # conv1 -> bn1 -> LeakyReLU(0.2)
    y1 = conv3x3(bw1_ref)
    a1 = batchnorm(y1, g1_t, b1_t)
    a1 = jnp.maximum(a1, 0.2 * a1)

    # re-pad the activation into the scratch (halo is still zero)
    xpad_ref[:, 1:H + 1, C:C + WC] = a1.reshape(N, H, WC)

    # conv2 -> bn2 -> residual add
    y2 = conv3x3(bw2_ref)
    out = batchnorm(y2, g2_t, b2_t) + x_ref[...].astype(jnp.float32)

    o_ref[...] = out.astype(o_ref.dtype)


def _banded_conv_weights(w_oihw, W):
    """OIHW 3x3 weights -> (3, (W+2)*Cin, W*Cout) banded matrices, one per ky.

    bw[ky, (w+kx)*Cin + ci, w*Cout + co] = w[co, ci, ky, kx]; everything else 0.
    Host-side preprocessing on concrete weights (numpy), done once per call.
    """
    w = np.asarray(w_oihw, dtype=np.float32)
    Co, Ci, KH, KW = w.shape
    wt = np.transpose(w, (2, 3, 1, 0))                    # (ky, kx, Cin, Cout)
    bw = np.zeros((KH, (W + 2) * Ci, W * Co), np.float32)
    for ky in range(KH):
        for kx in range(KW):
            for wo in range(W):
                r0 = (wo + kx) * Ci
                c0 = wo * Co
                bw[ky, r0:r0 + Ci, c0:c0 + Co] = wt[ky, kx]
    return jnp.asarray(bw)


def resblock_pallas(x_nchw, w1, w2, g1, b1, g2, b2):
    """x_nchw: (N, 16, H, W); w*: (16, 16, 3, 3) OIHW; g*/b*: (16,)."""
    N, C, H, W = x_nchw.shape
    WC, WpC, Hp = W * C, (W + 2) * C, H + 2

    # NHWC collapsed to lane-dense (N*H, W*C); pad is fused into the kernel.
    x2d = jnp.transpose(x_nchw, (0, 2, 3, 1)).reshape(N * H, WC)

    bw1 = _banded_conv_weights(w1, W)
    bw2 = _banded_conv_weights(w2, W)

    # BN params packed into one array, pre-tiled over the W lane groups.
    bnp = jnp.stack([jnp.tile(g1, W), jnp.tile(b1, W),
                     jnp.tile(g2, W), jnp.tile(b2, W)], axis=0)

    out2d = pl.pallas_call(
        resblock_kernel,
        out_shape=jax.ShapeDtypeStruct((N * H, WC), x_nchw.dtype),
        grid=(1,),
        in_specs=[
            pl.BlockSpec((N * H, WC), lambda i: (0, 0)),
            pl.BlockSpec((3, WpC, WC), lambda i: (0, 0, 0)),
            pl.BlockSpec((3, WpC, WC), lambda i: (0, 0, 0)),
            pl.BlockSpec((4, WC), lambda i: (0, 0)),
        ],
        out_specs=pl.BlockSpec((N * H, WC), lambda i: (0, 0)),
        scratch_shapes=[pltpu.VMEM((N, Hp, WpC), jnp.float32)],
        compiler_params=pltpu.CompilerParams(
            dimension_semantics=("arbitrary",)),
    )(x2d, bw1, bw2, bnp)

    return jnp.transpose(out2d.reshape(N, H, W, C), (0, 3, 1, 2))  # NCHW


def resblock_reference(x, w1, w2, g1, b1, g2, b2):
    """Plain-JAX reference matching the PyTorch forward (training-mode BN)."""
    def conv(inp, w):
        return jax.lax.conv_general_dilated(
            inp, w, window_strides=(1, 1), padding=((1, 1), (1, 1)),
            dimension_numbers=("NCHW", "OIHW", "NCHW"))

    def bn(inp, g, b, eps=1e-5):
        mean = jnp.mean(inp, axis=(0, 2, 3), keepdims=True)
        var = jnp.mean((inp - mean) ** 2, axis=(0, 2, 3), keepdims=True)
        return ((inp - mean) / jnp.sqrt(var + eps)
                * g.reshape(1, -1, 1, 1) + b.reshape(1, -1, 1, 1))

    out = conv(x, w1)
    out = bn(out, g1, b1)
    out = jnp.where(out > 0, out, 0.2 * out)
    out = conv(out, w2)
    out = bn(out, g2, b2)
    return out + x


if __name__ == "__main__":
    key = jax.random.PRNGKey(0)
    k1, k2, k3, k4, k5, k6, kx = jax.random.split(key, 7)

    N, C, H, W = 2, 16, 16, 16  # channels fixed at 16 by the module definition

    # Deterministic synthetic parameters (shapes from ResBlock.__init__)
    w1 = 0.1 * jax.random.normal(k1, (C, C, 3, 3), jnp.float32)   # conv1.weight
    w2 = 0.1 * jax.random.normal(k2, (C, C, 3, 3), jnp.float32)   # conv2.weight
    g1 = 1.0 + 0.1 * jax.random.normal(k3, (C,), jnp.float32)     # bn1.weight
    b1 = 0.1 * jax.random.normal(k4, (C,), jnp.float32)           # bn1.bias
    g2 = 1.0 + 0.1 * jax.random.normal(k5, (C,), jnp.float32)     # bn2.weight
    b2 = 0.1 * jax.random.normal(k6, (C,), jnp.float32)           # bn2.bias
    # TODO(synk): BatchNorm running_mean/running_var buffer updates (a training-
    # mode side effect) are not modeled; only the forward output is produced.

    x = jax.random.normal(kx, (N, C, H, W), jnp.float32)          # NCHW input

    out = resblock_pallas(x, w1, w2, g1, b1, g2, b2)
    out = jax.block_until_ready(out)

    ref = resblock_reference(x, w1, w2, g1, b1, g2, b2)
    np.testing.assert_allclose(np.asarray(out), np.asarray(ref),
                               rtol=1e-4, atol=1e-4)
    print("KERNEL_OK")
</pallas_src>

<mosaic_0001>
module attributes {stable_mosaic.version = 11 : i64} {
  func.func @resblock_kernel(%arg0: i32, %arg1: memref<32x256xf32, #tpu.memory_space<vmem>>, %arg2: memref<3x288x256xf32, #tpu.memory_space<vmem>>, %arg3: memref<3x288x256xf32, #tpu.memory_space<vmem>>, %arg4: memref<4x256xf32, #tpu.memory_space<vmem>>, %arg5: memref<32x256xf32, #tpu.memory_space<vmem>>, %arg6: memref<2x18x288xf32, #tpu.memory_space<vmem>>) attributes {dimension_semantics = [#tpu.dimension_semantics<arbitrary>], iteration_bounds = array<i64: 1>, scalar_prefetch = 0 : i64, scratch_operands = 1 : i64, tpu.core_type = #tpu.core_type<tc>, window_params = [{pipeline_mode = #tpu.pipeline_mode<synchronous>, transform_indices = @transform_0, window_bounds = array<i64: 32, 256>}, {pipeline_mode = #tpu.pipeline_mode<synchronous>, transform_indices = @transform_1, window_bounds = array<i64: 3, 288, 256>}, {pipeline_mode = #tpu.pipeline_mode<synchronous>, transform_indices = @transform_2, window_bounds = array<i64: 3, 288, 256>}, {pipeline_mode = #tpu.pipeline_mode<synchronous>, transform_indices = @transform_3, window_bounds = array<i64: 4, 256>}, {pipeline_mode = #tpu.pipeline_mode<synchronous>, transform_indices = @transform_4, window_bounds = array<i64: 32, 256>}]} {
    %cst = arith.constant 0.000000e+00 : f32
    %0 = vector.broadcast %cst : f32 to vector<2x1x288xf32>
    %c0 = arith.constant 0 : index
    %c0_0 = arith.constant 0 : index
    %c0_1 = arith.constant 0 : index
    %1 = vector.load %arg6[%c0, %c0_0, %c0_1] : memref<2x18x288xf32, #tpu.memory_space<vmem>>, vector<2x1x288xf32>
    tpu.vector_store %arg6[%c0, %c0_0, %c0_1], %0 {strides = array<i32>} : memref<2x18x288xf32, #tpu.memory_space<vmem>>, vector<2x1x288xf32>,
    %cst_2 = arith.constant 0.000000e+00 : f32
    %2 = vector.broadcast %cst_2 : f32 to vector<2x1x288xf32>
    %c0_3 = arith.constant 0 : index
    %c17 = arith.constant 17 : index
    %c0_4 = arith.constant 0 : index
    %3 = vector.load %arg6[%c0_3, %c17, %c0_4] : memref<2x18x288xf32, #tpu.memory_space<vmem>>, vector<2x1x288xf32>
    tpu.vector_store %arg6[%c0_3, %c17, %c0_4], %2 {strides = array<i32>} : memref<2x18x288xf32, #tpu.memory_space<vmem>>, vector<2x1x288xf32>,
    %cst_5 = arith.constant 0.000000e+00 : f32
    %4 = vector.broadcast %cst_5 : f32 to vector<2x18x16xf32>
    %c0_6 = arith.constant 0 : index
    %c0_7 = arith.constant 0 : index
    %c0_8 = arith.constant 0 : index
    %5 = vector.load %arg6[%c0_6, %c0_7, %c0_8] : memref<2x18x288xf32, #tpu.memory_space<vmem>>, vector<2x18x16xf32>
    tpu.vector_store %arg6[%c0_6, %c0_7, %c0_8], %4 {strides = array<i32>} : memref<2x18x288xf32, #tpu.memory_space<vmem>>, vector<2x18x16xf32>,
    %cst_9 = arith.constant 0.000000e+00 : f32
    %6 = vector.broadcast %cst_9 : f32 to vector<2x18x16xf32>
    %c0_10 = arith.constant 0 : index
    %c0_11 = arith.constant 0 : index
    %c272 = arith.constant 272 : index
    %7 = vector.load %arg6[%c0_10, %c0_11, %c272] : memref<2x18x288xf32, #tpu.memory_space<vmem>>, vector<2x18x16xf32>
    tpu.vector_store %arg6[%c0_10, %c0_11, %c272], %6 {strides = array<i32>} : memref<2x18x288xf32, #tpu.memory_space<vmem>>, vector<2x18x16xf32>,
    %c0_12 = arith.constant 0 : index
    %c0_13 = arith.constant 0 : index
    %8 = vector.load %arg1[%c0_12, %c0_13] : memref<32x256xf32, #tpu.memory_space<vmem>>, vector<32x256xf32>
    %9 = vector.shape_cast %8 : vector<32x256xf32> to vector<2x16x256xf32>
    %c0_14 = arith.constant 0 : index
    %c1 = arith.constant 1 : index
    %c16 = arith.constant 16 : index
    %10 = vector.load %arg6[%c0_14, %c1, %c16] : memref<2x18x288xf32, #tpu.memory_space<vmem>>, vector<2x16x256xf32>
    tpu.vector_store %arg6[%c0_14, %c1, %c16], %9 {strides = array<i32>} : memref<2x18x288xf32, #tpu.memory_space<vmem>>, vector<2x16x256xf32>,
    %c0_15 = arith.constant 0 : index
    %c0_16 = arith.constant 0 : index
    %11 = vector.load %arg4[%c0_15, %c0_16] : memref<4x256xf32, #tpu.memory_space<vmem>>, vector<4x256xf32>
    %12 = vector.extract_strided_slice %11 {offsets = [0, 0], sizes = [1, 256], strides = [1, 1]} : vector<4x256xf32> to vector<1x256xf32>
    %13 = vector.extract_strided_slice %11 {offsets = [1, 0], sizes = [1, 256], strides = [1, 1]} : vector<4x256xf32> to vector<1x256xf32>
    %14 = vector.extract_strided_slice %11 {offsets = [2, 0], sizes = [1, 256], strides = [1, 1]} : vector<4x256xf32> to vector<1x256xf32>
    %15 = vector.extract_strided_slice %11 {offsets = [3, 0], sizes = [1, 256], strides = [1, 1]} : vector<4x256xf32> to vector<1x256xf32>
    %cst_17 = arith.constant 0.000000e+00 : f32
    %16 = vector.broadcast %cst_17 : f32 to vector<32x256xf32>
    %c0_18 = arith.constant 0 : index
    %c0_19 = arith.constant 0 : index
    %c0_20 = arith.constant 0 : index
    %17 = vector.load %arg6[%c0_18, %c0_19, %c0_20] : memref<2x18x288xf32, #tpu.memory_space<vmem>>, vector<2x16x288xf32>
    %18 = vector.shape_cast %17 : vector<2x16x288xf32> to vector<32x288xf32>
    %c0_21 = arith.constant 0 : index
    %c0_22 = arith.constant 0 : index
    %c0_23 = arith.constant 0 : index
    %19 = vector.load %arg2[%c0_21, %c0_22, %c0_23] : memref<3x288x256xf32, #tpu.memory_space<vmem>>, vector<1x288x256xf32>
    %20 = vector.shape_cast %19 : vector<1x288x256xf32> to vector<288x256xf32>
    %cst_24 = arith.constant dense<0.000000e+00> : vector<32x256xf32>
    %21 = tpu.matmul %18, %20, %cst_24 {dimension_numbers = #tpu.dot_dimension_numbers<[1], [0], [0], [1], [0, 0, 1, 1], [], []>} : vector<32x288xf32>, vector<288x256xf32>, vector<32x256xf32> -> vector<32x256xf32>
    %22 = arith.addf %16, %21 : vector<32x256xf32>
    %c0_25 = arith.constant 0 : index
    %c1_26 = arith.constant 1 : index
    %c0_27 = arith.constant 0 : index
    %23 = vector.load %arg6[%c0_25, %c1_26, %c0_27] : memref<2x18x288xf32, #tpu.memory_space<vmem>>, vector<2x16x288xf32>
    %24 = vector.shape_cast %23 : vector<2x16x288xf32> to vector<32x288xf32>
    %c1_28 = arith.constant 1 : index
    %c0_29 = arith.constant 0 : index
    %c0_30 = arith.constant 0 : index
    %25 = vector.load %arg2[%c1_28, %c0_29, %c0_30] : memref<3x288x256xf32, #tpu.memory_space<vmem>>, vector<1x288x256xf32>
    %26 = vector.shape_cast %25 : vector<1x288x256xf32> to vector<288x256xf32>
    %cst_31 = arith.constant dense<0.000000e+00> : vector<32x256xf32>
    %27 = tpu.matmul %24, %26, %cst_31 {dimension_numbers = #tpu.dot_dimension_numbers<[1], [0], [0], [1], [0, 0, 1, 1], [], []>} : vector<32x288xf32>, vector<288x256xf32>, vector<32x256xf32> -> vector<32x256xf32>
    %28 = arith.addf %22, %27 : vector<32x256xf32>
    %c0_32 = arith.constant 0 : index
    %c2 = arith.constant 2 : index
    %c0_33 = arith.constant 0 : index
    %29 = vector.load %arg6[%c0_32, %c2, %c0_33] : memref<2x18x288xf32, #tpu.memory_space<vmem>>, vector<2x16x288xf32>
    %30 = vector.shape_cast %29 : vector<2x16x288xf32> to vector<32x288xf32>
    %c2_34 = arith.constant 2 : index
    %c0_35 = arith.constant 0 : index
    %c0_36 = arith.constant 0 : index
    %31 = vector.load %arg2[%c2_34, %c0_35, %c0_36] : memref<3x288x256xf32, #tpu.memory_space<vmem>>, vector<1x288x256xf32>
    %32 = vector.shape_cast %31 : vector<1x288x256xf32> to vector<288x256xf32>
    %cst_37 = arith.constant dense<0.000000e+00> : vector<32x256xf32>
    %33 = tpu.matmul %30, %32, %cst_37 {dimension_numbers = #tpu.dot_dimension_numbers<[1], [0], [0], [1], [0, 0, 1, 1], [], []>} : vector<32x288xf32>, vector<288x256xf32>, vector<32x256xf32> -> vector<32x256xf32>
    %34 = arith.addf %28, %33 : vector<32x256xf32>
    %cst_38 = arith.constant dense<0.000000e+00> : vector<256xf32>
    %35 = vector.multi_reduction <add>, %34, %cst_38 [0] : vector<32x256xf32> to vector<256xf32>
    %36 = vector.shape_cast %35 : vector<256xf32> to vector<1x256xf32>
    %37 = arith.mulf %34, %34 : vector<32x256xf32>
    %cst_39 = arith.constant dense<0.000000e+00> : vector<256xf32>
    %38 = vector.multi_reduction <add>, %37, %cst_39 [0] : vector<32x256xf32> to vector<256xf32>
    %39 = vector.shape_cast %38 : vector<256xf32> to vector<1x256xf32>
    %c16_i32 = arith.constant 16 : i32
    %40 = tpu.dynamic_rotate %36 by %c16_i32 dim 1 : vector<1x256xf32>, i32 -> vector<1x256xf32>
    %41 = arith.addf %36, %40 : vector<1x256xf32>
    %c32_i32 = arith.constant 32 : i32
    %42 = tpu.dynamic_rotate %41 by %c32_i32 dim 1 : vector<1x256xf32>, i32 -> vector<1x256xf32>
    %43 = arith.addf %41, %42 : vector<1x256xf32>
    %c64_i32 = arith.constant 64 : i32
    %44 = tpu.dynamic_rotate %43 by %c64_i32 dim 1 : vector<1x256xf32>, i32 -> vector<1x256xf32>
    %45 = arith.addf %43, %44 : vector<1x256xf32>
    %c128_i32 = arith.constant 128 : i32
    %46 = tpu.dynamic_rotate %45 by %c128_i32 dim 1 : vector<1x256xf32>, i32 -> vector<1x256xf32>
    %47 = arith.addf %45, %46 : vector<1x256xf32>
    %cst_40 = arith.constant 0.001953125 : f32
    %48 = vector.broadcast %cst_40 : f32 to vector<1x256xf32>
    %49 = arith.mulf %47, %48 : vector<1x256xf32>
    %c16_i32_41 = arith.constant 16 : i32
    %50 = tpu.dynamic_rotate %39 by %c16_i32_41 dim 1 : vector<1x256xf32>, i32 -> vector<1x256xf32>
    %51 = arith.addf %39, %50 : vector<1x256xf32>
    %c32_i32_42 = arith.constant 32 : i32
    %52 = tpu.dynamic_rotate %51 by %c32_i32_42 dim 1 : vector<1x256xf32>, i32 -> vector<1x256xf32>
    %53 = arith.addf %51, %52 : vector<1x256xf32>
    %c64_i32_43 = arith.constant 64 : i32
    %54 = tpu.dynamic_rotate %53 by %c64_i32_43 dim 1 : vector<1x256xf32>, i32 -> vector<1x256xf32>
    %55 = arith.addf %53, %54 : vector<1x256xf32>
    %c128_i32_44 = arith.constant 128 : i32
    %56 = tpu.dynamic_rotate %55 by %c128_i32_44 dim 1 : vector<1x256xf32>, i32 -> vector<1x256xf32>
    %57 = arith.addf %55, %56 : vector<1x256xf32>
    %cst_45 = arith.constant 0.001953125 : f32
    %58 = vector.broadcast %cst_45 : f32 to vector<1x256xf32>
    %59 = arith.mulf %57, %58 : vector<1x256xf32>
    %60 = arith.mulf %49, %49 : vector<1x256xf32>
    %61 = arith.subf %59, %60 : vector<1x256xf32>
    %cst_46 = arith.constant 9.99999974E-6 : f32
    %62 = vector.broadcast %cst_46 : f32 to vector<1x256xf32>
    %63 = arith.addf %61, %62 : vector<1x256xf32>
    %64 = math.rsqrt %63 : vector<1x256xf32>
    %65 = arith.mulf %12, %64 : vector<1x256xf32>
    %66 = arith.mulf %49, %65 : vector<1x256xf32>
    %67 = arith.subf %13, %66 : vector<1x256xf32>
    %68 = vector.broadcast %65 : vector<1x256xf32> to vector<32x256xf32>
    %69 = arith.mulf %34, %68 : vector<32x256xf32>
    %70 = vector.broadcast %67 : vector<1x256xf32> to vector<32x256xf32>
    %71 = arith.addf %69, %70 : vector<32x256xf32>
    %cst_47 = arith.constant 2.000000e-01 : f32
    %72 = vector.broadcast %cst_47 : f32 to vector<32x256xf32>
    %73 = arith.mulf %72, %71 : vector<32x256xf32>
    %74 = arith.maximumf %71, %73 : vector<32x256xf32>
    %75 = vector.shape_cast %74 : vector<32x256xf32> to vector<2x16x256xf32>
    %c0_48 = arith.constant 0 : index
    %c1_49 = arith.constant 1 : index
    %c16_50 = arith.constant 16 : index
    %76 = vector.load %arg6[%c0_48, %c1_49, %c16_50] : memref<2x18x288xf32, #tpu.memory_space<vmem>>, vector<2x16x256xf32>
    tpu.vector_store %arg6[%c0_48, %c1_49, %c16_50], %75 {strides = array<i32>} : memref<2x18x288xf32, #tpu.memory_space<vmem>>, vector<2x16x256xf32>,
    %cst_51 = arith.constant 0.000000e+00 : f32
    %77 = vector.broadcast %cst_51 : f32 to vector<32x256xf32>
    %c0_52 = arith.constant 0 : index
    %c0_53 = arith.constant 0 : index
    %c0_54 = arith.constant 0 : index
    %78 = vector.load %arg6[%c0_52, %c0_53, %c0_54] : memref<2x18x288xf32, #tpu.memory_space<vmem>>, vector<2x16x288xf32>
    %79 = vector.shape_cast %78 : vector<2x16x288xf32> to vector<32x288xf32>
    %c0_55 = arith.constant 0 : index
    %c0_56 = arith.constant 0 : index
    %c0_57 = arith.constant 0 : index
    %80 = vector.load %arg3[%c0_55, %c0_56, %c0_57] : memref<3x288x256xf32, #tpu.memory_space<vmem>>, vector<1x288x256xf32>
    %81 = vector.shape_cast %80 : vector<1x288x256xf32> to vector<288x256xf32>
    %cst_58 = arith.constant dense<0.000000e+00> : vector<32x256xf32>
    %82 = tpu.matmul %79, %81, %cst_58 {dimension_numbers = #tpu.dot_dimension_numbers<[1], [0], [0], [1], [0, 0, 1, 1], [], []>} : vector<32x288xf32>, vector<288x256xf32>, vector<32x256xf32> -> vector<32x256xf32>
    %83 = arith.addf %77, %82 : vector<32x256xf32>
    %c0_59 = arith.constant 0 : index
    %c1_60 = arith.constant 1 : index
    %c0_61 = arith.constant 0 : index
    %84 = vector.load %arg6[%c0_59, %c1_60, %c0_61] : memref<2x18x288xf32, #tpu.memory_space<vmem>>, vector<2x16x288xf32>
    %85 = vector.shape_cast %84 : vector<2x16x288xf32> to vector<32x288xf32>
    %c1_62 = arith.constant 1 : index
    %c0_63 = arith.constant 0 : index
    %c0_64 = arith.constant 0 : index
    %86 = vector.load %arg3[%c1_62, %c0_63, %c0_64] : memref<3x288x256xf32, #tpu.memory_space<vmem>>, vector<1x288x256xf32>
    %87 = vector.shape_cast %86 : vector<1x288x256xf32> to vector<288x256xf32>
    %cst_65 = arith.constant dense<0.000000e+00> : vector<32x256xf32>
    %88 = tpu.matmul %85, %87, %cst_65 {dimension_numbers = #tpu.dot_dimension_numbers<[1], [0], [0], [1], [0, 0, 1, 1], [], []>} : vector<32x288xf32>, vector<288x256xf32>, vector<32x256xf32> -> vector<32x256xf32>
    %89 = arith.addf %83, %88 : vector<32x256xf32>
    %c0_66 = arith.constant 0 : index
    %c2_67 = arith.constant 2 : index
    %c0_68 = arith.constant 0 : index
    %90 = vector.load %arg6[%c0_66, %c2_67, %c0_68] : memref<2x18x288xf32, #tpu.memory_space<vmem>>, vector<2x16x288xf32>
    %91 = vector.shape_cast %90 : vector<2x16x288xf32> to vector<32x288xf32>
    %c2_69 = arith.constant 2 : index
    %c0_70 = arith.constant 0 : index
    %c0_71 = arith.constant 0 : index
    %92 = vector.load %arg3[%c2_69, %c0_70, %c0_71] : memref<3x288x256xf32, #tpu.memory_space<vmem>>, vector<1x288x256xf32>
    %93 = vector.shape_cast %92 : vector<1x288x256xf32> to vector<288x256xf32>
    %cst_72 = arith.constant dense<0.000000e+00> : vector<32x256xf32>
    %94 = tpu.matmul %91, %93, %cst_72 {dimension_numbers = #tpu.dot_dimension_numbers<[1], [0], [0], [1], [0, 0, 1, 1], [], []>} : vector<32x288xf32>, vector<288x256xf32>, vector<32x256xf32> -> vector<32x256xf32>
    %95 = arith.addf %89, %94 : vector<32x256xf32>
    %cst_73 = arith.constant dense<0.000000e+00> : vector<256xf32>
    %96 = vector.multi_reduction <add>, %95, %cst_73 [0] : vector<32x256xf32> to vector<256xf32>
    %97 = vector.shape_cast %96 : vector<256xf32> to vector<1x256xf32>
    %98 = arith.mulf %95, %95 : vector<32x256xf32>
    %cst_74 = arith.constant dense<0.000000e+00> : vector<256xf32>
    %99 = vector.multi_reduction <add>, %98, %cst_74 [0] : vector<32x256xf32> to vector<256xf32>
    %100 = vector.shape_cast %99 : vector<256xf32> to vector<1x256xf32>
    %c16_i32_75 = arith.constant 16 : i32
    %101 = tpu.dynamic_rotate %97 by %c16_i32_75 dim 1 : vector<1x256xf32>, i32 -> vector<1x256xf32>
    %102 = arith.addf %97, %101 : vector<1x256xf32>
    %c32_i32_76 = arith.constant 32 : i32
    %103 = tpu.dynamic_rotate %102 by %c32_i32_76 dim 1 : vector<1x256xf32>, i32 -> vector<1x256xf32>
    %104 = arith.addf %102, %103 : vector<1x256xf32>
    %c64_i32_77 = arith.constant 64 : i32
    %105 = tpu.dynamic_rotate %104 by %c64_i32_77 dim 1 : vector<1x256xf32>, i32 -> vector<1x256xf32>
    %106 = arith.addf %104, %105 : vector<1x256xf32>
    %c128_i32_78 = arith.constant 128 : i32
    %107 = tpu.dynamic_rotate %106 by %c128_i32_78 dim 1 : vector<1x256xf32>, i32 -> vector<1x256xf32>
    %108 = arith.addf %106, %107 : vector<1x256xf32>
    %cst_79 = arith.constant 0.001953125 : f32
    %109 = vector.broadcast %cst_79 : f32 to vector<1x256xf32>
    %110 = arith.mulf %108, %109 : vector<1x256xf32>
    %c16_i32_80 = arith.constant 16 : i32
    %111 = tpu.dynamic_rotate %100 by %c16_i32_80 dim 1 : vector<1x256xf32>, i32 -> vector<1x256xf32>
    %112 = arith.addf %100, %111 : vector<1x256xf32>
    %c32_i32_81 = arith.constant 32 : i32
    %113 = tpu.dynamic_rotate %112 by %c32_i32_81 dim 1 : vector<1x256xf32>, i32 -> vector<1x256xf32>
    %114 = arith.addf %112, %113 : vector<1x256xf32>
    %c64_i32_82 = arith.constant 64 : i32
    %115 = tpu.dynamic_rotate %114 by %c64_i32_82 dim 1 : vector<1x256xf32>, i32 -> vector<1x256xf32>
    %116 = arith.addf %114, %115 : vector<1x256xf32>
    %c128_i32_83 = arith.constant 128 : i32
    %117 = tpu.dynamic_rotate %116 by %c128_i32_83 dim 1 : vector<1x256xf32>, i32 -> vector<1x256xf32>
    %118 = arith.addf %116, %117 : vector<1x256xf32>
    %cst_84 = arith.constant 0.001953125 : f32
    %119 = vector.broadcast %cst_84 : f32 to vector<1x256xf32>
    %120 = arith.mulf %118, %119 : vector<1x256xf32>
    %121 = arith.mulf %110, %110 : vector<1x256xf32>
    %122 = arith.subf %120, %121 : vector<1x256xf32>
    %cst_85 = arith.constant 9.99999974E-6 : f32
    %123 = vector.broadcast %cst_85 : f32 to vector<1x256xf32>
    %124 = arith.addf %122, %123 : vector<1x256xf32>
    %125 = math.rsqrt %124 : vector<1x256xf32>
    %126 = arith.mulf %14, %125 : vector<1x256xf32>
    %127 = arith.mulf %110, %126 : vector<1x256xf32>
    %128 = arith.subf %15, %127 : vector<1x256xf32>
    %129 = vector.broadcast %126 : vector<1x256xf32> to vector<32x256xf32>
    %130 = arith.mulf %95, %129 : vector<32x256xf32>
    %131 = vector.broadcast %128 : vector<1x256xf32> to vector<32x256xf32>
    %132 = arith.addf %130, %131 : vector<32x256xf32>
    %c0_86 = arith.constant 0 : index
    %c0_87 = arith.constant 0 : index
    %133 = vector.load %arg1[%c0_86, %c0_87] : memref<32x256xf32, #tpu.memory_space<vmem>>, vector<32x256xf32>
    %134 = arith.addf %132, %133 : vector<32x256xf32>
    %c0_88 = arith.constant 0 : index
    %c0_89 = arith.constant 0 : index
    %135 = vector.load %arg5[%c0_88, %c0_89] : memref<32x256xf32, #tpu.memory_space<vmem>>, vector<32x256xf32>
    tpu.vector_store %arg5[%c0_88, %c0_89], %134 {strides = array<i32>} : memref<32x256xf32, #tpu.memory_space<vmem>>, vector<32x256xf32>,
    return
  }
  func.func @transform_0(%arg0: i32) -> (i32, i32) {
    %c0_i32 = arith.constant 0 : i32
    %c0_i32_0 = arith.constant 0 : i32
    %c0_i32_1 = arith.constant 0 : i32
    return %c0_i32, %c0_i32_0 : i32, i32
  }
  func.func @transform_1(%arg0: i32) -> (i32, i32, i32) {
    %c0_i32 = arith.constant 0 : i32
    %c0_i32_0 = arith.constant 0 : i32
    %c0_i32_1 = arith.constant 0 : i32
    %c0_i32_2 = arith.constant 0 : i32
    return %c0_i32, %c0_i32_0, %c0_i32_1 : i32, i32, i32
  }
  func.func @transform_2(%arg0: i32) -> (i32, i32, i32) {
    %c0_i32 = arith.constant 0 : i32
    %c0_i32_0 = arith.constant 0 : i32
    %c0_i32_1 = arith.constant 0 : i32
    %c0_i32_2 = arith.constant 0 : i32
    return %c0_i32, %c0_i32_0, %c0_i32_1 : i32, i32, i32
  }
  func.func @transform_3(%arg0: i32) -> (i32, i32) {
    %c0_i32 = arith.constant 0 : i32
    %c0_i32_0 = arith.constant 0 : i32
    %c0_i32_1 = arith.constant 0 : i32
    return %c0_i32, %c0_i32_0 : i32, i32
  }
  func.func @transform_4(%arg0: i32) -> (i32, i32) {
    %c0_i32 = arith.constant 0 : i32
    %c0_i32_0 = arith.constant 0 : i32
    %c0_i32_1 = arith.constant 0 : i32
    return %c0_i32, %c0_i32_0 : i32, i32
  }
}

</mosaic_0001>

<bundles_post_ra>
// kernel: tpu_custom_call.1
= control target key start
LH: loop header
LB: loop body
LE: loop exit
PB: predicated region body
PF: predicated region fallthrough
CT: control target
= control target key end

     0   :  { %9 = vsyncpa [#allocation4], 0  ;;  %s3743_s0 = inlined_call_operand.hbm [shape: f32[32,256], index: 0, kind: input, shape index: {}]   ;;  %s3744_s1 = inlined_call_operand.hbm [shape: f32[3,288,256], index: 1, kind: input, shape index: {}]   ;;  %s3745_s2 = inlined_call_operand.hbm [shape: f32[3,288,256], index: 2, kind: input, shape index: {}]   ;;  %s3746_s3 = inlined_call_operand.vmem [shape: f32[4,256], index: 3, kind: input, shape index: {}]   ;;  %s3747_s4 = inlined_call_operand.hbm [shape: f32[32,256], index: 4, kind: output, shape index: {}]  }
   0x1   :  { %10 = vsyncpa [#allocation7], 0 }
   0x2   :  { %11 = vsyncpa [#allocation5], 0  ;;  %s3176_s15 = smov [#allocation6]   ;;  %s3177_s17 = smov [#allocation3]  }
   0x3   :  { %s29_s16 = sshll.u32 %s3176_s15, 4  ;;  %s17_s18 = sshll.u32 %s3177_s17, 4  ;;  %s30_s16 = int_to_ptr.vmem [resolvable:$true] %s29_s16  ;;  %s3210_s18 = int_to_ptr.vmem [resolvable:$true] %s17_s18 }
   0x4   :  { %s3082_s21 = scalar_lea.hbm %s3744_s1, 27648 }
   0x5   :  { %p3083_p0 = scmp.ne.s32.totalorder %s3744_s1, %s3082_s21  ;;  %p3086_p1 = scmp.lt.u32.totalorder %s3082_s21, %s3744_s1 }
   0x7   :  { %p3088_p2 = pnand %p3086_p1, %p3083_p0 }
   0x9   :  { %3091 = shalt.err (!%p3088_p2)
}
   0xa   :  { %s3092_s26 = scalar_lea.vmem %s30_s16, 27648  ;;  %p3097_p4 = scmp.lt.s32.totalorder %s30_s16, %s30_s16 }
   0xb   :  { %p3093_p3 = scmp.ne.s32.totalorder %s30_s16, %s3092_s26  ;;  %p3098_p5 = scmp.lt.s32.totalorder %s3092_s26, %s3092_s26 }
   0xd   :  { %p3099_p6 = por %p3098_p5, %p3097_p4 }
   0xf   :  { %p3100_p7 = pnand %p3099_p6, %p3093_p3 }
  0x11   :  { %3103 = shalt.err (!%p3100_p7)
}
  0x12   :  { %s3178_s27 = smov 256   ;;  %s3179_s28 = smov 16  }
  0x13   :  { %35 = dma.hbm_to_vmem [thread:$0]  %s3744_s1, 27648, %s30_s16, [#allocation7], %s3178_s27, %s3178_s27, %s3179_s28  }
  0x14   :  { %s3104_s7 = scalar_lea.hbm %s3743_s0, 1024 }
  0x15   :  { %p3105_p8 = scmp.ne.s32.totalorder %s3743_s0, %s3104_s7  ;;  %p3108_p9 = scmp.lt.u32.totalorder %s3104_s7, %s3743_s0 }
  0x17   :  { %p3110_p10 = pnand %p3108_p9, %p3105_p8 }
  0x19   :  { %3113 = shalt.err (!%p3110_p10)
}
  0x1a   :  { %s3114_s12 = scalar_lea.vmem %s3210_s18, 1024  ;;  %p3119_p12 = scmp.lt.s32.totalorder %s3210_s18, %s3210_s18 }
  0x1b   :  { %p3115_p11 = scmp.ne.s32.totalorder %s3210_s18, %s3114_s12  ;;  %p3120_p13 = scmp.lt.s32.totalorder %s3114_s12, %s3114_s12 }
  0x1d   :  { %p3121_p0 = por %p3120_p13, %p3119_p12 }
  0x1f   :  { %p3122_p1 = pnand %p3121_p0, %p3115_p11 }
  0x21   :  { %3125 = shalt.err (!%p3122_p1)
}
  0x22   :  { %23 = dma.hbm_to_vmem [thread:$0]  %s3743_s0, 1024, %s3210_s18, [#allocation4], %s3178_s27, %s3178_s27, %s3179_s28  }
  0x23   :  { %s3180_s14 = smov [#allocation8]   ;;  %s3126_s19 = scalar_lea.hbm %s3745_s2, 27648 }
  0x24   :  { %s41_s15 = sshll.u32 %s3180_s14, 4  ;;  %p3127_p2 = scmp.ne.s32.totalorder %s3745_s2, %s3126_s19  ;;  %s42_s15 = int_to_ptr.vmem [resolvable:$true] %s41_s15 }
  0x25   :  { %p3130_p3 = scmp.lt.u32.totalorder %s3126_s19, %s3745_s2 }
  0x27   :  { %p3132_p4 = pnand %p3130_p3, %p3127_p2 }
  0x29   :  { %3135 = shalt.err (!%p3132_p4)
}
  0x2a   :  { %s3136_s24 = scalar_lea.vmem %s42_s15, 27648  ;;  %p3141_p6 = scmp.lt.s32.totalorder %s42_s15, %s42_s15 }
  0x2b   :  { %p3137_p5 = scmp.ne.s32.totalorder %s42_s15, %s3136_s24  ;;  %p3142_p7 = scmp.lt.s32.totalorder %s3136_s24, %s3136_s24 }
  0x2d   :  { %p3143_p8 = por %p3142_p7, %p3141_p6 }
  0x2f   :  { %p3144_p9 = pnand %p3143_p8, %p3137_p5 }
  0x31   :  { %3147 = shalt.err (!%p3144_p9)
}
  0x32   :  { %47 = dma.hbm_to_vmem [thread:$0]  %s3745_s2, 27648, %s42_s15, [#allocation7], %s3178_s27, %s3178_s27, %s3179_s28  }
  0x33   :  { %3170 = dma.done.wait [#allocation4], 1024  }
  0x34   :  { %3171 = vsyncadd [#allocation4], 4294966272 }
  0x35   :  { %3172 = dma.done.wait [#allocation7], 55296  }
  0x36   :  { %3173 = vsyncadd [#allocation7], 4294912000  ;;  %v59_v0 = vlaneseq  ;;  %vm85_vm0 = vcmask 255104   ;;  %vm74_vm1 = vcmask 130048   ;;  %vm82_vm2 = vcmask 261248   ;;  %v93_v2 = vld [vmem:[#allocation3 + $0x18] sm:$0xff] }
  0x37   :  { %v3181_v1 = vmov 0.0   ;;  %vm77_vm4 = vcmask 123904   ;;  %v90_v3 = vld [vmem:[#allocation3] sm:$0xff]  ;;  %v91_v4 = vld [vmem:[#allocation3 + $0x8] sm:$0xff]  ;;  %v111_v5 = vrot.slane %v93_v2, 7  ;;  %v92_v7 = vld [vmem:[#allocation3 + $0x10] sm:$0xff] }
  0x38   :  { %vm61_vm3 = vcmp.lt.s32.totalorder %v59_v0, 288  ;;  %76 = vst.msk [vmem:[#allocation2 + $0x18] sm:$0xff] %vm74_vm1, %v3181_v1  ;;  %80 = vst.msk [vmem:[#allocation2 + $0x60] sm:$0xff] %vm74_vm1, %v3181_v1  ;;  %v107_v6 = vrot.slane %v90_v3, 7  ;;  %vm106_vm5 = vcmask 1040384   ;;  %v109_v8 = vrot.slane %v92_v7, 7 }
  0x39   :  { %84 = vst.msk [vmem:[#allocation2 + $0x28] sm:$0xff] %vm82_vm2, %v3181_v1  ;;  %88 = vst.msk [vmem:[#allocation2 + $0x70] sm:$0xff] %vm82_vm2, %v3181_v1  ;;  %v346_v9 = vld [vmem:[#allocation6 + $0x248] sm:$0xff]  ;;  %129 = vrot.lane.b32.xlu1 %v111_v5, %s3179_s28  ;;  %v108_v10 = vrot.slane %v91_v4, 7  ;;  %v348_v11 = vld [vmem:[#allocation6 + $0x258] sm:$0xff]  ;;  %vm179_vm6 = vcmask 122880  }
  0x3a   :  { %69 = vst.msk [vmem:[#allocation2 + $0x31] ss:$8 sm:$0x7] %vm61_vm3, %v3181_v1  ;;  %63 = vst.msk [vmem:[#allocation2] ss:$8 sm:$0x7] %vm61_vm3, %v3181_v1  ;;  %119 = vrot.lane.b32.xlu0 %v107_v6, %s3179_s28  ;;  %v110_v14 = vsel %vm106_vm5, %v107_v6, %v109_v8  ;;  %v2556_v15 = vpack.c.bf16 %v348_v11, %v346_v9 }
  0x3b   :  { %66 = vst.msk [vmem:[#allocation2 + $0x48] ss:$8 sm:$0x7] %vm61_vm3, %v3181_v1  ;;  %72 = vst.msk [vmem:[#allocation2 + $0x79] ss:$8 sm:$0x7] %vm61_vm3, %v3181_v1  ;;  %v112_v24 = vsel %vm106_vm5, %v108_v10, %v111_v5 }
  0x3c   :  { %86 = vst.msk [vmem:[#allocation2 + $0x40] sm:$0x3] %vm85_vm0, %v3181_v1  ;;  %89 = vst.msk [vmem:[#allocation2 + $0x88] sm:$0x3] %vm85_vm0, %v3181_v1  ;;  %v345_v12 = vld [vmem:[#allocation6 + $0x240] sm:$0xff]  ;;  %v347_v13 = vld [vmem:[#allocation6 + $0x250] sm:$0xff]  ;;  %2557 = vmatprep.subr.bf16.mxu0 %v2556_v15 }
  0x3d   :  { %75 = vst.msk [vmem:[#allocation2] sm:$0xff] %vm74_vm1, %v3181_v1  ;;  %79 = vst.msk [vmem:[#allocation2 + $0x48] sm:$0xff] %vm74_vm1, %v3181_v1  ;;  %v2558_v16 = vpack.c.bf16 %v347_v13, %v345_v12  ;;  %v350_v17 = vld [vmem:[#allocation6 + $0x268] sm:$0xff]  ;;  %v352_v18 = vld [vmem:[#allocation6 + $0x278] sm:$0xff]  ;;  %123 = vrot.lane.b32.xlu1 %v110_v14, %s3179_s28  ;;  %vm167_vm7 = vcmask 1047681   ;;  %vm170_vm8 = vcmask 130049  }
  0x3e   :  { %83 = vst.msk [vmem:[#allocation2 + $0x10] sm:$0xff] %vm82_vm2, %v3181_v1  ;;  %87 = vst.msk [vmem:[#allocation2 + $0x58] sm:$0xff] %vm82_vm2, %v3181_v1  ;;  %v2560_v19 = vpack.c.bf16 %v352_v18, %v350_v17  ;;  %v349_v20 = vld [vmem:[#allocation6 + $0x260] sm:$0xff]  ;;  %v351_v21 = vld [vmem:[#allocation6 + $0x270] sm:$0xff]  ;;  %121 = vrot.lane.b32.xlu0 %v108_v10, %s3179_s28  ;;  %vm172_vm9 = vcmask 1047680   ;;  %vm176_vm10 = vcmask 1040512  }
  0x3f   :  { %78 = vst.msk [vmem:[#allocation2 + $0x30] sm:$0x3] %vm77_vm4, %v3181_v1  ;;  %81 = vst.msk [vmem:[#allocation2 + $0x78] sm:$0x3] %vm77_vm4, %v3181_v1  ;;  %v354_v22 = vld [vmem:[#allocation6 + $0x288] sm:$0xff]  ;;  %v356_v23 = vld [vmem:[#allocation6 + $0x298] sm:$0xff]  ;;  %2559 = vmatpush1.bf16.msra.mxu0 %v2558_v16  ;;  %v2562_v28 = vpack.c.bf16 %v351_v21, %v349_v20 }
  0x40   :  { %v94_v25 = vld [vmem:[#allocation3 + $0x20] sm:$0xff]  ;;  %v95_v26 = vld [vmem:[#allocation3 + $0x28] sm:$0xff]  ;;  %v96_v27 = vld [vmem:[#allocation3 + $0x30] sm:$0xff]  ;;  %2561 = vmatprep.subr.bf16.mxu0 %v2560_v19  ;;  %v2564_v30 = vpack.c.bf16 %v356_v23, %v354_v22  ;;  %vm305_vm11 = vcmask 1046528   ;;  %vm417_vm12 = vcmask 261120   ;;  %vm816_vm13 = vcmask 1045504  }
  0x41   :  { %v97_v29 = vld [vmem:[#allocation3 + $0x38] sm:$0xff]  ;;  %v353_v31 = vld [vmem:[#allocation6 + $0x280] sm:$0xff]  ;;  %v355_v32 = vld [vmem:[#allocation6 + $0x290] sm:$0xff]  ;;  %125 = vrot.lane.b32.xlu1 %v112_v24, %s3179_s28  ;;  %v113_v35 = vrot.slane %v94_v25, 7  ;;  %v114_v36 = vrot.slane %v95_v26, 7  ;;  %v115_v37 = vrot.slane %v96_v27, 7 }
  0x42   :  { %v358_v33 = vld [vmem:[#allocation6 + $0x2a8] sm:$0xff]  ;;  %v360_v34 = vld [vmem:[#allocation6 + $0x2b8] sm:$0xff]  ;;  %127 = vrot.lane.b32.xlu0 %v109_v8, %s3179_s28  ;;  %v117_v38 = vrot.slane %v97_v29, 7  ;;  %v2566_v39 = vpack.c.bf16 %v355_v32, %v353_v31  ;;  %v357_v41 = vld [vmem:[#allocation6 + $0x2a0] sm:$0xff]  ;;  %s3182_s2 = smov 32   ;;  %s3183_s25 = smov 64  }
  0x43   :  { %2563 = vmatpush1.bf16.msra.mxu0 %v2562_v28  ;;  %v2568_v40 = vpack.c.bf16 %v360_v34, %v358_v33  ;;  %v359_v42 = vld [vmem:[#allocation6 + $0x2b0] sm:$0xff]  ;;  %v362_v43 = vld [vmem:[#allocation6 + $0x2c8] sm:$0xff]  ;;  %v364_v44 = vld [vmem:[#allocation6 + $0x2d8] sm:$0xff]  ;;  %v116_v45 = vsel %vm106_vm5, %v113_v35, %v115_v37 }
  0x44   :  { %2565 = vmatprep.subr.bf16.mxu0 %v2564_v30  ;;  %v118_v46 = vsel %vm106_vm5, %v114_v36, %v117_v38  ;;  %v2570_v47 = vpack.c.bf16 %v359_v42, %v357_v41  ;;  %v2572_v48 = vpack.c.bf16 %v364_v44, %v362_v43  ;;  %v361_v49 = vld [vmem:[#allocation6 + $0x2c0] sm:$0xff]  ;;  %v363_v50 = vld [vmem:[#allocation6 + $0x2d0] sm:$0xff]  ;;  %v366_v51 = vld [vmem:[#allocation6 + $0x2e8] sm:$0xff] }
  0x45   :  { %133 = vrot.lane.b32.xlu1 %v114_v36, %s3179_s28  ;;  %v368_v52 = vld [vmem:[#allocation6 + $0x2f8] sm:$0xff]  ;;  %v2574_v53 = vpack.c.bf16 %v363_v50, %v361_v49  ;;  %v365_v55 = vld [vmem:[#allocation6 + $0x2e0] sm:$0xff]  ;;  %v367_v56 = vld [vmem:[#allocation6 + $0x2f0] sm:$0xff] }
  0x46   :  { %131 = vrot.lane.b32.xlu0 %v113_v35, %s3179_s28  ;;  %v2576_v54 = vpack.c.bf16 %v368_v52, %v366_v51  ;;  %v370_v57 = vld [vmem:[#allocation6 + $0x308] sm:$0xff]  ;;  %v372_v58 = vld [vmem:[#allocation6 + $0x318] sm:$0xff]  ;;  %v2578_v59 = vpack.c.bf16 %v367_v56, %v365_v55  ;;  %v369_v61 = vld [vmem:[#allocation6 + $0x300] sm:$0xff] }
  0x47   :  { %2567 = vmatpush1.bf16.msra.mxu0 %v2566_v39  ;;  %v2580_v60 = vpack.c.bf16 %v372_v58, %v370_v57  ;;  %v371_v62 = vld [vmem:[#allocation6 + $0x310] sm:$0xff]  ;;  %v374_v63 = vld [vmem:[#allocation6 + $0x328] sm:$0xff]  ;;  %v376_v2 = vld [vmem:[#allocation6 + $0x338] sm:$0xff] }
  0x48   :  { %2569 = vmatprep.subr.bf16.mxu0 %v2568_v40  ;;  %v2582_v3 = vpack.c.bf16 %v371_v62, %v369_v61  ;;  %v2584_v4 = vpack.c.bf16 %v376_v2, %v374_v63  ;;  %v373_v5 = vld [vmem:[#allocation6 + $0x320] sm:$0xff]  ;;  %v375_v6 = vld [vmem:[#allocation6 + $0x330] sm:$0xff]  ;;  %v378_v7 = vld [vmem:[#allocation6 + $0x348] sm:$0xff] }
  0x49   :  { %137 = vrot.lane.b32.xlu1 %v118_v46, %s3179_s28  ;;  %v380_v8 = vld [vmem:[#allocation6 + $0x358] sm:$0xff]  ;;  %v2586_v9 = vpack.c.bf16 %v375_v6, %v373_v5  ;;  %v377_v11 = vld [vmem:[#allocation6 + $0x340] sm:$0xff]  ;;  %v379_v12 = vld [vmem:[#allocation6 + $0x350] sm:$0xff] }
  0x4a   :  { %135 = vrot.lane.b32.xlu0 %v116_v45, %s3179_s28  ;;  %v2588_v10 = vpack.c.bf16 %v380_v8, %v378_v7  ;;  %v382_v13 = vld [vmem:[#allocation6 + $0x368] sm:$0xff]  ;;  %v384_v14 = vld [vmem:[#allocation6 + $0x378] sm:$0xff]  ;;  %v2590_v15 = vpack.c.bf16 %v379_v12, %v377_v11  ;;  %v381_v17 = vld [vmem:[#allocation6 + $0x360] sm:$0xff] }
  0x4b   :  { %2571 = vmatpush1.bf16.msra.mxu0 %v2570_v47  ;;  %v2592_v16 = vpack.c.bf16 %v384_v14, %v382_v13  ;;  %v383_v18 = vld [vmem:[#allocation6 + $0x370] sm:$0xff]  ;;  %v386_v19 = vld [vmem:[#allocation6 + $0x388] sm:$0xff]  ;;  %v388_v20 = vld [vmem:[#allocation6 + $0x398] sm:$0xff] }
  0x4c   :  { %2573 = vmatprep.subr.bf16.mxu0 %v2572_v48  ;;  %v2594_v21 = vpack.c.bf16 %v383_v18, %v381_v17  ;;  %v2596_v22 = vpack.c.bf16 %v388_v20, %v386_v19  ;;  %v385_v23 = vld [vmem:[#allocation6 + $0x380] sm:$0xff]  ;;  %v387_v24 = vld [vmem:[#allocation6 + $0x390] sm:$0xff]  ;;  %v390_v25 = vld [vmem:[#allocation6 + $0x3a8] sm:$0xff] }
  0x4d   :  { %141 = vrot.lane.b32.xlu1 %v117_v38, %s3179_s28  ;;  %v392_v26 = vld [vmem:[#allocation6 + $0x3b8] sm:$0xff]  ;;  %v2598_v27 = vpack.c.bf16 %v387_v24, %v385_v23  ;;  %v389_v29 = vld [vmem:[#allocation6 + $0x3a0] sm:$0xff]  ;;  %v391_v30 = vld [vmem:[#allocation6 + $0x3b0] sm:$0xff] }
  0x4e   :  { %139 = vrot.lane.b32.xlu0 %v115_v37, %s3179_s28  ;;  %v2600_v28 = vpack.c.bf16 %v392_v26, %v390_v25  ;;  %v394_v31 = vld [vmem:[#allocation6 + $0x3c8] sm:$0xff]  ;;  %v396_v32 = vld [vmem:[#allocation6 + $0x3d8] sm:$0xff]  ;;  %v2602_v33 = vpack.c.bf16 %v391_v30, %v389_v29  ;;  %v393_v35 = vld [vmem:[#allocation6 + $0x3c0] sm:$0xff] }
  0x4f   :  { %2575 = vmatpush1.bf16.msra.mxu0 %v2574_v53  ;;  %v2604_v34 = vpack.c.bf16 %v396_v32, %v394_v31  ;;  %v395_v36 = vld [vmem:[#allocation6 + $0x3d0] sm:$0xff]  ;;  %v398_v37 = vld [vmem:[#allocation6 + $0x3e8] sm:$0xff]  ;;  %v400_v38 = vld [vmem:[#allocation6 + $0x3f8] sm:$0xff] }
  0x50   :  { %2577 = vmatprep.subr.bf16.mxu0 %v2576_v54  ;;  %v2606_v39 = vpack.c.bf16 %v395_v36, %v393_v35  ;;  %v2608_v40 = vpack.c.bf16 %v400_v38, %v398_v37  ;;  %v397_v41 = vld [vmem:[#allocation6 + $0x3e0] sm:$0xff]  ;;  %v399_v42 = vld [vmem:[#allocation6 + $0x3f0] sm:$0xff]  ;;  %v402_v43 = vld [vmem:[#allocation6 + $0x408] sm:$0xff] }
  0x51   :  { %v404_v44 = vld [vmem:[#allocation6 + $0x418] sm:$0xff]  ;;  %v2610_v45 = vpack.c.bf16 %v399_v42, %v397_v41  ;;  %v401_v47 = vld [vmem:[#allocation6 + $0x400] sm:$0xff]  ;;  %v403_v48 = vld [vmem:[#allocation6 + $0x410] sm:$0xff] }
  0x52   :  { %v2612_v46 = vpack.c.bf16 %v404_v44, %v402_v43  ;;  %v406_v49 = vld [vmem:[#allocation6 + $0x428] sm:$0xff]  ;;  %v408_v50 = vld [vmem:[#allocation6 + $0x438] sm:$0xff]  ;;  %v2614_v51 = vpack.c.bf16 %v403_v48, %v401_v47  ;;  %v405_v53 = vld [vmem:[#allocation6 + $0x420] sm:$0xff] }
  0x53   :  { %2579 = vmatpush1.bf16.msra.mxu0 %v2578_v59  ;;  %v2616_v52 = vpack.c.bf16 %v408_v50, %v406_v49  ;;  %v407_v54 = vld [vmem:[#allocation6 + $0x430] sm:$0xff]  ;;  %v410_v55 = vld [vmem:[#allocation6 + $0x448] sm:$0xff]  ;;  %v412_v56 = vld [vmem:[#allocation6 + $0x458] sm:$0xff] }
  0x54   :  { %2581 = vmatprep.subr.bf16.mxu0 %v2580_v60  ;;  %v2618_v57 = vpack.c.bf16 %v407_v54, %v405_v53  ;;  %v2620_v58 = vpack.c.bf16 %v412_v56, %v410_v55  ;;  %v409_v6 = vld [vmem:[#allocation6 + $0x440] sm:$0xff]  ;;  %v411_v11 = vld [vmem:[#allocation6 + $0x450] sm:$0xff]  ;;  %v204_v31 = vld [vmem:[#allocation6 + $0x8] sm:$0xff] }
  0x55   :  { %v2622_v20 = vpack.c.bf16 %v411_v11, %v409_v6  ;;  %v413_v26 = vld [vmem:[#allocation6 + $0x460] sm:$0xff]  ;;  %v206_v32 = vld [vmem:[#allocation6 + $0x18] sm:$0xff]  ;;  %v212_v11 = vld [vmem:[#allocation6 + $0x48] sm:$0xff] }
  0x57   :  { %2583 = vmatpush1.bf16.msra.mxu0 %v2582_v3 }
  0x58   :  { %2585 = vmatprep.subr.bf16.mxu0 %v2584_v4 }
  0x5b   :  { %2587 = vmatpush1.bf16.msra.mxu0 %v2586_v9 }
  0x5c   :  { %2589 = vmatprep.subr.bf16.mxu0 %v2588_v10 }
  0x5f   :  { %2591 = vmatpush1.bf16.msra.mxu0 %v2590_v15  ;;  %v414_v15 = vld [vmem:[#allocation6 + $0x468] sm:$0xff] }
  0x60   :  { %2593 = vmatprep.subr.bf16.mxu0 %v2592_v16  ;;  %v416_v16 = vld [vmem:[#allocation6 + $0x478] sm:$0xff] }
  0x61   :  { %v2624_v25 = vpack.c.bf16 %v416_v16, %v414_v15 }
  0x63   :  { %2595 = vmatpush1.bf16.msra.mxu0 %v2594_v21 }
  0x64   :  { %2597 = vmatprep.subr.bf16.mxu0 %v2596_v22 }
  0x67   :  { %2599 = vmatpush1.bf16.msra.mxu0 %v2598_v27  ;;  %v415_v27 = vld [vmem:[#allocation6 + $0x470] sm:$0xff] }
  0x68   :  { %2601 = vmatprep.subr.bf16.mxu0 %v2600_v28  ;;  %v2626_v35 = vpack.c.bf16 %v415_v27, %v413_v26 }
  0x6b   :  { %2603 = vmatpush1.bf16.msra.mxu0 %v2602_v33 }
  0x6c   :  { %2605 = vmatprep.subr.bf16.mxu0 %v2604_v34 }
  0x6f   :  { %2607 = vmatpush1.bf16.msra.mxu0 %v2606_v39  ;;  %v2628_v39 = vpack.c.bf16 %v206_v32, %v204_v31  ;;  %v220_v32 = vld [vmem:[#allocation6 + $0x88] sm:$0xff] }
  0x70   :  { %2609 = vmatprep.subr.bf16.mxu0 %v2608_v40 }
  0x73   :  { %2611 = vmatpush1.bf16.msra.mxu0 %v2610_v45 }
  0x74   :  { %2613 = vmatprep.subr.bf16.mxu0 %v2612_v46 }
  0x77   :  { %2615 = vmatpush1.bf16.msra.mxu0 %v2614_v51 }
  0x78   :  { %2617 = vmatprep.subr.bf16.mxu0 %v2616_v52 }
  0x7b   :  { %2619 = vmatpush1.bf16.msra.mxu0 %v2618_v57 }
  0x7c   :  { %2621 = vmatprep.subr.bf16.mxu0 %v2620_v58  ;;  %v203_v58 = vld [vmem:[#allocation6] sm:$0xff] }
  0xab   :  { %v130_v59 = vpop.permute.xlu1 %129 }
  0xac   :  { %v120_v60 = vpop.permute.xlu0 %119  ;;  %180 = vst.msk [vmem:[#allocation2 + $0x40] sm:$0x1] %vm179_vm6, %v130_v59 }
  0xad   :  { %168 = vst.msk [vmem:[#allocation2] sm:$0xfe] %vm167_vm7, %v120_v60 }
  0xaf   :  { %v124_v62 = vpop.permute.xlu1 %123 }
  0xb0   :  { %v122_v61 = vpop.permute.xlu0 %121  ;;  %173 = vst.msk [vmem:[#allocation2 + $0x18] sm:$0xff] %vm172_vm9, %v124_v62 }
  0xb1   :  { %v143_v63 = vsel %vm74_vm1, %v120_v60, %v122_v61  ;;  %171 = vst.msk [vmem:[#allocation2 + $0x10] sm:$0xfe] %vm170_vm8, %v122_v61 }
  0xb2   :  { %169 = vst [vmem:[#allocation2 + $0x8] sm:$0xfe] %v143_v63  ;;  %v210_v63 = vld [vmem:[#allocation6 + $0x38] sm:$0xff] }
  0xb3   :  { %v126_v3 = vpop.permute.xlu1 %125  ;;  %v280_v6 = vld [vmem:[#allocation2 + $0x40] sm:$0x1] }
  0xb4   :  { %v128_v2 = vpop.permute.xlu0 %127  ;;  %175 = vst.msk [vmem:[#allocation2 + $0x28] sm:$0xff] %vm74_vm1, %v126_v3  ;;  %v3314_v5 = vsel %vm74_vm1, %v124_v62, %v126_v3  ;;  %v275_v10 = vld [vmem:[#allocation2] sm:$0xfe]  ;;  %v208_v62 = vld [vmem:[#allocation6 + $0x28] sm:$0xff] }
  0xb5   :  { %v145_v4 = vsel %vm74_vm1, %v128_v2, %v130_v59  ;;  %177 = vst.msk [vmem:[#allocation2 + $0x30] sm:$0x1] %vm176_vm10, %v128_v2  ;;  %v310_v18 = vrot.slane %v3314_v5, 1  ;;  %v306_v19 = vrot.slane %v275_v10, 1  ;;  %v205_v59 = vld [vmem:[#allocation6 + $0x10] sm:$0xff] }
  0xb6   :  { %178 = vst [vmem:[#allocation2 + $0x38] sm:$0x1] %v145_v4  ;;  %v2630_v3 = vpack.c.bf16 %v205_v59, %v203_v58  ;;  %v2632_v4 = vpack.c.bf16 %v210_v63, %v208_v62  ;;  %v231_v59 = vld [vmem:[#allocation6 + $0xe0] sm:$0xff]  ;;  %v238_v62 = vld [vmem:[#allocation6 + $0x118] sm:$0xff] }
  0xb7   :  { %v134_v8 = vpop.permute.xlu1 %133  ;;  %v3316_v9 = vld [vmem:[#allocation2 + $0x18] sm:$0xff] }
  0xb8   :  { %v132_v7 = vpop.permute.xlu0 %131  ;;  %183 = vst.msk [vmem:[#allocation2 + $0x58] sm:$0xfe] %vm170_vm8, %v134_v8  ;;  %v307_v14 = vrot.slane %v3316_v9, 1  ;;  %v277_v57 = vld [vmem:[#allocation2 + $0x10] sm:$0xfe] }
  0xb9   :  { %181 = vst.msk [vmem:[#allocation2 + $0x48] sm:$0xfe] %vm167_vm7, %v132_v7  ;;  %v146_v12 = vsel %vm74_vm1, %v132_v7, %v134_v8  ;;  %v276_v13 = vld [vmem:[#allocation2 + $0x8] sm:$0xfe]  ;;  %v312_v2 = vrot.slane %v277_v57, 1  ;;  %v207_v7 = vld [vmem:[#allocation6 + $0x20] sm:$0xff] }
  0xba   :  { %182 = vst [vmem:[#allocation2 + $0x50] sm:$0xfe] %v146_v12  ;;  %v309_v17 = vrot.slane %v276_v13, 1  ;;  %v308_v28 = vsel %vm305_vm11, %v306_v19, %v307_v14  ;;  %v209_v8 = vld [vmem:[#allocation6 + $0x30] sm:$0xff]  ;;  %v214_v12 = vld [vmem:[#allocation6 + $0x58] sm:$0xff] }
  0xbb   :  { %v138_v22 = vpop.permute.xlu1 %137  ;;  %v3341_v55 = vld [vmem:[#allocation2 + $0x28] sm:$0xff]  ;;  %v2634_v15 = vpack.c.bf16 %v209_v8, %v207_v7  ;;  %v2636_v16 = vpack.c.bf16 %v214_v12, %v212_v11  ;;  %v213_v19 = vld [vmem:[#allocation6 + $0x50] sm:$0xff]  ;;  %v239_v11 = vld [vmem:[#allocation6 + $0x120] sm:$0xff] }
  0xbc   :  { %v136_v21 = vpop.permute.xlu0 %135  ;;  %v311_v23 = vsel %vm305_vm11, %v309_v17, %v310_v18  ;;  %v278_v24 = vld [vmem:[#allocation2 + $0x30] sm:$0x1]  ;;  %186 = vst.msk [vmem:[#allocation2 + $0x70] sm:$0xff] %vm74_vm1, %v138_v22  ;;  %v313_v61 = vrot.slane %v3341_v55, 1  ;;  %v242_v7 = vld [vmem:[#allocation6 + $0x138] sm:$0xff]  ;;  %v241_v12 = vld [vmem:[#allocation6 + $0x130] sm:$0xff] }
  0xbd   :  { %184 = vst.msk [vmem:[#allocation2 + $0x60] sm:$0xff] %vm172_vm9, %v136_v21  ;;  %490 = vmatprep.mubr.f32.mxu0 %v311_v23  ;;  %v279_v29 = vld [vmem:[#allocation2 + $0x38] sm:$0x1]  ;;  %v315_v30 = vrot.slane %v278_v24, 1  ;;  %v3328_v34 = vsel %vm74_vm1, %v136_v21, %v138_v22  ;;  %v218_v23 = vld [vmem:[#allocation6 + $0x78] sm:$0xff] }
  0xbe   :  { %491 = vmatmul.mubr.f32.vlgmr.msra.gmra.mrb[0].mxu0 %v308_v28  ;;  %v317_v33 = vrot.slane %v279_v29, 1  ;;  %v325_v44 = vrot.slane %v3328_v34, 1  ;;  %v314_v10 = vsel %vm305_vm11, %v312_v2, %v313_v61  ;;  %v216_v22 = vld [vmem:[#allocation6 + $0x68] sm:$0xff]  ;;  %v215_v28 = vld [vmem:[#allocation6 + $0x60] sm:$0xff]  ;;  %v217_v29 = vld [vmem:[#allocation6 + $0x70] sm:$0xff] }
  0xbf   :  { %2623 = vmatpush1.bf16.msra.mxu0 %v2622_v20  ;;  %v142_v37 = vpop.permute.xlu1 %141  ;;  %v316_v41 = vsel %vm305_vm11, %v307_v14, %v315_v30  ;;  %v319_v14 = vrot.slane %v280_v6, 1  ;;  %v283_v17 = vld [vmem:[#allocation2 + $0x58] sm:$0xfe]  ;;  %v2640_v27 = vpack.c.bf16 %v218_v23, %v216_v22 }
  0xc0   :  { %v140_v36 = vpop.permute.xlu0 %139  ;;  %v318_v38 = vsel %vm305_vm11, %v310_v18, %v317_v33  ;;  %2625 = vmatprep.subr.bf16.mxu0 %v2624_v25  ;;  %189 = vst.msk [vmem:[#allocation2 + $0x88] sm:$0x1] %vm179_vm6, %v142_v37  ;;  %v281_v45 = vld [vmem:[#allocation2 + $0x48] sm:$0xfe]  ;;  %v211_v18 = vld [vmem:[#allocation6 + $0x40] sm:$0xff]  ;;  %v327_v25 = vrot.slane %v283_v17, 1 }
  0xc1   :  { %187 = vst.msk [vmem:[#allocation2 + $0x78] sm:$0x1] %vm176_vm10, %v140_v36  ;;  %v148_v40 = vsel %vm74_vm1, %v140_v36, %v142_v37  ;;  %496 = vmatprep.mubr.f32.mxu0 %v318_v38  ;;  %v282_v42 = vld [vmem:[#allocation2 + $0x50] sm:$0xfe]  ;;  %v321_v48 = vrot.slane %v281_v45, 1  ;;  %v320_v20 = vsel %vm305_vm11, %v313_v61, %v319_v14  ;;  %v2638_v26 = vpack.c.bf16 %v213_v19, %v211_v18  ;;  %v222_v33 = vld [vmem:[#allocation6 + $0x98] sm:$0xff] }
  0xc2   :  { %188 = vst [vmem:[#allocation2 + $0x80] sm:$0x1] %v148_v40  ;;  %497 = vmatmul.mubr.f32.gmra.mrb[2].mxu0 %v316_v41  ;;  %v324_v43 = vrot.slane %v282_v42, 1  ;;  %v2644_v36 = vpack.c.bf16 %v222_v33, %v220_v32  ;;  %v219_v37 = vld [vmem:[#allocation6 + $0x80] sm:$0xff]  ;;  %v221_v38 = vld [vmem:[#allocation6 + $0x90] sm:$0xff]  ;;  %v224_v40 = vld [vmem:[#allocation6 + $0xa8] sm:$0xff] }
  0xc3   :  { %2627 = vmatpush1.bf16.msra.mxu0 %v2626_v35  ;;  %v3349_v13 = vld [vmem:[#allocation2 + $0x70] sm:$0xff]  ;;  %v2642_v35 = vpack.c.bf16 %v217_v29, %v215_v28  ;;  %v226_v41 = vld [vmem:[#allocation6 + $0xb8] sm:$0xff]  ;;  %v236_v61 = vld [vmem:[#allocation6 + $0x108] sm:$0xff] }
  0xc4   :  { %v326_v46 = vsel %vm305_vm11, %v324_v43, %v325_v44  ;;  %v3337_v47 = vld [vmem:[#allocation2 + $0x60] sm:$0xff]  ;;  %2629 = vmatprep.subr.bf16.mxu0 %v2628_v39  ;;  %v328_v21 = vrot.slane %v3349_v13, 1  ;;  %v192_v42 = vld [vmem:[#allocation2 + $0x8] sm:$0xff]  ;;  %v2646_v43 = vpack.c.bf16 %v221_v38, %v219_v37  ;;  %v223_v45 = vld [vmem:[#allocation6 + $0xa0] sm:$0xff]  ;;  %v2660_v2 = vpack.c.bf16 %v238_v62, %v236_v61 }
  0xc5   :  { %502 = vmatprep.mubr.f32.mxu0 %v326_v46  ;;  %v322_v49 = vrot.slane %v3337_v47, 1  ;;  %v225_v46 = vld [vmem:[#allocation6 + $0xb0] sm:$0xff]  ;;  %v240_v6 = vld [vmem:[#allocation6 + $0x128] sm:$0xff]  ;;  %v243_v18 = vld [vmem:[#allocation6 + $0x140] sm:$0xff] }
  0xc6   :  { %v329_v30 = vsel %vm305_vm11, %v327_v25, %v328_v21  ;;  %v244_v14 = vld [vmem:[#allocation6 + $0x148] sm:$0xff]  ;;  %v245_v19 = vld [vmem:[#allocation6 + $0x150] sm:$0xff]  ;;  %v258_v33 = vld [vmem:[#allocation6 + $0x1b8] sm:$0xff] }
  0xc7   :  { %v323_v50 = vsel %vm305_vm11, %v321_v48, %v322_v49  ;;  %v286_v24 = vld [vmem:[#allocation2 + $0x88] sm:$0x1]  ;;  %v228_v48 = vld [vmem:[#allocation6 + $0xc8] sm:$0xff]  ;;  %v2670_v22 = vpack.c.bf16 %v245_v19, %v243_v18  ;;  %v249_v25 = vld [vmem:[#allocation6 + $0x170] sm:$0xff] }
  0xc8   :  { %503 = vmatmul.mubr.f32.gmra.mrb[4].mxu0 %v323_v50  ;;  %v284_v51 = vld [vmem:[#allocation2 + $0x78] sm:$0x1]  ;;  %v334_v31 = vrot.slane %v286_v24, 1  ;;  %v2650_v50 = vpack.c.bf16 %v225_v46, %v223_v45  ;;  %v247_v24 = vld [vmem:[#allocation6 + $0x160] sm:$0xff]  ;;  %v257_v38 = vld [vmem:[#allocation6 + $0x1b0] sm:$0xff] }
  0xc9   :  { %v285_v52 = vld [vmem:[#allocation2 + $0x80] sm:$0x1]  ;;  %v330_v53 = vrot.slane %v284_v51, 1  ;;  %v2674_v28 = vpack.c.bf16 %v249_v25, %v247_v24  ;;  %v256_v32 = vld [vmem:[#allocation6 + $0x1a8] sm:$0xff]  ;;  %v255_v37 = vld [vmem:[#allocation6 + $0x1a0] sm:$0xff] }
  0xca   :  { %v332_v54 = vrot.slane %v285_v52, 1  ;;  %v335_v39 = vsel %vm305_vm11, %v328_v21, %v334_v31  ;;  %v227_v52 = vld [vmem:[#allocation6 + $0xc0] sm:$0xff]  ;;  %v250_v21 = vld [vmem:[#allocation6 + $0x178] sm:$0xff]  ;;  %v253_v31 = vld [vmem:[#allocation6 + $0x190] sm:$0xff] }
  0xcb   :  { %v331_v60 = vsel %vm305_vm11, %v322_v49, %v330_v53  ;;  %v230_v49 = vld [vmem:[#allocation6 + $0xd8] sm:$0xff]  ;;  %v229_v53 = vld [vmem:[#allocation6 + $0xd0] sm:$0xff]  ;;  %v264_v45 = vld [vmem:[#allocation6 + $0x1e8] sm:$0xff] }
  0xcc   :  { %v333_v56 = vsel %vm305_vm11, %v325_v44, %v332_v54  ;;  %v2648_v44 = vpack.c.bf16 %v226_v41, %v224_v40  ;;  %v2652_v51 = vpack.c.bf16 %v230_v49, %v228_v48  ;;  %v232_v54 = vld [vmem:[#allocation6 + $0xe8] sm:$0xff]  ;;  %v2654_v57 = vpack.c.bf16 %v229_v53, %v227_v52  ;;  %v262_v40 = vld [vmem:[#allocation6 + $0x1d8] sm:$0xff]  ;;  %v860_v19 = vld [vmem:[#allocation6 + $0x4a0] sm:$0xff] }
  0xcd   :  { %508 = vmatprep.mubr.f32.mxu0 %v333_v56  ;;  %v234_v56 = vld [vmem:[#allocation6 + $0xf8] sm:$0xff]  ;;  %v2682_v41 = vpack.c.bf16 %v257_v38, %v255_v37  ;;  %v268_v52 = vld [vmem:[#allocation6 + $0x208] sm:$0xff] }
  0xce   :  { %509 = vmatmul.mubr.f32.gmra.mrb[6].mxu0 %v331_v60  ;;  %v2656_v58 = vpack.c.bf16 %v234_v56, %v232_v54  ;;  %v233_v60 = vld [vmem:[#allocation6 + $0xf0] sm:$0xff]  ;;  %v266_v46 = vld [vmem:[#allocation6 + $0x1f8] sm:$0xff]  ;;  %v873_v37 = vld [vmem:[#allocation6 + $0x508] sm:$0xff] }
  0xcf   :  { %579 = vmatprep.mubr.f32.mxu0 %v3181_v1  ;;  %v2658_v63 = vpack.c.bf16 %v233_v60, %v231_v59  ;;  %v2688_v49 = vpack.c.bf16 %v266_v46, %v264_v45  ;;  %v270_v53 = vld [vmem:[#allocation6 + $0x218] sm:$0xff]  ;;  %v272_v59 = vld [vmem:[#allocation6 + $0x228] sm:$0xff] }
  0xd0   :  { %v2692_v56 = vpack.c.bf16 %v270_v53, %v268_v52  ;;  %v274_v60 = vld [vmem:[#allocation6 + $0x238] sm:$0xff]  ;;  %v877_v45 = vld [vmem:[#allocation6 + $0x528] sm:$0xff]  ;;  %v878_v52 = vld [vmem:[#allocation6 + $0x530] sm:$0xff] }
  0xd1   :  { %v2696_v62 = vpack.c.bf16 %v274_v60, %v272_v59  ;;  %v875_v38 = vld [vmem:[#allocation6 + $0x518] sm:$0xff]  ;;  %v881_v53 = vld [vmem:[#allocation6 + $0x548] sm:$0xff]  ;;  %v882_v59 = vld [vmem:[#allocation6 + $0x550] sm:$0xff] }
  0xd2   :  { %2532 = vmatmul.mubr.msk.f32.vlgmr.msra.gmra.mrb[0].mxu0 %vm417_vm12, %v314_v10  ;;  %v2664_v10 = vpack.c.bf16 %v242_v7, %v240_v6  ;;  %v859_v6 = vld [vmem:[#allocation6 + $0x498] sm:$0xff]  ;;  %v885_v60 = vld [vmem:[#allocation6 + $0x568] sm:$0xff] }
  0xd3   :  { %2631 = vmatpush1.bf16.msra.mxu0 %v2630_v3  ;;  %585 = vmatprep.mubr.f32.mxu0 %v3181_v1  ;;  %v235_v3 = vld [vmem:[#allocation6 + $0x100] sm:$0xff]  ;;  %v879_v46 = vld [vmem:[#allocation6 + $0x538] sm:$0xff] }
  0xd4   :  { %2633 = vmatprep.subr.bf16.mxu0 %v2632_v4  ;;  %v237_v4 = vld [vmem:[#allocation6 + $0x110] sm:$0xff] }
  0xd5   :  { %v2662_v8 = vpack.c.bf16 %v237_v4, %v235_v3  ;;  %v191_v3 = vld [vmem:[#allocation2] sm:$0xff]  ;;  %v857_v4 = vld [vmem:[#allocation6 + $0x488] sm:$0xff] }
  0xd6   :  { %2533 = vmatmul.mubr.msk.f32.gmra.mrb[2].mxu0 %vm417_vm12, %v320_v20  ;;  %v248_v20 = vld [vmem:[#allocation6 + $0x168] sm:$0xff] }
  0xd7   :  { %2635 = vmatpush1.bf16.msra.mxu0 %v2634_v15  ;;  %591 = vmatprep.mubr.f32.mxu0 %v3181_v1  ;;  %v246_v15 = vld [vmem:[#allocation6 + $0x158] sm:$0xff]  ;;  %v2672_v23 = vpack.c.bf16 %v250_v21, %v248_v20  ;;  %v862_v20 = vld [vmem:[#allocation6 + $0x4b0] sm:$0xff]  ;;  %v193_v21 = vld [vmem:[#allocation2 + $0x10] sm:$0xff] }
  0xd8   :  { %2637 = vmatprep.subr.bf16.mxu0 %v2636_v16  ;;  %v2666_v16 = vpack.c.bf16 %v241_v12, %v239_v11  ;;  %v2668_v17 = vpack.c.bf16 %v246_v15, %v244_v14  ;;  %v197_v11 = vld [vmem:[#allocation2 + $0x48] sm:$0xff]  ;;  %v856_v12 = vld [vmem:[#allocation6 + $0x480] sm:$0xff]  ;;  %v858_v14 = vld [vmem:[#allocation6 + $0x490] sm:$0xff]  ;;  %v2706_v24 = vpack.c.bf16 %v862_v20, %v860_v19 }
  0xd9   :  { %v861_v15 = vld [vmem:[#allocation6 + $0x4a8] sm:$0xff]  ;;  %v899_v20 = vld [vmem:[#allocation6 + $0x5d8] sm:$0xff] }
  0xda   :  { %2534 = vmatmul.mubr.msk.f32.gmra.mrb[4].mxu0 %vm417_vm12, %v329_v30  ;;  %v251_v30 = vld [vmem:[#allocation6 + $0x180] sm:$0xff]  ;;  %v897_v19 = vld [vmem:[#allocation6 + $0x5c8] sm:$0xff] }
  0xdb   :  { %2639 = vmatpush1.bf16.msra.mxu0 %v2638_v26  ;;  %597 = vmatprep.mubr.f32.mxu0 %v3181_v1  ;;  %v252_v26 = vld [vmem:[#allocation6 + $0x188] sm:$0xff] }
  0xdc   :  { %2641 = vmatprep.subr.bf16.mxu0 %v2640_v27  ;;  %v254_v27 = vld [vmem:[#allocation6 + $0x198] sm:$0xff] }
  0xdd   :  { %v2676_v29 = vpack.c.bf16 %v254_v27, %v252_v26  ;;  %v864_v26 = vld [vmem:[#allocation6 + $0x4c0] sm:$0xff]  ;;  %v866_v27 = vld [vmem:[#allocation6 + $0x4d0] sm:$0xff] }
  0xde   :  { %2535 = vmatmul.mubr.msk.f32.gmra.mrb[6].mxu0 %vm417_vm12, %v335_v39  ;;  %v260_v39 = vld [vmem:[#allocation6 + $0x1c8] sm:$0xff] }
  0xdf   :  { %2643 = vmatpush1.bf16.msra.mxu0 %v2642_v35  ;;  %678 = vmatprep.mubr.f32.mxu0 %v192_v42  ;;  %v2678_v35 = vpack.c.bf16 %v253_v31, %v251_v30  ;;  %v2684_v42 = vpack.c.bf16 %v262_v40, %v260_v39  ;;  %v2710_v30 = vpack.c.bf16 %v866_v27, %v864_v26  ;;  %v793_v31 = vld [vmem:[#allocation2 + $0x8] sm:$0xfc] }
  0xe0   :  { %2645 = vmatprep.subr.bf16.mxu0 %v2644_v36  ;;  %v2680_v36 = vpack.c.bf16 %v258_v33, %v256_v32  ;;  %v868_v33 = vld [vmem:[#allocation6 + $0x4e0] sm:$0xff]  ;;  %v820_v39 = vrot.slane %v793_v31, 2  ;;  %v903_v26 = vld [vmem:[#allocation6 + $0x5f8] sm:$0xff]  ;;  %v905_v31 = vld [vmem:[#allocation6 + $0x608] sm:$0xff] }
  0xe3   :  { %2647 = vmatpush1.bf16.msra.mxu0 %v2646_v43  ;;  %v259_v43 = vld [vmem:[#allocation6 + $0x1c0] sm:$0xff] }
  0xe4   :  { %2649 = vmatprep.subr.bf16.mxu0 %v2648_v44  ;;  %v261_v44 = vld [vmem:[#allocation6 + $0x1d0] sm:$0xff] }
  0xe5   :  { %v2686_v48 = vpack.c.bf16 %v261_v44, %v259_v43  ;;  %v872_v43 = vld [vmem:[#allocation6 + $0x500] sm:$0xff]  ;;  %v874_v44 = vld [vmem:[#allocation6 + $0x510] sm:$0xff] }
  0xe7   :  { %2651 = vmatpush1.bf16.msra.mxu0 %v2650_v50  ;;  %v263_v50 = vld [vmem:[#allocation6 + $0x1e0] sm:$0xff] }
  0xe8   :  { %2653 = vmatprep.subr.bf16.mxu0 %v2652_v51  ;;  %v265_v51 = vld [vmem:[#allocation6 + $0x1f0] sm:$0xff] }
  0xe9   :  { %v2690_v54 = vpack.c.bf16 %v265_v51, %v263_v50  ;;  %v2720_v50 = vpack.c.bf16 %v879_v46, %v877_v45  ;;  %v876_v51 = vld [vmem:[#allocation6 + $0x520] sm:$0xff]  ;;  %v913_v45 = vld [vmem:[#allocation6 + $0x648] sm:$0xff]  ;;  %v915_v46 = vld [vmem:[#allocation6 + $0x658] sm:$0xff] }
  0xeb   :  { %2655 = vmatpush1.bf16.msra.mxu0 %v2654_v57  ;;  %v267_v57 = vld [vmem:[#allocation6 + $0x200] sm:$0xff] }
  0xec   :  { %2657 = vmatprep.subr.bf16.mxu0 %v2656_v58  ;;  %v269_v58 = vld [vmem:[#allocation6 + $0x210] sm:$0xff] }
  0xed   :  { %v2694_v61 = vpack.c.bf16 %v269_v58, %v267_v57  ;;  %v880_v58 = vld [vmem:[#allocation6 + $0x540] sm:$0xff] }
  0xef   :  { %2659 = vmatpush1.bf16.msra.mxu0 %v2658_v63  ;;  %v271_v63 = vld [vmem:[#allocation6 + $0x220] sm:$0xff] }
  0xf0   :  { %2661 = vmatprep.subr.bf16.mxu0 %v2660_v2  ;;  %v273_v2 = vld [vmem:[#allocation6 + $0x230] sm:$0xff] }
  0xf1   :  { %v2698_v7 = vpack.c.bf16 %v273_v2, %v271_v63  ;;  %v884_v2 = vld [vmem:[#allocation6 + $0x560] sm:$0xff] }
  0xf3   :  { %2663 = vmatpush1.bf16.msra.mxu0 %v2662_v8  ;;  %v2700_v8 = vpack.c.bf16 %v859_v6, %v857_v4  ;;  %v889_v4 = vld [vmem:[#allocation6 + $0x588] sm:$0xff]  ;;  %v891_v6 = vld [vmem:[#allocation6 + $0x598] sm:$0xff] }
  0xf4   :  { %2665 = vmatprep.subr.bf16.mxu0 %v2664_v10  ;;  %v198_v10 = vld [vmem:[#allocation2 + $0x50] sm:$0xff] }
  0xf7   :  { %2667 = vmatpush1.bf16.msra.mxu0 %v2666_v16  ;;  %v863_v16 = vld [vmem:[#allocation6 + $0x4b8] sm:$0xff] }
  0xf8   :  { %2669 = vmatprep.subr.bf16.mxu0 %v2668_v17  ;;  %v2702_v17 = vpack.c.bf16 %v858_v14, %v856_v12  ;;  %v2704_v18 = vpack.c.bf16 %v863_v16, %v861_v15  ;;  %v893_v12 = vld [vmem:[#allocation6 + $0x5a8] sm:$0xff]  ;;  %v895_v14 = vld [vmem:[#allocation6 + $0x5b8] sm:$0xff] }
  0xf9   :  { %v2736_v16 = vpack.c.bf16 %v895_v14, %v893_v12 }
  0xfb   :  { %2671 = vmatpush1.bf16.msra.mxu0 %v2670_v22  ;;  %v865_v22 = vld [vmem:[#allocation6 + $0x4c8] sm:$0xff] }
  0xfc   :  { %2673 = vmatprep.subr.bf16.mxu0 %v2672_v23  ;;  %v867_v23 = vld [vmem:[#allocation6 + $0x4d8] sm:$0xff] }
  0xfd   :  { %v2708_v25 = vpack.c.bf16 %v867_v23, %v865_v22  ;;  %v2740_v22 = vpack.c.bf16 %v899_v20, %v897_v19  ;;  %v896_v23 = vld [vmem:[#allocation6 + $0x5c0] sm:$0xff] }
  0xff   :  { %2675 = vmatpush1.bf16.msra.mxu0 %v2674_v28  ;;  %v869_v28 = vld [vmem:[#allocation6 + $0x4e8] sm:$0xff] }
 0x100   :  { %2677 = vmatprep.subr.bf16.mxu0 %v2676_v29  ;;  %v871_v29 = vld [vmem:[#allocation6 + $0x4f8] sm:$0xff] }
 0x101   :  { %v2712_v32 = vpack.c.bf16 %v871_v29, %v869_v28  ;;  %v900_v29 = vld [vmem:[#allocation6 + $0x5e0] sm:$0xff] }
 0x103   :  { %2679 = vmatpush1.bf16.msra.mxu0 %v2678_v35  ;;  %v870_v35 = vld [vmem:[#allocation6 + $0x4f0] sm:$0xff] }
 0x104   :  { %2681 = vmatprep.subr.bf16.mxu0 %v2680_v36  ;;  %v199_v36 = vld [vmem:[#allocation2 + $0x58] sm:$0xff]  ;;  %v2714_v40 = vpack.c.bf16 %v870_v35, %v868_v33 }
 0x107   :  { %2683 = vmatpush1.bf16.msra.mxu0 %v2682_v41  ;;  %v821_v41 = vrot.slane %v3314_v5, 2 }
 0x108   :  { %2685 = vmatprep.subr.bf16.mxu0 %v2684_v42  ;;  %v2716_v42 = vpack.c.bf16 %v875_v38, %v873_v37  ;;  %v906_v37 = vld [vmem:[#allocation6 + $0x610] sm:$0xff]  ;;  %v909_v38 = vld [vmem:[#allocation6 + $0x628] sm:$0xff] }
 0x10b   :  { %2687 = vmatpush1.bf16.msra.mxu0 %v2686_v48  ;;  %v822_v48 = vsel %vm816_vm13, %v820_v39, %v821_v41  ;;  %v911_v39 = vld [vmem:[#allocation6 + $0x638] sm:$0xff] }
 0x10c   :  { %2689 = vmatprep.subr.bf16.mxu0 %v2688_v49  ;;  %v2718_v49 = vpack.c.bf16 %v874_v44, %v872_v43  ;;  %v908_v43 = vld [vmem:[#allocation6 + $0x620] sm:$0xff]  ;;  %v910_v44 = vld [vmem:[#allocation6 + $0x630] sm:$0xff] }
 0x10f   :  { %2691 = vmatpush1.bf16.msra.mxu0 %v2690_v54  ;;  %v883_v54 = vld [vmem:[#allocation6 + $0x558] sm:$0xff] }
 0x110   :  { %2693 = vmatprep.subr.bf16.mxu0 %v2692_v56  ;;  %v2722_v56 = vpack.c.bf16 %v878_v52, %v876_v51  ;;  %v2724_v57 = vpack.c.bf16 %v883_v54, %v881_v53  ;;  %v914_v51 = vld [vmem:[#allocation6 + $0x650] sm:$0xff]  ;;  %v917_v52 = vld [vmem:[#allocation6 + $0x668] sm:$0xff]  ;;  %v919_v53 = vld [vmem:[#allocation6 + $0x678] sm:$0xff] }
 0x112   :  { %679 = vmatmul.mubr.f32.vlgmr.msra.gmra.mrb[0].mxu0 %v191_v3  ;;  %v886_v3 = vld [vmem:[#allocation6 + $0x570] sm:$0xff] }
 0x113   :  { %684 = vmatprep.mubr.f32.mxu0 %v3314_v5  ;;  %2695 = vmatpush1.bf16.msra.mxu0 %v2694_v61  ;;  %v887_v61 = vld [vmem:[#allocation6 + $0x578] sm:$0xff]  ;;  %v801_v5 = vld [vmem:[#allocation2 + $0x78] sm:$0x3] }
 0x114   :  { %2697 = vmatprep.subr.bf16.mxu0 %v2696_v62  ;;  %v2726_v62 = vpack.c.bf16 %v882_v59, %v880_v58  ;;  %v2728_v63 = vpack.c.bf16 %v887_v61, %v885_v60  ;;  %v918_v58 = vld [vmem:[#allocation6 + $0x670] sm:$0xff]  ;;  %v921_v59 = vld [vmem:[#allocation6 + $0x688] sm:$0xff]  ;;  %v923_v60 = vld [vmem:[#allocation6 + $0x698] sm:$0xff] }
 0x116   :  { %685 = vmatmul.mubr.f32.gmra.mrb[2].mxu0 %v3316_v9 }
 0x117   :  { %690 = vmatprep.mubr.f32.mxu0 %v198_v10  ;;  %2699 = vmatpush1.bf16.msra.mxu0 %v2698_v7  ;;  %v2730_v7 = vpack.c.bf16 %v886_v3, %v884_v2  ;;  %v888_v10 = vld [vmem:[#allocation6 + $0x580] sm:$0xff]  ;;  %v2764_v2 = vpack.c.bf16 %v923_v60, %v921_v59 }
 0x118   :  { %2701 = vmatprep.subr.bf16.mxu0 %v2700_v8  ;;  %v2732_v8 = vpack.c.bf16 %v891_v6, %v889_v4  ;;  %v920_v3 = vld [vmem:[#allocation6 + $0x680] sm:$0xff]  ;;  %v922_v4 = vld [vmem:[#allocation6 + $0x690] sm:$0xff]  ;;  %v818_v6 = vrot.slane %v3316_v9, 2 }
 0x119   :  { %v2766_v14 = vpack.c.bf16 %v922_v4, %v920_v3 }
 0x11a   :  { %691 = vmatmul.mubr.f32.gmra.mrb[4].mxu0 %v197_v11  ;;  %v890_v11 = vld [vmem:[#allocation6 + $0x590] sm:$0xff] }
 0x11b   :  { %696 = vmatprep.mubr.f32.mxu0 %v3328_v34  ;;  %v2734_v15 = vpack.c.bf16 %v890_v11, %v888_v10  ;;  %v795_v11 = vld [vmem:[#allocation2 + $0x30] sm:$0x3] }
 0x11c   :  { %v826_v20 = vrot.slane %v795_v11, 2 }
 0x11e   :  { %697 = vmatmul.mubr.f32.gmra.mrb[6].mxu0 %v3337_v47 }
 0x11f   :  { %767 = vmatprep.mubr.f32.mxu0 %v3181_v1 }
 0x122   :  { %2536 = vmatmul.mubr.msk.f32.vlgmr.msra.gmra.mrb[0].mxu0 %vm417_vm12, %v193_v21 }
 0x123   :  { %2703 = vmatpush1.bf16.msra.mxu0 %v2702_v17  ;;  %773 = vmatprep.mubr.f32.mxu0 %v3181_v1  ;;  %v892_v17 = vld [vmem:[#allocation6 + $0x5a0] sm:$0xff] }
 0x124   :  { %2705 = vmatprep.subr.bf16.mxu0 %v2704_v18  ;;  %v894_v18 = vld [vmem:[#allocation6 + $0x5b0] sm:$0xff] }
 0x125   :  { %v2738_v21 = vpack.c.bf16 %v894_v18, %v892_v17  ;;  %v924_v17 = vld [vmem:[#allocation6 + $0x6a0] sm:$0xff]  ;;  %v926_v18 = vld [vmem:[#allocation6 + $0x6b0] sm:$0xff] }
 0x126   :  { %2537 = vmatmul.mubr.msk.f32.gmra.mrb[2].mxu0 %vm417_vm12, %v3341_v55 }
 0x127   :  { %2707 = vmatpush1.bf16.msra.mxu0 %v2706_v24  ;;  %779 = vmatprep.mubr.f32.mxu0 %v3181_v1  ;;  %v898_v24 = vld [vmem:[#allocation6 + $0x5d0] sm:$0xff] }
 0x128   :  { %2709 = vmatprep.subr.bf16.mxu0 %v2708_v25  ;;  %v901_v25 = vld [vmem:[#allocation6 + $0x5e8] sm:$0xff]  ;;  %v2742_v27 = vpack.c.bf16 %v898_v24, %v896_v23  ;;  %v2770_v23 = vpack.c.bf16 %v926_v18, %v924_v17  ;;  %v836_v24 = vrot.slane %v3328_v34, 2 }
 0x129   :  { %v2744_v28 = vpack.c.bf16 %v903_v26, %v901_v25  ;;  %v798_v25 = vld [vmem:[#allocation2 + $0x48] sm:$0xfc]  ;;  %v827_v26 = vsel %vm816_vm13, %v818_v6, %v826_v20 }
 0x12a   :  { %2538 = vmatmul.mubr.msk.f32.gmra.mrb[4].mxu0 %vm417_vm12, %v199_v36  ;;  %v904_v36 = vld [vmem:[#allocation6 + $0x600] sm:$0xff] }
 0x12b   :  { %2711 = vmatpush1.bf16.msra.mxu0 %v2710_v30  ;;  %785 = vmatprep.mubr.f32.mxu0 %v3181_v1  ;;  %v902_v30 = vld [vmem:[#allocation6 + $0x5f0] sm:$0xff] }
 0x12c   :  { %2713 = vmatprep.subr.bf16.mxu0 %v2712_v32  ;;  %v907_v32 = vld [vmem:[#allocation6 + $0x618] sm:$0xff]  ;;  %v2746_v33 = vpack.c.bf16 %v902_v30, %v900_v29 }
 0x12d   :  { %v2748_v35 = vpack.c.bf16 %v907_v32, %v905_v31  ;;  %v841_v31 = vrot.slane %v801_v5, 2  ;;  %v794_v32 = vld [vmem:[#allocation2 + $0x10] sm:$0xfc] }
 0x12e   :  { %2539 = vmatmul.mubr.msk.f32.gmra.mrb[6].mxu0 %vm417_vm12, %v3349_v13 }
 0x12f   :  { %2715 = vmatpush1.bf16.msra.mxu0 %v2714_v40  ;;  %1000 = vmatprep.mubr.f32.mxu0 %v822_v48  ;;  %v2750_v40 = vpack.c.bf16 %v906_v37, %v904_v36  ;;  %v2754_v48 = vpack.c.bf16 %v910_v44, %v908_v43  ;;  %v797_v36 = vld [vmem:[#allocation2 + $0x40] sm:$0x3] }
 0x130   :  { %2717 = vmatprep.subr.bf16.mxu0 %v2716_v42  ;;  %v2752_v42 = vpack.c.bf16 %v911_v39, %v909_v38  ;;  %v830_v38 = vrot.slane %v797_v36, 2  ;;  %v800_v39 = vld [vmem:[#allocation2 + $0x58] sm:$0xfc] }
 0x131   :  { %v838_v43 = vrot.slane %v800_v39, 2 }
 0x133   :  { %2719 = vmatpush1.bf16.msra.mxu0 %v2718_v49  ;;  %v2756_v49 = vpack.c.bf16 %v915_v46, %v913_v45 }
 0x134   :  { %2721 = vmatprep.subr.bf16.mxu0 %v2720_v50  ;;  %v912_v50 = vld [vmem:[#allocation6 + $0x640] sm:$0xff] }
 0x135   :  { %v2758_v54 = vpack.c.bf16 %v914_v51, %v912_v50 }
 0x137   :  { %2723 = vmatpush1.bf16.msra.mxu0 %v2722_v56  ;;  %v2760_v56 = vpack.c.bf16 %v919_v53, %v917_v52 }
 0x138   :  { %2725 = vmatprep.subr.bf16.mxu0 %v2724_v57  ;;  %v916_v57 = vld [vmem:[#allocation6 + $0x660] sm:$0xff] }
 0x139   :  { %v2762_v61 = vpack.c.bf16 %v918_v58, %v916_v57 }
 0x13b   :  { %2727 = vmatpush1.bf16.msra.mxu0 %v2726_v62  ;;  %v796_v62 = vld [vmem:[#allocation2 + $0x38] sm:$0x3] }
 0x13c   :  { %2729 = vmatprep.subr.bf16.mxu0 %v2728_v63  ;;  %v792_v63 = vld [vmem:[#allocation2] sm:$0xfc]  ;;  %v828_v10 = vrot.slane %v796_v62, 2 }
 0x13d   :  { %v817_v12 = vrot.slane %v792_v63, 2 }
 0x13e   :  { %v829_v9 = vsel %vm816_vm13, %v821_v41, %v828_v10  ;;  %v832_v41 = vrot.slane %v798_v25, 2 }
 0x13f   :  { %2731 = vmatpush1.bf16.msra.mxu0 %v2730_v7  ;;  %v925_v7 = vld [vmem:[#allocation6 + $0x6a8] sm:$0xff]  ;;  %v819_v19 = vsel %vm816_vm13, %v817_v12, %v818_v6 }
 0x140   :  { %2733 = vmatprep.subr.bf16.mxu0 %v2732_v8  ;;  %v927_v8 = vld [vmem:[#allocation6 + $0x6b8] sm:$0xff] }
 0x143   :  { %2735 = vmatpush1.bf16.msra.mxu0 %v2734_v15  ;;  %v799_v15 = vld [vmem:[#allocation2 + $0x50] sm:$0xfc] }
 0x144   :  { %2737 = vmatprep.subr.bf16.mxu0 %v2736_v16  ;;  %v2768_v16 = vpack.c.bf16 %v927_v8, %v925_v7 }
 0x147   :  { %2739 = vmatpush1.bf16.msra.mxu0 %v2738_v21  ;;  %v835_v21 = vrot.slane %v799_v15, 2 }
 0x148   :  { %2741 = vmatprep.subr.bf16.mxu0 %v2740_v22  ;;  %v802_v22 = vld [vmem:[#allocation2 + $0x80] sm:$0x3] }
 0x149   :  { %v843_v29 = vrot.slane %v802_v22, 2 }
 0x14b   :  { %2743 = vmatpush1.bf16.msra.mxu0 %v2742_v27  ;;  %v833_v27 = vrot.slane %v3337_v47, 2  ;;  %v844_v34 = vsel %vm816_vm13, %v836_v24, %v843_v29  ;;  %v824_v47 = vrot.slane %v3341_v55, 2  ;;  %v803_v55 = vld [vmem:[#allocation2 + $0x88] sm:$0x3] }
 0x14c   :  { %2745 = vmatprep.subr.bf16.mxu0 %v2744_v28  ;;  %v837_v28 = vsel %vm816_vm13, %v835_v21, %v836_v24  ;;  %v845_v45 = vrot.slane %v803_v55, 2 }
 0x14d   :  { %v834_v30 = vsel %vm816_vm13, %v832_v41, %v833_v27 }
 0x14f   :  { %2747 = vmatpush1.bf16.msra.mxu0 %v2746_v33  ;;  %v842_v33 = vsel %vm816_vm13, %v833_v27, %v841_v31 }
 0x150   :  { %2749 = vmatprep.subr.bf16.mxu0 %v2748_v35  ;;  %v823_v35 = vrot.slane %v794_v32, 2 }
 0x152   :  { %v825_v37 = vsel %vm816_vm13, %v823_v35, %v824_v47 }
 0x153   :  { %2751 = vmatpush1.bf16.msra.mxu0 %v2750_v40  ;;  %v831_v40 = vsel %vm816_vm13, %v824_v47, %v830_v38 }
 0x154   :  { %2753 = vmatprep.subr.bf16.mxu0 %v2752_v42  ;;  %v839_v42 = vrot.slane %v3349_v13, 2 }
 0x156   :  { %v840_v44 = vsel %vm816_vm13, %v838_v43, %v839_v42  ;;  %v846_v46 = vsel %vm816_vm13, %v839_v42, %v845_v45 }
 0x157   :  { %2755 = vmatpush1.bf16.msra.mxu0 %v2754_v48 }
 0x158   :  { %2757 = vmatprep.subr.bf16.mxu0 %v2756_v49 }
 0x15b   :  { %2759 = vmatpush1.bf16.msra.mxu0 %v2758_v54 }
 0x15c   :  { %2761 = vmatprep.subr.bf16.mxu0 %v2760_v56 }
 0x15f   :  { %2763 = vmatpush1.bf16.msra.mxu0 %v2762_v61 }
 0x160   :  { %2765 = vmatprep.subr.bf16.mxu0 %v2764_v2 }
 0x162   :  { %1001 = vmatmul.mubr.f32.vlgmr.msra.gmra.mrb[0].mxu0 %v819_v19 }
 0x163   :  { %1006 = vmatprep.mubr.f32.mxu0 %v829_v9  ;;  %2767 = vmatpush1.bf16.msra.mxu0 %v2766_v14 }
 0x164   :  { %2769 = vmatprep.subr.bf16.mxu0 %v2768_v16 }
 0x166   :  { %1007 = vmatmul.mubr.f32.gmra.mrb[2].mxu0 %v827_v26 }
 0x167   :  { %1012 = vmatprep.mubr.f32.mxu0 %v837_v28  ;;  %2771 = vmatpush1.bf16.msra.mxu0 %v2770_v23 }
 0x16a   :  { %1013 = vmatmul.mubr.f32.gmra.mrb[4].mxu0 %v834_v30 }
 0x16b   :  { %1018 = vmatprep.mubr.f32.mxu0 %v844_v34 }
 0x16e   :  { %1019 = vmatmul.mubr.f32.gmra.mrb[6].mxu0 %v842_v33 }
 0x16f   :  { %1089 = vmatprep.mubr.f32.mxu0 %v3181_v1 }
 0x172   :  { %2540 = vmatmul.mubr.msk.f32.vlgmr.msra.gmra.mrb[0].mxu0 %vm417_vm12, %v825_v37  ;;  %v3450_v37 = vand.u32 127, %v59_v0 }
 0x173   :  { %1095 = vmatprep.mubr.f32.mxu0 %v3181_v1 }
 0x174   :  { %vm1172_vm14 = vcmp.lt.s32.totalorder %v3450_v37, 16  ;;  %vm1181_vm15 = vcmp.lt.s32.totalorder %v3450_v37, 32  ;;  %vm1190_vm0 = vcmp.lt.s32.totalorder %v3450_v37, 64  ;;  %v3081_v37 = vld [vmem:[%s3746_s3] sm:$0xff] }
 0x176   :  { %2541 = vmatmul.mubr.msk.f32.gmra.mrb[2].mxu0 %vm417_vm12, %v831_v40 }
 0x177   :  { %1101 = vmatprep.mubr.f32.mxu0 %v3181_v1 }
 0x17a   :  { %2542 = vmatmul.mubr.msk.f32.gmra.mrb[4].mxu0 %vm417_vm12, %v840_v44 }
 0x17b   :  { %1107 = vmatprep.mubr.f32.mxu0 %v3181_v1 }
 0x17e   :  { %2543 = vmatmul.mubr.msk.f32.gmra.mrb[6].mxu0 %vm417_vm12, %v846_v46 }
 0x245   :  { %v3405_v48 = vpop.f32.mrb[0].mxu0 }
 0x246   :  { %v3407_v13 = vpop.f32.mrb[1].mxu0  ;;  %v1140_v50 = vmul.f32 %v3405_v48, %v3405_v48 }
 0x247   :  { %v1141_v54 = vmul.f32 %v3407_v13, %v3407_v13 }
 0x249   :  { %v3409_v49 = vpop.f32.mrb[2].mxu0 }
 0x24a   :  { %v1122_v51 = vadd.f32 %v3409_v49, %v3405_v48  ;;  %v1142_v52 = vmul.f32 %v3409_v49, %v3409_v49  ;;  %v3417_v53 = vpop.f32.mrb[3].mxu0 }
 0x24b   :  { %v1131_v56 = vadd.f32 %v3417_v53, %v3407_v13  ;;  %v1143_v57 = vmul.f32 %v3417_v53, %v3417_v53 }
 0x24c   :  { %v1148_v58 = vadd.f32 %v1142_v52, %v1140_v50 }
 0x24d   :  { %v1157_v59 = vadd.f32 %v1143_v57, %v1141_v54  ;;  %v3425_v60 = vpop.f32.mrb[4].mxu0 }
 0x24e   :  { %v1123_v61 = vadd.f32 %v1122_v51, %v3425_v60  ;;  %v1144_v62 = vmul.f32 %v3425_v60, %v3425_v60  ;;  %v3430_v63 = vpop.f32.mrb[5].mxu0 }
 0x24f   :  { %v1132_v2 = vadd.f32 %v1131_v56, %v3430_v63  ;;  %v1145_v3 = vmul.f32 %v3430_v63, %v3430_v63 }
 0x250   :  { %v1149_v4 = vadd.f32 %v1148_v58, %v1144_v62 }
 0x251   :  { %v1158_v6 = vadd.f32 %v1157_v59, %v1145_v3  ;;  %v3435_v7 = vpop.f32.mrb[6].mxu0 }
 0x252   :  { %v1124_v8 = vadd.f32 %v1123_v61, %v3435_v7  ;;  %v1146_v10 = vmul.f32 %v3435_v7, %v3435_v7  ;;  %v3440_v11 = vpop.f32.mrb[7].mxu0 }
 0x253   :  { %v1133_v12 = vadd.f32 %v1132_v2, %v3440_v11  ;;  %v1147_v14 = vmul.f32 %v3440_v11, %v3440_v11 }
 0x254   :  { %v1125_v15 = vrot.slane %v1124_v8, 4  ;;  %v1150_v16 = vadd.f32 %v1149_v4, %v1146_v10  ;;  %v1549_v10 = vld [vmem:[#allocation8 + $0x248] sm:$0xff] }
 0x255   :  { %v1134_v17 = vrot.slane %v1133_v12, 4  ;;  %v1159_v18 = vadd.f32 %v1158_v6, %v1147_v14  ;;  %v1548_v14 = vld [vmem:[#allocation8 + $0x240] sm:$0xff] }
 0x256   :  { %v1126_v19 = vadd.f32 %v1125_v15, %v1124_v8  ;;  %v1151_v20 = vrot.slane %v1150_v16, 4 }
 0x257   :  { %v1135_v9 = vadd.f32 %v1134_v17, %v1133_v12  ;;  %v1160_v21 = vrot.slane %v1159_v18, 4  ;;  %v1551_v12 = vld [vmem:[#allocation8 + $0x258] sm:$0xff]  ;;  %v1553_v17 = vld [vmem:[#allocation8 + $0x268] sm:$0xff] }
 0x258   :  { %v1127_v22 = vrot.slane %v1126_v19, 2  ;;  %v1152_v23 = vadd.f32 %v1151_v20, %v1150_v16  ;;  %v2772_v15 = vpack.c.bf16 %v1551_v12, %v1549_v10  ;;  %v1550_v16 = vld [vmem:[#allocation8 + $0x250] sm:$0xff] }
 0x259   :  { %v1136_v24 = vrot.slane %v1135_v9, 2  ;;  %v1161_v25 = vadd.f32 %v1160_v21, %v1159_v18  ;;  %v1555_v18 = vld [vmem:[#allocation8 + $0x278] sm:$0xff]  ;;  %v1554_v21 = vld [vmem:[#allocation8 + $0x270] sm:$0xff] }
 0x25a   :  { %v1128_v26 = vadd.f32 %v1127_v22, %v1126_v19  ;;  %v1153_v27 = vrot.slane %v1152_v23, 2  ;;  %v2774_v19 = vpack.c.bf16 %v1550_v16, %v1548_v14  ;;  %v2776_v20 = vpack.c.bf16 %v1555_v18, %v1553_v17  ;;  %v1557_v22 = vld [vmem:[#allocation8 + $0x288] sm:$0xff]  ;;  %2773 = vmatprep.subr.bf16.mxu1 %v2772_v15  ;;  %v1580_v14 = vld [vmem:[#allocation8 + $0x340] sm:$0xff]  ;;  %v1582_v15 = vld [vmem:[#allocation8 + $0x350] sm:$0xff] }
 0x25b   :  { %v1137_v28 = vadd.f32 %v1136_v24, %v1135_v9  ;;  %v1162_v29 = vrot.slane %v1161_v25, 2  ;;  %v1552_v9 = vld [vmem:[#allocation8 + $0x260] sm:$0xff]  ;;  %v1585_v16 = vld [vmem:[#allocation8 + $0x368] sm:$0xff]  ;;  %v1587_v17 = vld [vmem:[#allocation8 + $0x378] sm:$0xff]  ;;  %v2806_v18 = vpack.c.bf16 %v1582_v15, %v1580_v14 }
 0x25c   :  { %v1129_v5 = vrot.slane %v1128_v26, 1  ;;  %v1154_v41 = vadd.f32 %v1153_v27, %v1152_v23  ;;  %v1559_v23 = vld [vmem:[#allocation8 + $0x298] sm:$0xff]  ;;  %2775 = vmatpush1.bf16.msra.mxu1 %v2774_v19  ;;  %v2778_v24 = vpack.c.bf16 %v1554_v21, %v1552_v9  ;;  %v1558_v27 = vld [vmem:[#allocation8 + $0x290] sm:$0xff]  ;;  %v2808_v19 = vpack.c.bf16 %v1587_v17, %v1585_v16  ;;  %v1589_v21 = vld [vmem:[#allocation8 + $0x388] sm:$0xff] }
 0x25d   :  { %v1138_v30 = vrot.slane %v1137_v28, 1  ;;  %v1163_v31 = vadd.f32 %v1162_v29, %v1161_v25  ;;  %2777 = vmatprep.subr.bf16.mxu1 %v2776_v20  ;;  %v2780_v25 = vpack.c.bf16 %v1559_v23, %v1557_v22  ;;  %v1563_v29 = vld [vmem:[#allocation8 + $0x2b8] sm:$0xff]  ;;  %v1584_v20 = vld [vmem:[#allocation8 + $0x360] sm:$0xff]  ;;  %v1586_v9 = vld [vmem:[#allocation8 + $0x370] sm:$0xff] }
 0x25e   :  { %v1130_v34 = vadd.f32 %v1129_v5, %v1128_v26  ;;  %v1155_v32 = vrot.slane %v1154_v41, 1  ;;  %v1556_v26 = vld [vmem:[#allocation8 + $0x280] sm:$0xff]  ;;  %v1591_v22 = vld [vmem:[#allocation8 + $0x398] sm:$0xff]  ;;  %v2810_v23 = vpack.c.bf16 %v1586_v9, %v1584_v20  ;;  %v1593_v14 = vld [vmem:[#allocation8 + $0x3a8] sm:$0xff] }
 0x25f   :  { %v1139_v33 = vadd.f32 %v1138_v30, %v1137_v28  ;;  %v1164_v47 = vrot.slane %v1163_v31, 1  ;;  %v1561_v28 = vld [vmem:[#allocation8 + $0x2a8] sm:$0xff]  ;;  %v2782_v5 = vpack.c.bf16 %v1558_v27, %v1556_v26  ;;  %v1560_v30 = vld [vmem:[#allocation8 + $0x2a0] sm:$0xff]  ;;  %v1590_v26 = vld [vmem:[#allocation8 + $0x390] sm:$0xff] }
 0x260   :  { %1166 = vrot.lane.b32.xlu0 %v1130_v34, %s3179_s28  ;;  %v1156_v35 = vadd.f32 %v1155_v32, %v1154_v41  ;;  %2779 = vmatpush1.bf16.msra.mxu1 %v2778_v24  ;;  %v2784_v41 = vpack.c.bf16 %v1563_v29, %v1561_v28  ;;  %v1567_v32 = vld [vmem:[#allocation8 + $0x2d8] sm:$0xff]  ;;  %v2812_v24 = vpack.c.bf16 %v1591_v22, %v1589_v21  ;;  %v1592_v16 = vld [vmem:[#allocation8 + $0x3a0] sm:$0xff]  ;;  %v1594_v9 = vld [vmem:[#allocation8 + $0x3b0] sm:$0xff] }
 0x261   :  { %1168 = vrot.lane.b32.xlu1 %v1139_v33, %s3179_s28  ;;  %v1165_v36 = vadd.f32 %v1164_v47, %v1163_v31  ;;  %2781 = vmatprep.subr.bf16.mxu1 %v2780_v25  ;;  %v1562_v31 = vld [vmem:[#allocation8 + $0x2b0] sm:$0xff]  ;;  %v1588_v25 = vld [vmem:[#allocation8 + $0x380] sm:$0xff]  ;;  %v1595_v15 = vld [vmem:[#allocation8 + $0x3b8] sm:$0xff] }
 0x262   :  { %v2814_v27 = vpack.c.bf16 %v1590_v26, %v1588_v25  ;;  %v2816_v20 = vpack.c.bf16 %v1595_v15, %v1593_v14  ;;  %v1607_v14 = vld [vmem:[#allocation8 + $0x418] sm:$0xff]  ;;  %v1604_v15 = vld [vmem:[#allocation8 + $0x400] sm:$0xff] }
 0x264   :  { %1197 = vrot.lane.b32.xlu0 %v1156_v35, %s3179_s28  ;;  %2783 = vmatpush1.bf16.msra.mxu1 %v2782_v5 }
 0x265   :  { %1199 = vrot.lane.b32.xlu1 %v1165_v36, %s3179_s28  ;;  %2785 = vmatprep.subr.bf16.mxu1 %v2784_v41 }
 0x2d2   :  { %v1167_v38 = vpop.permute.xlu0 %1166 }
 0x2d3   :  { %v1169_v39 = vpop.permute.xlu1 %1168 }
 0x2d4   :  { %v1173_v40 = vsel %vm1172_vm14, %v1167_v38, %v1169_v39  ;;  %v1174_v42 = vsel %vm1172_vm14, %v1169_v39, %v1167_v38  ;;  %v1569_v38 = vld [vmem:[#allocation8 + $0x2e8] sm:$0xff]  ;;  %v1571_v39 = vld [vmem:[#allocation8 + $0x2f8] sm:$0xff] }
 0x2d5   :  { %v1175_v55 = vadd.f32 %v1174_v42, %v1130_v34  ;;  %v1176_v43 = vadd.f32 %v1173_v40, %v1139_v33  ;;  %v1565_v34 = vld [vmem:[#allocation8 + $0x2c8] sm:$0xff]  ;;  %v2786_v33 = vpack.c.bf16 %v1562_v31, %v1560_v30  ;;  %v2792_v42 = vpack.c.bf16 %v1571_v39, %v1569_v38 }
 0x2d6   :  { %v1198_v44 = vpop.permute.xlu0 %1197  ;;  %v2788_v47 = vpack.c.bf16 %v1567_v32, %v1565_v34 }
 0x2d7   :  { %1177 = vrot.lane.b32.xlu0 %v1175_v55, %s3182_s2  ;;  %1179 = vrot.lane.b32.xlu1 %v1176_v43, %s3182_s2  ;;  %v1200_v45 = vpop.permute.xlu1 %1199 }
 0x2d8   :  { %v1201_v46 = vsel %vm1172_vm14, %v1198_v44, %v1200_v45  ;;  %v1202_v50 = vsel %vm1172_vm14, %v1200_v45, %v1198_v44  ;;  %2787 = vmatpush1.bf16.msra.mxu1 %v2786_v33  ;;  %v1573_v44 = vld [vmem:[#allocation8 + $0x308] sm:$0xff]  ;;  %v1575_v45 = vld [vmem:[#allocation8 + $0x318] sm:$0xff] }
 0x2d9   :  { %v1203_v51 = vadd.f32 %v1202_v50, %v1156_v35  ;;  %v1204_v52 = vadd.f32 %v1201_v46, %v1165_v36  ;;  %v1564_v35 = vld [vmem:[#allocation8 + $0x2c0] sm:$0xff]  ;;  %v1566_v36 = vld [vmem:[#allocation8 + $0x2d0] sm:$0xff]  ;;  %2789 = vmatprep.subr.bf16.mxu1 %v2788_v47  ;;  %v2796_v50 = vpack.c.bf16 %v1575_v45, %v1573_v44 }
 0x2da   :  { %v2790_v40 = vpack.c.bf16 %v1566_v36, %v1564_v35  ;;  %v190_v45 = vld [vmem:[%s3746_s3] sm:$0xff]  ;;  %s3184_s3 = smov [#allocation9]  }
 0x2db   :  { %1205 = vrot.lane.b32.xlu0 %v1203_v51, %s3182_s2  ;;  %1207 = vrot.lane.b32.xlu1 %v1204_v52, %s3182_s2  ;;  %s2519_s6 = sshll.u32 %s3184_s3, 4  ;;  %s2520_s6 = int_to_ptr.vmem [resolvable:$true] %s2519_s6 }
 0x2dc   :  { %2791 = vmatpush1.bf16.msra.mxu1 %v2790_v40  ;;  %s3148_s7 = scalar_lea.vmem %s2520_s6, 1024  ;;  %p3153_p11 = scmp.lt.s32.totalorder %s2520_s6, %s2520_s6 }
 0x2dd   :  { %2793 = vmatprep.subr.bf16.mxu1 %v2792_v42  ;;  %p3149_p10 = scmp.ne.s32.totalorder %s2520_s6, %s3148_s7  ;;  %p3154_p12 = scmp.lt.s32.totalorder %s3148_s7, %s3148_s7 }
 0x2df   :  { %p3155_p13 = por %p3154_p12, %p3153_p11 }
 0x2e1   :  { %p3156_p0 = pnand %p3155_p13, %p3149_p10 }
 0x349   :  { %v1178_v54 = vpop.permute.xlu0 %1177  ;;  %v1180_v56 = vpop.permute.xlu1 %1179 }
 0x34a   :  { %v1182_v57 = vsel %vm1181_vm15, %v1178_v54, %v1180_v56  ;;  %v1183_v58 = vsel %vm1181_vm15, %v1180_v56, %v1178_v54  ;;  %v1577_v54 = vld [vmem:[#allocation8 + $0x328] sm:$0xff]  ;;  %v1579_v56 = vld [vmem:[#allocation8 + $0x338] sm:$0xff] }
 0x34b   :  { %v3470_v59 = vadd.f32 %v1183_v58, %v1175_v55  ;;  %v3472_v61 = vadd.f32 %v1182_v57, %v1176_v43  ;;  %v1568_v55 = vld [vmem:[#allocation8 + $0x2e0] sm:$0xff]  ;;  %v1570_v43 = vld [vmem:[#allocation8 + $0x2f0] sm:$0xff]  ;;  %v2800_v58 = vpack.c.bf16 %v1579_v56, %v1577_v54 }
 0x34c   :  { %v2794_v46 = vpack.c.bf16 %v1570_v43, %v1568_v55 }
 0x34d   :  { %v1206_v62 = vpop.permute.xlu0 %1205  ;;  %1186 = vrot.lane.b32.xlu0 %v3470_v59, %s3183_s25  ;;  %1188 = vrot.lane.b32.xlu1 %v3472_v61, %s3183_s25  ;;  %v1208_v2 = vpop.permute.xlu1 %1207 }
 0x34e   :  { %v1209_v3 = vsel %vm1181_vm15, %v1206_v62, %v1208_v2  ;;  %v1210_v4 = vsel %vm1181_vm15, %v1208_v2, %v1206_v62  ;;  %2795 = vmatpush1.bf16.msra.mxu1 %v2794_v46  ;;  %v1576_v62 = vld [vmem:[#allocation8 + $0x320] sm:$0xff]  ;;  %v1578_v2 = vld [vmem:[#allocation8 + $0x330] sm:$0xff] }
 0x34f   :  { %v3482_v6 = vadd.f32 %v1210_v4, %v1203_v51  ;;  %v3484_v8 = vadd.f32 %v1209_v3, %v1204_v52  ;;  %v1572_v51 = vld [vmem:[#allocation8 + $0x300] sm:$0xff]  ;;  %v1574_v52 = vld [vmem:[#allocation8 + $0x310] sm:$0xff]  ;;  %2797 = vmatprep.subr.bf16.mxu1 %v2796_v50  ;;  %v1581_v3 = vld [vmem:[#allocation8 + $0x348] sm:$0xff]  ;;  %v2802_v10 = vpack.c.bf16 %v1578_v2, %v1576_v62 }
 0x350   :  { %v2798_v57 = vpack.c.bf16 %v1574_v52, %v1572_v51  ;;  %v1583_v4 = vld [vmem:[#allocation8 + $0x358] sm:$0xff] }
 0x351   :  { %1213 = vrot.lane.b32.xlu0 %v3482_v6, %s3183_s25  ;;  %1215 = vrot.lane.b32.xlu1 %v3484_v8, %s3183_s25  ;;  %v2804_v12 = vpack.c.bf16 %v1583_v4, %v1581_v3 }
 0x352   :  { %2799 = vmatpush1.bf16.msra.mxu1 %v2798_v57 }
 0x353   :  { %2801 = vmatprep.subr.bf16.mxu1 %v2800_v58 }
 0x356   :  { %2803 = vmatpush1.bf16.msra.mxu1 %v2802_v10 }
 0x357   :  { %2805 = vmatprep.subr.bf16.mxu1 %v2804_v12 }
 0x35a   :  { %2807 = vmatpush1.bf16.msra.mxu1 %v2806_v18 }
 0x35b   :  { %2809 = vmatprep.subr.bf16.mxu1 %v2808_v19 }
 0x35e   :  { %2811 = vmatpush1.bf16.msra.mxu1 %v2810_v23 }
 0x35f   :  { %2813 = vmatprep.subr.bf16.mxu1 %v2812_v24  ;;  %v2818_v24 = vpack.c.bf16 %v1594_v9, %v1592_v16 }
 0x362   :  { %2815 = vmatpush1.bf16.msra.mxu1 %v2814_v27 }
 0x363   :  { %2817 = vmatprep.subr.bf16.mxu1 %v2816_v20 }
 0x366   :  { %2819 = vmatpush1.bf16.msra.mxu1 %v2818_v24  ;;  %v1608_v24 = vld [vmem:[#allocation8 + $0x420] sm:$0xff] }
 0x3bf   :  { %v1187_v28 = vpop.permute.xlu0 %1186  ;;  %v1189_v29 = vpop.permute.xlu1 %1188 }
 0x3c0   :  { %v1191_v5 = vsel %vm1190_vm0, %v1187_v28, %v1189_v29  ;;  %v1192_v41 = vsel %vm1190_vm0, %v1189_v29, %v1187_v28 }
 0x3c1   :  { %v1193_v30 = vadd.f32 %v1192_v41, %v3470_v59  ;;  %v1194_v31 = vadd.f32 %v1191_v5, %v3472_v61  ;;  %v3504_v61 = vshrl.u32 %v59_v0, 7  ;;  %v1597_v5 = vld [vmem:[#allocation8 + $0x3c8] sm:$0xff]  ;;  %v1599_v41 = vld [vmem:[#allocation8 + $0x3d8] sm:$0xff] }
 0x3c3   :  { %v1195_v34 = vadd.f32 %v1194_v31, %v1193_v30  ;;  %v1214_v32 = vpop.permute.xlu0 %1213  ;;  %v1216_v33 = vpop.permute.xlu1 %1215  ;;  %v1234_v46 = vsub.s32 0, %v3504_v61  ;;  %v1269_v0 = vsub.s32 1, %v3504_v61  ;;  %v1273_v62 = vsub.s32 5, %v3504_v61  ;;  %v1596_v30 = vld [vmem:[#allocation8 + $0x3c0] sm:$0xff] }
 0x3c4   :  { %v1217_v47 = vsel %vm1190_vm0, %v1214_v32, %v1216_v33  ;;  %v1218_v35 = vsel %vm1190_vm0, %v1216_v33, %v1214_v32 }
 0x3c5   :  { %v1196_v36 = vmul.f32 0.001953125, %v1195_v34  ;;  %v1219_v38 = vadd.f32 %v1218_v35, %v3482_v6  ;;  %v1220_v39 = vadd.f32 %v1217_v47, %v3484_v8  ;;  %v1238_v6 = vsub.s32 4, %v3504_v61 }
 0x3c7   :  { %v1221_v40 = vadd.f32 %v1220_v39, %v1219_v38  ;;  %v1223_v42 = vmul.f32 %v1196_v36, %v1196_v36 }
 0x3c9   :  { %v1222_v55 = vmul.f32 0.001953125, %v1221_v40 }
 0x3cb   :  { %v1224_v59 = vsub.f32 %v1222_v55, %v1223_v42 }
 0x3cd   :  { %v1225_v43 = vadd.f32 1e-05, %v1224_v59  ;;  %v1601_v59 = vld [vmem:[#allocation8 + $0x3e8] sm:$0xff] }
 0x3cf   :  { %3077 = vrsqrt.f32 %v1225_v43 }
 0x3d9   :  { %v3078_v44 = vpop.eup %3077 }
 0x3da   :  { %v1228_v50 = vcombine.low %v3078_v44, %v3078_v44 }
 0x3dc   :  { %v1230_v8 = vmul.f32 %v1228_v50, %v190_v45  ;;  %v1600_v50 = vld [vmem:[#allocation8 + $0x3e0] sm:$0xff] }
 0x3de   :  { %v1235_v51 = vrot.slane %v1230_v8, %v1234_v46  ;;  %v1239_v52 = vrot.slane %v1230_v8, %v1238_v6  ;;  %v1603_v6 = vld [vmem:[#allocation8 + $0x3f8] sm:$0xff]  ;;  %v1602_v8 = vld [vmem:[#allocation8 + $0x3f0] sm:$0xff] }
 0x3e0   :  { %v1242_v54 = vmul.f32 %v1235_v51, %v1196_v36  ;;  %v1243_v56 = vmul.f32 %v1239_v52, %v1196_v36  ;;  %v1257_v2 = vrot.slane %v1239_v52, %v1234_v46  ;;  %v1253_v3 = vrot.slane %v1235_v51, %v1234_v46 }
 0x3e2   :  { %v1246_v57 = vcombine.low %v1242_v54, %v1243_v56  ;;  %v1259_v17 = vmul.f32 %v1257_v2, %v3407_v13  ;;  %v1258_v18 = vmul.f32 %v1253_v3, %v3405_v48  ;;  %v1261_v19 = vmul.f32 %v1257_v2, %v3417_v53 }
 0x3e3   :  { %v1260_v23 = vmul.f32 %v1253_v3, %v3409_v49  ;;  %v1263_v25 = vmul.f32 %v1257_v2, %v3430_v63  ;;  %v1262_v26 = vmul.f32 %v1253_v3, %v3425_v60  ;;  %v1265_v27 = vmul.f32 %v1257_v2, %v3440_v11  ;;  %v1598_v63 = vld [vmem:[#allocation8 + $0x3d0] sm:$0xff] }
 0x3e4   :  { %v1247_v58 = vrot.slane %v1246_v57, 7  ;;  %v1264_v28 = vmul.f32 %v1253_v3, %v3435_v7  ;;  %v2820_v11 = vpack.c.bf16 %v1599_v41, %v1597_v5  ;;  %v2822_v38 = vpack.c.bf16 %v1598_v63, %v1596_v30 }
 0x3e6   :  { %v1249_v4 = vsub.f32 %v190_v45, %v1247_v58  ;;  %2821 = vmatprep.subr.bf16.mxu1 %v2820_v11 }
 0x3e7   :  { %2823 = vmatpush1.bf16.msra.mxu1 %v2822_v38 }
 0x3e8   :  { %v1274_v10 = vrot.slane %v1249_v4, %v1273_v62  ;;  %v1270_v12 = vrot.slane %v1249_v4, %v1269_v0  ;;  %v2824_v4 = vpack.c.bf16 %v1603_v6, %v1601_v59 }
 0x3ea   :  { %v1284_v21 = vrot.slane %v1274_v10, %v1269_v0  ;;  %v1280_v22 = vrot.slane %v1270_v12, %v1269_v0  ;;  %v2826_v10 = vpack.c.bf16 %v1602_v8, %v1600_v50  ;;  %v1605_v12 = vld [vmem:[#allocation8 + $0x408] sm:$0xff]  ;;  %2825 = vmatprep.subr.bf16.mxu1 %v2824_v4 }
 0x3ec   :  { %v1286_v13 = vadd.f32 %v1284_v21, %v1259_v17  ;;  %v1285_v48 = vadd.f32 %v1280_v22, %v1258_v18  ;;  %v1288_v29 = vadd.f32 %v1284_v21, %v1261_v19  ;;  %v1287_v53 = vadd.f32 %v1280_v22, %v1260_v23  ;;  %v1606_v19 = vld [vmem:[#allocation8 + $0x410] sm:$0xff]  ;;  %2827 = vmatpush1.bf16.msra.mxu1 %v2826_v10  ;;  %v1611_v23 = vld [vmem:[#allocation8 + $0x438] sm:$0xff] }
 0x3ed   :  { %v1290_v31 = vadd.f32 %v1284_v21, %v1263_v25  ;;  %v1289_v49 = vadd.f32 %v1280_v22, %v1262_v26  ;;  %v1292_v34 = vadd.f32 %v1284_v21, %v1265_v27  ;;  %v1291_v32 = vadd.f32 %v1280_v22, %v1264_v28  ;;  %v1609_v22 = vld [vmem:[#allocation8 + $0x428] sm:$0xff]  ;;  %v1610_v26 = vld [vmem:[#allocation8 + $0x430] sm:$0xff] }
 0x3ee   :  { %v1294_v33 = vmul.f32 0.2, %v1286_v13  ;;  %v1293_v60 = vmul.f32 0.2, %v1285_v48  ;;  %v1296_v47 = vmul.f32 0.2, %v1288_v29  ;;  %v2828_v18 = vpack.c.bf16 %v1607_v14, %v1605_v12 }
 0x3ef   :  { %v1295_v35 = vmul.f32 0.2, %v1287_v53  ;;  %v1298_v7 = vmul.f32 0.2, %v1290_v31  ;;  %v1297_v36 = vmul.f32 0.2, %v1289_v49  ;;  %v2830_v21 = vpack.c.bf16 %v1606_v19, %v1604_v15 }
 0x3f0   :  { %v1302_v39 = vmax.f32 %v1286_v13, %v1294_v33  ;;  %v1301_v40 = vmax.f32 %v1285_v48, %v1293_v60  ;;  %v1304_v42 = vmax.f32 %v1288_v29, %v1296_v47  ;;  %v1300_v55 = vmul.f32 0.2, %v1292_v34  ;;  %2829 = vmatprep.subr.bf16.mxu1 %v2828_v18  ;;  %v1613_v28 = vld [vmem:[#allocation8 + $0x448] sm:$0xff]  ;;  %v1615_v13 = vld [vmem:[#allocation8 + $0x458] sm:$0xff] }
 0x3f1   :  { %v1303_v43 = vmax.f32 %v1287_v53, %v1295_v35  ;;  %v1306_v44 = vmax.f32 %v1290_v31, %v1298_v7  ;;  %v1305_v45 = vmax.f32 %v1289_v49, %v1297_v36  ;;  %v1299_v46 = vmul.f32 0.2, %v1291_v32  ;;  %2831 = vmatpush1.bf16.msra.mxu1 %v2830_v21 }
 0x3f2   :  { %v1318_v51 = vrot.slane %v1302_v39, 7  ;;  %v1317_v52 = vrot.slane %v1301_v40, 7  ;;  %v1321_v54 = vrot.slane %v1304_v42, 7  ;;  %v1308_v56 = vmax.f32 %v1292_v34, %v1300_v55  ;;  %v1612_v39 = vld [vmem:[#allocation8 + $0x440] sm:$0xff]  ;;  %v1614_v40 = vld [vmem:[#allocation8 + $0x450] sm:$0xff]  ;;  %v1617_v42 = vld [vmem:[#allocation8 + $0x468] sm:$0xff] }
 0x3f3   :  { %v1319_v57 = vrot.slane %v1303_v43, 7  ;;  %v1324_v58 = vrot.slane %v1306_v44, 7  ;;  %v1323_v0 = vrot.slane %v1305_v45, 7  ;;  %v1307_v62 = vmax.f32 %v1291_v32, %v1299_v46  ;;  %v1619_v55 = vld [vmem:[#allocation8 + $0x478] sm:$0xff] }
 0x3f4   :  { %1331 = vrot.lane.b32.xlu1 %v1318_v51, %s3179_s28  ;;  %1329 = vrot.lane.b32.xlu0 %v1317_v52, %s3179_s28  ;;  %v1322_v2 = vsel %vm106_vm5, %v1318_v51, %v1321_v54  ;;  %v1327_v3 = vrot.slane %v1308_v56, 7  ;;  %v2832_v25 = vpack.c.bf16 %v1611_v23, %v1609_v22  ;;  %v2834_v27 = vpack.c.bf16 %v1610_v26, %v1608_v24  ;;  %v1618_v56 = vld [vmem:[#allocation8 + $0x470] sm:$0xff] }
 0x3f5   :  { %v1320_v16 = vsel %vm106_vm5, %v1317_v52, %v1319_v57  ;;  %v1325_v17 = vrot.slane %v1307_v62, 7  ;;  %v2836_v48 = vpack.c.bf16 %v1615_v13, %v1613_v28  ;;  %v2838_v8 = vpack.c.bf16 %v1614_v40, %v1612_v39 }
 0x3f6   :  { %v1328_v20 = vsel %vm106_vm5, %v1324_v58, %v1327_v3  ;;  %2833 = vmatprep.subr.bf16.mxu1 %v2832_v25  ;;  %v2840_v52 = vpack.c.bf16 %v1619_v55, %v1617_v42  ;;  %v1415_v55 = vld [vmem:[#allocation8 + $0x40] sm:$0xff] }
 0x3f7   :  { %v1326_v9 = vsel %vm106_vm5, %v1323_v0, %v1325_v17  ;;  %2835 = vmatpush1.bf16.msra.mxu1 %v2834_v27 }
 0x3f8   :  { %1339 = vrot.lane.b32.xlu1 %v1321_v54, %s3179_s28  ;;  %1337 = vrot.lane.b32.xlu0 %v1319_v57, %s3179_s28  ;;  %v1616_v54 = vld [vmem:[#allocation8 + $0x460] sm:$0xff] }
 0x3f9   :  { %2837 = vmatprep.subr.bf16.mxu1 %v2836_v48  ;;  %v2842_v14 = vpack.c.bf16 %v1618_v56, %v1616_v54  ;;  %v1419_v56 = vld [vmem:[#allocation8 + $0x60] sm:$0xff] }
 0x3fc   :  { %1335 = vrot.lane.b32.xlu1 %v1322_v2, %s3179_s28  ;;  %1333 = vrot.lane.b32.xlu0 %v1320_v16, %s3179_s28 }
 0x400   :  { %1343 = vrot.lane.b32.xlu1 %v1324_v58, %s3179_s28  ;;  %1341 = vrot.lane.b32.xlu0 %v1323_v0, %s3179_s28  ;;  %v1408_v58 = vld [vmem:[#allocation8 + $0x8] sm:$0xff]  ;;  %v1410_v0 = vld [vmem:[#allocation8 + $0x18] sm:$0xff] }
 0x401   :  { %v2844_v18 = vpack.c.bf16 %v1410_v0, %v1408_v58 }
 0x404   :  { %1347 = vrot.lane.b32.xlu1 %v1328_v20, %s3179_s28  ;;  %1345 = vrot.lane.b32.xlu0 %v1326_v9, %s3179_s28 }
 0x408   :  { %1351 = vrot.lane.b32.xlu1 %v1327_v3, %s3179_s28  ;;  %1349 = vrot.lane.b32.xlu0 %v1325_v17, %s3179_s28 }
 0x466   :  { %v1332_v29 = vpop.permute.xlu1 %1331  ;;  %v1330_v53 = vpop.permute.xlu0 %1329 }
 0x467   :  { %1379 = vst.msk [vmem:[#allocation2 + $0x10] sm:$0xfe] %vm170_vm8, %v1332_v29  ;;  %v1353_v5 = vsel %vm74_vm1, %v1330_v53, %v1332_v29  ;;  %v1407_v29 = vld [vmem:[#allocation8] sm:$0xff] }
 0x468   :  { %1377 = vst.msk [vmem:[#allocation2] sm:$0xfe] %vm167_vm7, %v1330_v53  ;;  %1378 = vst [vmem:[#allocation2 + $0x8] sm:$0xfe] %v1353_v5  ;;  %v1409_v53 = vld [vmem:[#allocation8 + $0x10] sm:$0xff] }
 0x46a   :  { %v1340_v41 = vpop.permute.xlu1 %1339  ;;  %v1338_v30 = vpop.permute.xlu0 %1337 }
 0x46b   :  { %1385 = vst.msk [vmem:[#allocation2 + $0x40] sm:$0x1] %vm179_vm6, %v1340_v41  ;;  %v1355_v31 = vsel %vm74_vm1, %v1338_v30, %v1340_v41 }
 0x46c   :  { %1383 = vst.msk [vmem:[#allocation2 + $0x30] sm:$0x1] %vm176_vm10, %v1338_v30  ;;  %1384 = vst [vmem:[#allocation2 + $0x38] sm:$0x1] %v1355_v31  ;;  %v1412_v30 = vld [vmem:[#allocation8 + $0x28] sm:$0xff]  ;;  %v1414_v31 = vld [vmem:[#allocation8 + $0x38] sm:$0xff] }
 0x46e   :  { %v1336_v49 = vpop.permute.xlu1 %1335  ;;  %v1334_v34 = vpop.permute.xlu0 %1333  ;;  %v1481_v48 = vld [vmem:[#allocation2 + $0x10] sm:$0xfe] }
 0x46f   :  { %1382 = vst.msk [vmem:[#allocation2 + $0x28] sm:$0xff] %vm74_vm1, %v1336_v49  ;;  %v3545_v32 = vsel %vm74_vm1, %v1334_v34, %v1336_v49  ;;  %v1480_v63 = vld [vmem:[#allocation2 + $0x8] sm:$0xfe]  ;;  %v1479_v38 = vld [vmem:[#allocation2] sm:$0xfe]  ;;  %v1515_v49 = vrot.slane %v1481_v48, 1 }
 0x470   :  { %1380 = vst.msk [vmem:[#allocation2 + $0x18] sm:$0xff] %vm172_vm9, %v1334_v34  ;;  %v1512_v33 = vrot.slane %v1480_v63, 1  ;;  %v1513_v60 = vrot.slane %v3545_v32, 1  ;;  %v1509_v6 = vrot.slane %v1479_v38, 1  ;;  %v2846_v34 = vpack.c.bf16 %v1409_v53, %v1407_v29  ;;  %v1438_v48 = vld [vmem:[#allocation8 + $0xf8] sm:$0xff] }
 0x471   :  { %v2848_v63 = vpack.c.bf16 %v1414_v31, %v1412_v30  ;;  %v1440_v30 = vld [vmem:[#allocation8 + $0x108] sm:$0xff]  ;;  %v1442_v31 = vld [vmem:[#allocation8 + $0x118] sm:$0xff] }
 0x472   :  { %v1344_v47 = vpop.permute.xlu1 %1343  ;;  %v1342_v11 = vpop.permute.xlu0 %1341  ;;  %v1514_v35 = vsel %vm305_vm11, %v1512_v33, %v1513_v60  ;;  %v1484_v33 = vld [vmem:[#allocation2 + $0x40] sm:$0x1] }
 0x473   :  { %1388 = vst.msk [vmem:[#allocation2 + $0x58] sm:$0xfe] %vm170_vm8, %v1344_v47  ;;  %v1356_v7 = vsel %vm74_vm1, %v1342_v11, %v1344_v47  ;;  %1692 = vmatprep.mubr.f32.mxu1 %v1514_v35  ;;  %v1483_v36 = vld [vmem:[#allocation2 + $0x38] sm:$0x1]  ;;  %v1482_v51 = vld [vmem:[#allocation2 + $0x30] sm:$0x1] }
 0x474   :  { %1386 = vst.msk [vmem:[#allocation2 + $0x48] sm:$0xfe] %vm167_vm7, %v1342_v11  ;;  %1387 = vst [vmem:[#allocation2 + $0x50] sm:$0xfe] %v1356_v7  ;;  %v1520_v45 = vrot.slane %v1483_v36, 1  ;;  %v1518_v10 = vrot.slane %v1482_v51, 1 }
 0x475   :  { %v1413_v47 = vld [vmem:[#allocation8 + $0x30] sm:$0xff]  ;;  %v1416_v35 = vld [vmem:[#allocation8 + $0x48] sm:$0xff]  ;;  %v1418_v7 = vld [vmem:[#allocation8 + $0x58] sm:$0xff]  ;;  %v1522_v38 = vrot.slane %v1484_v33, 1 }
 0x476   :  { %v1348_v59 = vpop.permute.xlu1 %1347  ;;  %v1346_v43 = vpop.permute.xlu0 %1345  ;;  %v1521_v3 = vsel %vm305_vm11, %v1513_v60, %v1520_v45  ;;  %v3573_v28 = vld [vmem:[#allocation2 + $0x28] sm:$0xff]  ;;  %v1411_v60 = vld [vmem:[#allocation8 + $0x20] sm:$0xff]  ;;  %v2852_v40 = vpack.c.bf16 %v1418_v7, %v1416_v35  ;;  %v1441_v33 = vld [vmem:[#allocation8 + $0x110] sm:$0xff] }
 0x477   :  { %v3553_v44 = vld [vmem:[#allocation2 + $0x18] sm:$0xff]  ;;  %1391 = vst.msk [vmem:[#allocation2 + $0x70] sm:$0xff] %vm74_vm1, %v1348_v59  ;;  %v3557_v46 = vsel %vm74_vm1, %v1346_v43, %v1348_v59  ;;  %v1516_v41 = vrot.slane %v3573_v28, 1  ;;  %v2850_v39 = vpack.c.bf16 %v1413_v47, %v1411_v60  ;;  %v1417_v59 = vld [vmem:[#allocation8 + $0x50] sm:$0xff]  ;;  %v1446_v47 = vld [vmem:[#allocation8 + $0x138] sm:$0xff] }
 0x478   :  { %1389 = vst.msk [vmem:[#allocation2 + $0x60] sm:$0xff] %vm172_vm9, %v1346_v43  ;;  %v1510_v50 = vrot.slane %v3553_v44, 1  ;;  %v1528_v16 = vrot.slane %v3557_v46, 1  ;;  %v1444_v60 = vld [vmem:[#allocation8 + $0x128] sm:$0xff]  ;;  %v1443_v7 = vld [vmem:[#allocation8 + $0x120] sm:$0xff] }
 0x479   :  { %v1517_v11 = vsel %vm305_vm11, %v1515_v49, %v1516_v41  ;;  %v1523_v43 = vsel %vm305_vm11, %v1516_v41, %v1522_v38  ;;  %v1437_v41 = vld [vmem:[#allocation8 + $0xf0] sm:$0xff]  ;;  %v2880_v35 = vpack.c.bf16 %v1446_v47, %v1444_v60  ;;  %v2058_v60 = vld [vmem:[#allocation8 + $0x488] sm:$0xff]  ;;  %v2060_v47 = vld [vmem:[#allocation8 + $0x498] sm:$0xff] }
 0x47a   :  { %v1511_v57 = vsel %vm305_vm11, %v1509_v6, %v1510_v50  ;;  %v1352_v62 = vpop.permute.xlu1 %1351  ;;  %v1350_v2 = vpop.permute.xlu0 %1349  ;;  %v1519_v19 = vsel %vm305_vm11, %v1510_v50, %v1518_v10  ;;  %v1487_v42 = vld [vmem:[#allocation2 + $0x58] sm:$0xfe]  ;;  %v1422_v50 = vld [vmem:[#allocation8 + $0x78] sm:$0xff]  ;;  %v1423_v10 = vld [vmem:[#allocation8 + $0x80] sm:$0xff] }
 0x47b   :  { %1693 = vmatmul.mubr.f32.vlgmr.msra.gmra.mrb[0].mxu1 %v1511_v57  ;;  %1394 = vst.msk [vmem:[#allocation2 + $0x88] sm:$0x1] %vm179_vm6, %v1352_v62  ;;  %v1358_v4 = vsel %vm74_vm1, %v1350_v2, %v1352_v62  ;;  %v1486_v12 = vld [vmem:[#allocation2 + $0x50] sm:$0xfe]  ;;  %v1485_v17 = vld [vmem:[#allocation2 + $0x48] sm:$0xfe] }
 0x47c   :  { %1392 = vst.msk [vmem:[#allocation2 + $0x78] sm:$0x1] %vm176_vm10, %v1350_v2  ;;  %1698 = vmatprep.mubr.f32.mxu1 %v1521_v3  ;;  %2839 = vmatpush1.bf16.msra.mxu1 %v2838_v8  ;;  %1393 = vst [vmem:[#allocation2 + $0x80] sm:$0x1] %v1358_v4  ;;  %v1527_v15 = vrot.slane %v1486_v12, 1  ;;  %v1524_v21 = vrot.slane %v1485_v17, 1 }
 0x47d   :  { %2841 = vmatprep.subr.bf16.mxu1 %v2840_v52  ;;  %v1420_v6 = vld [vmem:[#allocation8 + $0x68] sm:$0xff]  ;;  %v1530_v51 = vrot.slane %v1487_v42, 1  ;;  %v2854_v52 = vpack.c.bf16 %v1417_v59, %v1415_v55  ;;  %v1421_v57 = vld [vmem:[#allocation8 + $0x70] sm:$0xff]  ;;  %v1426_v2 = vld [vmem:[#allocation8 + $0x98] sm:$0xff] }
 0x47e   :  { %v1529_v20 = vsel %vm305_vm11, %v1527_v15, %v1528_v16  ;;  %v3581_v36 = vld [vmem:[#allocation2 + $0x70] sm:$0xff]  ;;  %v2856_v54 = vpack.c.bf16 %v1422_v50, %v1420_v6  ;;  %v1424_v62 = vld [vmem:[#allocation8 + $0x88] sm:$0xff]  ;;  %v2858_v3 = vpack.c.bf16 %v1421_v57, %v1419_v56  ;;  %v1425_v12 = vld [vmem:[#allocation8 + $0x90] sm:$0xff] }
 0x47f   :  { %1699 = vmatmul.mubr.f32.gmra.mrb[2].mxu1 %v1519_v19  ;;  %v3569_v9 = vld [vmem:[#allocation2 + $0x60] sm:$0xff]  ;;  %v1531_v45 = vrot.slane %v3581_v36, 1  ;;  %v2860_v4 = vpack.c.bf16 %v1426_v2, %v1424_v62  ;;  %v1428_v15 = vld [vmem:[#allocation8 + $0xa8] sm:$0xff]  ;;  %v1396_v17 = vld [vmem:[#allocation2 + $0x8] sm:$0xff] }
 0x480   :  { %1704 = vmatprep.mubr.f32.mxu1 %v1529_v20  ;;  %v1525_v22 = vrot.slane %v3569_v9, 1  ;;  %2843 = vmatpush1.bf16.msra.mxu1 %v2842_v14  ;;  %v1427_v20 = vld [vmem:[#allocation8 + $0xa0] sm:$0xff]  ;;  %v1445_v38 = vld [vmem:[#allocation8 + $0x130] sm:$0xff]  ;;  %v1454_v6 = vld [vmem:[#allocation8 + $0x178] sm:$0xff] }
 0x481   :  { %2845 = vmatprep.subr.bf16.mxu1 %v2844_v18  ;;  %v1532_v58 = vsel %vm305_vm11, %v1530_v51, %v1531_v45  ;;  %v2862_v18 = vpack.c.bf16 %v1425_v12, %v1423_v10  ;;  %v2882_v42 = vpack.c.bf16 %v1445_v38, %v1443_v7  ;;  %v1447_v59 = vld [vmem:[#allocation8 + $0x140] sm:$0xff]  ;;  %v1458_v56 = vld [vmem:[#allocation8 + $0x198] sm:$0xff]  ;;  %v1457_v62 = vld [vmem:[#allocation8 + $0x190] sm:$0xff] }
 0x482   :  { %v1526_v23 = vsel %vm305_vm11, %v1524_v21, %v1525_v22  ;;  %v1490_v8 = vld [vmem:[#allocation2 + $0x88] sm:$0x1]  ;;  %v1429_v21 = vld [vmem:[#allocation8 + $0xb0] sm:$0xff]  ;;  %v1451_v51 = vld [vmem:[#allocation8 + $0x160] sm:$0xff] }
 0x483   :  { %1705 = vmatmul.mubr.f32.gmra.mrb[4].mxu1 %v1526_v23  ;;  %v1488_v24 = vld [vmem:[#allocation2 + $0x78] sm:$0x1]  ;;  %v1489_v25 = vld [vmem:[#allocation2 + $0x80] sm:$0x1]  ;;  %v1537_v0 = vrot.slane %v1490_v8, 1  ;;  %v1434_v23 = vld [vmem:[#allocation8 + $0xd8] sm:$0xff] }
 0x484   :  { %v1533_v26 = vrot.slane %v1488_v24, 1  ;;  %v1535_v27 = vrot.slane %v1489_v25, 1  ;;  %v2866_v24 = vpack.c.bf16 %v1429_v21, %v1427_v20  ;;  %v1460_v2 = vld [vmem:[#allocation8 + $0x1a8] sm:$0xff]  ;;  %v1459_v12 = vld [vmem:[#allocation8 + $0x1a0] sm:$0xff]  ;;  %v1465_v20 = vld [vmem:[#allocation8 + $0x1d0] sm:$0xff] }
 0x485   :  { %v1538_v14 = vsel %vm305_vm11, %v1531_v45, %v1537_v0  ;;  %v1452_v45 = vld [vmem:[#allocation8 + $0x168] sm:$0xff]  ;;  %v1455_v0 = vld [vmem:[#allocation8 + $0x180] sm:$0xff]  ;;  %v1401_v38 = vld [vmem:[#allocation2 + $0x48] sm:$0xff] }
 0x486   :  { %v1536_v13 = vsel %vm305_vm11, %v1528_v16, %v1535_v27  ;;  %v1534_v5 = vsel %vm305_vm11, %v1525_v22, %v1533_v26  ;;  %v1430_v16 = vld [vmem:[#allocation8 + $0xb8] sm:$0xff]  ;;  %v1432_v22 = vld [vmem:[#allocation8 + $0xc8] sm:$0xff]  ;;  %v1431_v26 = vld [vmem:[#allocation8 + $0xc0] sm:$0xff]  ;;  %v2888_v8 = vpack.c.bf16 %v1454_v6, %v1452_v45 }
 0x487   :  { %1710 = vmatprep.mubr.f32.mxu1 %v1536_v13  ;;  %v2864_v19 = vpack.c.bf16 %v1430_v16, %v1428_v15  ;;  %v2868_v25 = vpack.c.bf16 %v1434_v23, %v1432_v22  ;;  %v1433_v27 = vld [vmem:[#allocation8 + $0xd0] sm:$0xff]  ;;  %v1436_v13 = vld [vmem:[#allocation8 + $0xe8] sm:$0xff]  ;;  %v1466_v16 = vld [vmem:[#allocation8 + $0x1d8] sm:$0xff] }
 0x488   :  { %1711 = vmatmul.mubr.f32.gmra.mrb[6].mxu1 %v1534_v5  ;;  %v2870_v29 = vpack.c.bf16 %v1433_v27, %v1431_v26  ;;  %v2872_v53 = vpack.c.bf16 %v1438_v48, %v1436_v13  ;;  %v1435_v5 = vld [vmem:[#allocation8 + $0xe0] sm:$0xff]  ;;  %v1464_v15 = vld [vmem:[#allocation8 + $0x1c8] sm:$0xff]  ;;  %v1470_v22 = vld [vmem:[#allocation8 + $0x1f8] sm:$0xff] }
 0x489   :  { %1781 = vmatprep.mubr.f32.mxu1 %v3181_v1  ;;  %v2874_v49 = vpack.c.bf16 %v1437_v41, %v1435_v5  ;;  %v1468_v21 = vld [vmem:[#allocation8 + $0x1e8] sm:$0xff]  ;;  %v1469_v26 = vld [vmem:[#allocation8 + $0x1f0] sm:$0xff]  ;;  %v1474_v13 = vld [vmem:[#allocation8 + $0x218] sm:$0xff] }
 0x48a   :  { %v1472_v27 = vld [vmem:[#allocation8 + $0x208] sm:$0xff]  ;;  %v1473_v5 = vld [vmem:[#allocation8 + $0x210] sm:$0xff]  ;;  %v1402_v7 = vld [vmem:[#allocation2 + $0x50] sm:$0xff] }
 0x48b   :  { %v1476_v41 = vld [vmem:[#allocation8 + $0x228] sm:$0xff]  ;;  %v2061_v45 = vld [vmem:[#allocation8 + $0x4a0] sm:$0xff]  ;;  %v2063_v6 = vld [vmem:[#allocation8 + $0x4b0] sm:$0xff] }
 0x48c   :  { %2544 = vmatmul.mubr.msk.f32.vlgmr.msra.gmra.mrb[0].mxu1 %vm417_vm12, %v1517_v11 }
 0x48d   :  { %2847 = vmatpush1.bf16.msra.mxu1 %v2846_v34  ;;  %1787 = vmatprep.mubr.f32.mxu1 %v3181_v1  ;;  %v2876_v34 = vpack.c.bf16 %v1442_v31, %v1440_v30  ;;  %v1478_v30 = vld [vmem:[#allocation8 + $0x238] sm:$0xff] }
 0x48e   :  { %2849 = vmatprep.subr.bf16.mxu1 %v2848_v63  ;;  %v1439_v63 = vld [vmem:[#allocation8 + $0x100] sm:$0xff] }
 0x48f   :  { %v2878_v11 = vpack.c.bf16 %v1441_v33, %v1439_v63  ;;  %v1477_v63 = vld [vmem:[#allocation8 + $0x230] sm:$0xff] }
 0x490   :  { %2545 = vmatmul.mubr.msk.f32.gmra.mrb[2].mxu1 %vm417_vm12, %v1523_v43  ;;  %v1449_v43 = vld [vmem:[#allocation8 + $0x150] sm:$0xff] }
 0x491   :  { %2851 = vmatpush1.bf16.msra.mxu1 %v2850_v39  ;;  %1793 = vmatprep.mubr.f32.mxu1 %v3181_v1  ;;  %v1448_v39 = vld [vmem:[#allocation8 + $0x148] sm:$0xff]  ;;  %v2886_v50 = vpack.c.bf16 %v1449_v43, %v1447_v59  ;;  %v1395_v33 = vld [vmem:[#allocation2] sm:$0xff] }
 0x492   :  { %2853 = vmatprep.subr.bf16.mxu1 %v2852_v40  ;;  %v1450_v40 = vld [vmem:[#allocation8 + $0x158] sm:$0xff] }
 0x493   :  { %v2884_v55 = vpack.c.bf16 %v1450_v40, %v1448_v39  ;;  %v2057_v39 = vld [vmem:[#allocation8 + $0x480] sm:$0xff]  ;;  %v2059_v40 = vld [vmem:[#allocation8 + $0x490] sm:$0xff] }
 0x494   :  { %2546 = vmatmul.mubr.msk.f32.gmra.mrb[4].mxu1 %vm417_vm12, %v1532_v58  ;;  %v2918_v59 = vpack.c.bf16 %v2059_v40, %v2057_v39  ;;  %v2091_v39 = vld [vmem:[#allocation8 + $0x590] sm:$0xff]  ;;  %v2094_v40 = vld [vmem:[#allocation8 + $0x5a8] sm:$0xff] }
 0x495   :  { %2855 = vmatpush1.bf16.msra.mxu1 %v2854_v52  ;;  %1799 = vmatprep.mubr.f32.mxu1 %v3181_v1  ;;  %v1453_v52 = vld [vmem:[#allocation8 + $0x170] sm:$0xff] }
 0x496   :  { %2857 = vmatprep.subr.bf16.mxu1 %v2856_v54  ;;  %v1456_v54 = vld [vmem:[#allocation8 + $0x188] sm:$0xff]  ;;  %v2890_v57 = vpack.c.bf16 %v1453_v52, %v1451_v51  ;;  %v2068_v51 = vld [vmem:[#allocation8 + $0x4d8] sm:$0xff]  ;;  %v2922_v52 = vpack.c.bf16 %v2063_v6, %v2061_v45  ;;  %v2095_v45 = vld [vmem:[#allocation8 + $0x5b0] sm:$0xff] }
 0x497   :  { %v2892_v58 = vpack.c.bf16 %v1458_v56, %v1456_v54  ;;  %v2065_v56 = vld [vmem:[#allocation8 + $0x4c0] sm:$0xff]  ;;  %v2098_v6 = vld [vmem:[#allocation8 + $0x5c8] sm:$0xff] }
 0x498   :  { %2547 = vmatmul.mubr.msk.f32.gmra.mrb[6].mxu1 %vm417_vm12, %v1538_v14  ;;  %v1461_v14 = vld [vmem:[#allocation8 + $0x1b0] sm:$0xff] }
 0x499   :  { %2859 = vmatpush1.bf16.msra.mxu1 %v2858_v3  ;;  %1880 = vmatprep.mubr.f32.mxu1 %v1396_v17  ;;  %v1462_v3 = vld [vmem:[#allocation8 + $0x1b8] sm:$0xff]  ;;  %v2898_v17 = vpack.c.bf16 %v1461_v14, %v1459_v12  ;;  %v1403_v12 = vld [vmem:[#allocation2 + $0x58] sm:$0xff] }
 0x49a   :  { %2861 = vmatprep.subr.bf16.mxu1 %v2860_v4  ;;  %v2894_v4 = vpack.c.bf16 %v1457_v62, %v1455_v0  ;;  %v2896_v10 = vpack.c.bf16 %v1462_v3, %v1460_v2  ;;  %v2072_v0 = vld [vmem:[#allocation8 + $0x4f8] sm:$0xff]  ;;  %v2074_v14 = vld [vmem:[#allocation8 + $0x508] sm:$0xff] }
 0x49b   :  { %v1995_v2 = vld [vmem:[#allocation2 + $0x8] sm:$0xfc] }
 0x49d   :  { %2863 = vmatpush1.bf16.msra.mxu1 %v2862_v18  ;;  %v2900_v18 = vpack.c.bf16 %v1466_v16, %v1464_v15  ;;  %v2076_v15 = vld [vmem:[#allocation8 + $0x518] sm:$0xff]  ;;  %v2021_v16 = vrot.slane %v1995_v2, 2  ;;  %v2103_v2 = vld [vmem:[#allocation8 + $0x5f0] sm:$0xff] }
 0x49e   :  { %2865 = vmatprep.subr.bf16.mxu1 %v2864_v19  ;;  %v1463_v19 = vld [vmem:[#allocation8 + $0x1c0] sm:$0xff] }
 0x49f   :  { %v2902_v23 = vpack.c.bf16 %v1465_v20, %v1463_v19  ;;  %v2932_v19 = vpack.c.bf16 %v2076_v15, %v2074_v14  ;;  %v2073_v20 = vld [vmem:[#allocation8 + $0x500] sm:$0xff]  ;;  %v2107_v15 = vld [vmem:[#allocation8 + $0x610] sm:$0xff] }
 0x4a0   :  { %v2105_v14 = vld [vmem:[#allocation8 + $0x600] sm:$0xff] }
 0x4a1   :  { %2867 = vmatpush1.bf16.msra.mxu1 %v2866_v24  ;;  %v2904_v24 = vpack.c.bf16 %v1470_v22, %v1468_v21  ;;  %v2075_v21 = vld [vmem:[#allocation8 + $0x510] sm:$0xff]  ;;  %v2078_v22 = vld [vmem:[#allocation8 + $0x528] sm:$0xff] }
 0x4a2   :  { %2869 = vmatprep.subr.bf16.mxu1 %v2868_v25  ;;  %v1467_v25 = vld [vmem:[#allocation8 + $0x1e0] sm:$0xff] }
 0x4a3   :  { %v2906_v48 = vpack.c.bf16 %v1469_v26, %v1467_v25  ;;  %v2934_v25 = vpack.c.bf16 %v2075_v21, %v2073_v20  ;;  %v2109_v21 = vld [vmem:[#allocation8 + $0x620] sm:$0xff] }
 0x4a5   :  { %2871 = vmatpush1.bf16.msra.mxu1 %v2870_v29  ;;  %v2908_v29 = vpack.c.bf16 %v1474_v13, %v1472_v27  ;;  %v2077_v27 = vld [vmem:[#allocation8 + $0x520] sm:$0xff]  ;;  %v2079_v13 = vld [vmem:[#allocation8 + $0x530] sm:$0xff] }
 0x4a6   :  { %2873 = vmatprep.subr.bf16.mxu1 %v2872_v53  ;;  %v1471_v53 = vld [vmem:[#allocation8 + $0x200] sm:$0xff] }
 0x4a7   :  { %v2910_v31 = vpack.c.bf16 %v1473_v5, %v1471_v53  ;;  %v2938_v53 = vpack.c.bf16 %v2079_v13, %v2077_v27  ;;  %v2113_v27 = vld [vmem:[#allocation8 + $0x640] sm:$0xff]  ;;  %v2115_v13 = vld [vmem:[#allocation8 + $0x650] sm:$0xff] }
 0x4a9   :  { %2875 = vmatpush1.bf16.msra.mxu1 %v2874_v49  ;;  %v2912_v49 = vpack.c.bf16 %v1478_v30, %v1476_v41  ;;  %v2081_v41 = vld [vmem:[#allocation8 + $0x540] sm:$0xff]  ;;  %v2083_v30 = vld [vmem:[#allocation8 + $0x550] sm:$0xff] }
 0x4aa   :  { %2877 = vmatprep.subr.bf16.mxu1 %v2876_v34  ;;  %v1475_v34 = vld [vmem:[#allocation8 + $0x220] sm:$0xff] }
 0x4ad   :  { %2879 = vmatpush1.bf16.msra.mxu1 %v2878_v11  ;;  %v2914_v11 = vpack.c.bf16 %v1477_v63, %v1475_v34  ;;  %v2942_v34 = vpack.c.bf16 %v2083_v30, %v2081_v41  ;;  %v2117_v41 = vld [vmem:[#allocation8 + $0x660] sm:$0xff]  ;;  %v2119_v30 = vld [vmem:[#allocation8 + $0x670] sm:$0xff] }
 0x4ae   :  { %2881 = vmatprep.subr.bf16.mxu1 %v2880_v35  ;;  %v2916_v35 = vpack.c.bf16 %v2060_v47, %v2058_v60  ;;  %v2087_v60 = vld [vmem:[#allocation8 + $0x570] sm:$0xff]  ;;  %v2090_v47 = vld [vmem:[#allocation8 + $0x588] sm:$0xff] }
 0x4b1   :  { %2883 = vmatpush1.bf16.msra.mxu1 %v2882_v42  ;;  %v2062_v42 = vld [vmem:[#allocation8 + $0x4a8] sm:$0xff] }
 0x4b2   :  { %2885 = vmatprep.subr.bf16.mxu1 %v2884_v55  ;;  %v2064_v55 = vld [vmem:[#allocation8 + $0x4b8] sm:$0xff] }
 0x4b3   :  { %v2920_v43 = vpack.c.bf16 %v2064_v55, %v2062_v42  ;;  %v2096_v42 = vld [vmem:[#allocation8 + $0x5b8] sm:$0xff] }
 0x4b5   :  { %2887 = vmatpush1.bf16.msra.mxu1 %v2886_v50  ;;  %v1397_v50 = vld [vmem:[#allocation2 + $0x10] sm:$0xff] }
 0x4b6   :  { %2889 = vmatprep.subr.bf16.mxu1 %v2888_v8  ;;  %v2066_v8 = vld [vmem:[#allocation8 + $0x4c8] sm:$0xff] }
 0x4b7   :  { %v2924_v54 = vpack.c.bf16 %v2068_v51, %v2066_v8 }
 0x4b9   :  { %2891 = vmatpush1.bf16.msra.mxu1 %v2890_v57  ;;  %v2067_v57 = vld [vmem:[#allocation8 + $0x4d0] sm:$0xff] }
 0x4ba   :  { %2893 = vmatprep.subr.bf16.mxu1 %v2892_v58  ;;  %v2070_v58 = vld [vmem:[#allocation8 + $0x4e8] sm:$0xff]  ;;  %v2926_v62 = vpack.c.bf16 %v2067_v57, %v2065_v56  ;;  %v2104_v57 = vld [vmem:[#allocation8 + $0x5f8] sm:$0xff] }
 0x4bb   :  { %v2928_v3 = vpack.c.bf16 %v2072_v0, %v2070_v58  ;;  %v2102_v56 = vld [vmem:[#allocation8 + $0x5e8] sm:$0xff] }
 0x4bc   :  { %v2960_v0 = vpack.c.bf16 %v2104_v57, %v2102_v56  ;;  %v2037_v56 = vrot.slane %v3557_v46, 2  ;;  %v2000_v57 = vld [vmem:[#allocation2 + $0x48] sm:$0xfc] }
 0x4bd   :  { %2895 = vmatpush1.bf16.msra.mxu1 %v2894_v4  ;;  %v2069_v4 = vld [vmem:[#allocation8 + $0x4e0] sm:$0xff] }
 0x4be   :  { %2897 = vmatprep.subr.bf16.mxu1 %v2896_v10  ;;  %v2071_v10 = vld [vmem:[#allocation8 + $0x4f0] sm:$0xff] }
 0x4c1   :  { %2899 = vmatpush1.bf16.msra.mxu1 %v2898_v17  ;;  %v2022_v17 = vrot.slane %v3545_v32, 2 }
 0x4c2   :  { %2901 = vmatprep.subr.bf16.mxu1 %v2900_v18  ;;  %v2930_v18 = vpack.c.bf16 %v2071_v10, %v2069_v4  ;;  %v2108_v4 = vld [vmem:[#allocation8 + $0x618] sm:$0xff] }
 0x4c5   :  { %2903 = vmatpush1.bf16.msra.mxu1 %v2902_v23  ;;  %v2080_v23 = vld [vmem:[#allocation8 + $0x538] sm:$0xff] }
 0x4c6   :  { %2905 = vmatprep.subr.bf16.mxu1 %v2904_v24  ;;  %v2023_v24 = vsel %vm816_vm13, %v2021_v16, %v2022_v17  ;;  %v2936_v26 = vpack.c.bf16 %v2080_v23, %v2078_v22  ;;  %v2110_v16 = vld [vmem:[#allocation8 + $0x628] sm:$0xff]  ;;  %v2111_v22 = vld [vmem:[#allocation8 + $0x630] sm:$0xff] }
 0x4c7   :  { %v2114_v23 = vld [vmem:[#allocation8 + $0x648] sm:$0xff] }
 0x4c9   :  { %2907 = vmatpush1.bf16.msra.mxu1 %v2906_v48  ;;  %v2082_v48 = vld [vmem:[#allocation8 + $0x548] sm:$0xff] }
 0x4ca   :  { %2909 = vmatprep.subr.bf16.mxu1 %v2908_v29  ;;  %v2084_v29 = vld [vmem:[#allocation8 + $0x558] sm:$0xff] }
 0x4cb   :  { %v2940_v5 = vpack.c.bf16 %v2084_v29, %v2082_v48  ;;  %v2118_v48 = vld [vmem:[#allocation8 + $0x668] sm:$0xff]  ;;  %v2120_v29 = vld [vmem:[#allocation8 + $0x678] sm:$0xff] }
 0x4cc   :  { %1881 = vmatmul.mubr.f32.vlgmr.msra.gmra.mrb[0].mxu1 %v1395_v33  ;;  %v2085_v33 = vld [vmem:[#allocation8 + $0x560] sm:$0xff] }
 0x4cd   :  { %1886 = vmatprep.mubr.f32.mxu1 %v3545_v32  ;;  %2911 = vmatpush1.bf16.msra.mxu1 %v2910_v31  ;;  %v2086_v31 = vld [vmem:[#allocation8 + $0x568] sm:$0xff] }
 0x4ce   :  { %2913 = vmatprep.subr.bf16.mxu1 %v2912_v49  ;;  %v2088_v49 = vld [vmem:[#allocation8 + $0x578] sm:$0xff] }
 0x4cf   :  { %v2944_v63 = vpack.c.bf16 %v2088_v49, %v2086_v31  ;;  %v2122_v31 = vld [vmem:[#allocation8 + $0x688] sm:$0xff]  ;;  %v2124_v49 = vld [vmem:[#allocation8 + $0x698] sm:$0xff] }
 0x4d0   :  { %1887 = vmatmul.mubr.f32.gmra.mrb[2].mxu1 %v3553_v44 }
 0x4d1   :  { %1892 = vmatprep.mubr.f32.mxu1 %v1402_v7  ;;  %2915 = vmatpush1.bf16.msra.mxu1 %v2914_v11  ;;  %v2092_v11 = vld [vmem:[#allocation8 + $0x598] sm:$0xff] }
 0x4d2   :  { %2917 = vmatprep.subr.bf16.mxu1 %v2916_v35  ;;  %v2946_v35 = vpack.c.bf16 %v2087_v60, %v2085_v33  ;;  %v2948_v7 = vpack.c.bf16 %v2092_v11, %v2090_v47  ;;  %v1994_v33 = vld [vmem:[#allocation2] sm:$0xfc]  ;;  %v2980_v60 = vpack.c.bf16 %v2124_v49, %v2122_v31  ;;  %v2121_v47 = vld [vmem:[#allocation8 + $0x680] sm:$0xff] }
 0x4d3   :  { %v2123_v11 = vld [vmem:[#allocation8 + $0x690] sm:$0xff] }
 0x4d4   :  { %1893 = vmatmul.mubr.f32.gmra.mrb[4].mxu1 %v1401_v38  ;;  %v2089_v38 = vld [vmem:[#allocation8 + $0x580] sm:$0xff] }
 0x4d5   :  { %1898 = vmatprep.mubr.f32.mxu1 %v3557_v46  ;;  %v2950_v55 = vpack.c.bf16 %v2091_v39, %v2089_v38  ;;  %v2128_v38 = vld [vmem:[#allocation8 + $0x6b8] sm:$0xff] }
 0x4d8   :  { %1899 = vmatmul.mubr.f32.gmra.mrb[6].mxu1 %v3569_v9 }
 0x4d9   :  { %1969 = vmatprep.mubr.f32.mxu1 %v3181_v1 }
 0x4dc   :  { %2548 = vmatmul.mubr.msk.f32.vlgmr.msra.gmra.mrb[0].mxu1 %vm417_vm12, %v1397_v50  ;;  %v2100_v50 = vld [vmem:[#allocation8 + $0x5d8] sm:$0xff] }
 0x4dd   :  { %2919 = vmatpush1.bf16.msra.mxu1 %v2918_v59  ;;  %1975 = vmatprep.mubr.f32.mxu1 %v3181_v1  ;;  %v2952_v59 = vpack.c.bf16 %v2096_v42, %v2094_v40  ;;  %v2956_v51 = vpack.c.bf16 %v2100_v50, %v2098_v6  ;;  %v2018_v40 = vrot.slane %v1994_v33, 2  ;;  %v2982_v42 = vpack.c.bf16 %v2123_v11, %v2121_v47  ;;  %v2127_v6 = vld [vmem:[#allocation8 + $0x6b0] sm:$0xff] }
 0x4de   :  { %2921 = vmatprep.subr.bf16.mxu1 %v2920_v43  ;;  %v2093_v43 = vld [vmem:[#allocation8 + $0x5a0] sm:$0xff] }
 0x4df   :  { %v2954_v8 = vpack.c.bf16 %v2095_v45, %v2093_v43  ;;  %v2125_v45 = vld [vmem:[#allocation8 + $0x6a0] sm:$0xff] }
 0x4e0   :  { %2549 = vmatmul.mubr.msk.f32.gmra.mrb[2].mxu1 %vm417_vm12, %v3573_v28 }
 0x4e1   :  { %2923 = vmatpush1.bf16.msra.mxu1 %v2922_v52  ;;  %1981 = vmatprep.mubr.f32.mxu1 %v3181_v1  ;;  %v2097_v52 = vld [vmem:[#allocation8 + $0x5c0] sm:$0xff] }
 0x4e2   :  { %2925 = vmatprep.subr.bf16.mxu1 %v2924_v54  ;;  %v2099_v54 = vld [vmem:[#allocation8 + $0x5d0] sm:$0xff] }
 0x4e3   :  { %v2958_v58 = vpack.c.bf16 %v2099_v54, %v2097_v52  ;;  %v2004_v52 = vld [vmem:[#allocation2 + $0x80] sm:$0x3]  ;;  %v2986_v54 = vpack.c.bf16 %v2127_v6, %v2125_v45 }
 0x4e4   :  { %2550 = vmatmul.mubr.msk.f32.gmra.mrb[4].mxu1 %vm417_vm12, %v1403_v12  ;;  %v2044_v32 = vrot.slane %v2004_v52, 2 }
 0x4e5   :  { %2927 = vmatpush1.bf16.msra.mxu1 %v2926_v62  ;;  %1987 = vmatprep.mubr.f32.mxu1 %v3181_v1  ;;  %v2101_v62 = vld [vmem:[#allocation8 + $0x5e0] sm:$0xff] }
 0x4e6   :  { %2929 = vmatprep.subr.bf16.mxu1 %v2928_v3  ;;  %v2106_v3 = vld [vmem:[#allocation8 + $0x608] sm:$0xff]  ;;  %v2962_v10 = vpack.c.bf16 %v2103_v2, %v2101_v62  ;;  %v2045_v46 = vsel %vm816_vm13, %v2037_v56, %v2044_v32 }
 0x4e7   :  { %v2964_v12 = vpack.c.bf16 %v2108_v4, %v2106_v3  ;;  %v2003_v2 = vld [vmem:[#allocation2 + $0x78] sm:$0x3] }
 0x4e8   :  { %2551 = vmatmul.mubr.msk.f32.gmra.mrb[6].mxu1 %vm417_vm12, %v3581_v36  ;;  %v2042_v4 = vrot.slane %v2003_v2, 2 }
 0x4e9   :  { %2931 = vmatpush1.bf16.msra.mxu1 %v2930_v18  ;;  %2201 = vmatprep.mubr.f32.mxu1 %v2023_v24  ;;  %v2112_v18 = vld [vmem:[#allocation8 + $0x638] sm:$0xff] }
 0x4ea   :  { %2933 = vmatprep.subr.bf16.mxu1 %v2932_v19  ;;  %v2966_v19 = vpack.c.bf16 %v2107_v15, %v2105_v14  ;;  %v2968_v20 = vpack.c.bf16 %v2112_v18, %v2110_v16  ;;  %v2116_v24 = vld [vmem:[#allocation8 + $0x658] sm:$0xff]  ;;  %v1999_v15 = vld [vmem:[#allocation2 + $0x40] sm:$0x3] }
 0x4eb   :  { %v2031_v18 = vrot.slane %v1999_v15, 2 }
 0x4ed   :  { %2935 = vmatpush1.bf16.msra.mxu1 %v2934_v25  ;;  %v2970_v25 = vpack.c.bf16 %v2111_v22, %v2109_v21  ;;  %v2040_v21 = vrot.slane %v3581_v36, 2 }
 0x4ee   :  { %2937 = vmatprep.subr.bf16.mxu1 %v2936_v26  ;;  %v2972_v26 = vpack.c.bf16 %v2116_v24, %v2114_v23 }
 0x4f1   :  { %2939 = vmatpush1.bf16.msra.mxu1 %v2938_v53  ;;  %v2974_v53 = vpack.c.bf16 %v2115_v13, %v2113_v27 }
 0x4f2   :  { %2941 = vmatprep.subr.bf16.mxu1 %v2940_v5  ;;  %v2976_v5 = vpack.c.bf16 %v2120_v29, %v2118_v48 }
 0x4f5   :  { %2943 = vmatpush1.bf16.msra.mxu1 %v2942_v34  ;;  %v2978_v34 = vpack.c.bf16 %v2119_v30, %v2117_v41 }
 0x4f6   :  { %2945 = vmatprep.subr.bf16.mxu1 %v2944_v63  ;;  %v1998_v63 = vld [vmem:[#allocation2 + $0x38] sm:$0x3] }
 0x4f7   :  { %v2029_v39 = vrot.slane %v1998_v63, 2 }
 0x4f9   :  { %2947 = vmatpush1.bf16.msra.mxu1 %v2946_v35  ;;  %v2019_v35 = vrot.slane %v3553_v44, 2 }
 0x4fa   :  { %2949 = vmatprep.subr.bf16.mxu1 %v2948_v7  ;;  %v2126_v7 = vld [vmem:[#allocation8 + $0x6a8] sm:$0xff] }
 0x4fb   :  { %v2984_v43 = vpack.c.bf16 %v2128_v38, %v2126_v7  ;;  %v2020_v50 = vsel %vm816_vm13, %v2018_v40, %v2019_v35 }
 0x4fd   :  { %2951 = vmatpush1.bf16.msra.mxu1 %v2950_v55  ;;  %v2001_v55 = vld [vmem:[#allocation2 + $0x50] sm:$0xfc] }
 0x4fe   :  { %2953 = vmatprep.subr.bf16.mxu1 %v2952_v59  ;;  %v1997_v59 = vld [vmem:[#allocation2 + $0x30] sm:$0x3]  ;;  %v2036_v44 = vrot.slane %v2001_v55, 2 }
 0x500   :  { %v2038_v62 = vsel %vm816_vm13, %v2036_v44, %v2037_v56 }
 0x501   :  { %2955 = vmatpush1.bf16.msra.mxu1 %v2954_v8  ;;  %v2030_v8 = vsel %vm816_vm13, %v2022_v17, %v2029_v39  ;;  %v2033_v17 = vrot.slane %v2000_v57, 2 }
 0x502   :  { %2957 = vmatprep.subr.bf16.mxu1 %v2956_v51  ;;  %v2027_v51 = vrot.slane %v1997_v59, 2 }
 0x505   :  { %2959 = vmatpush1.bf16.msra.mxu1 %v2958_v58  ;;  %v2028_v58 = vsel %vm816_vm13, %v2019_v35, %v2027_v51 }
 0x506   :  { %2961 = vmatprep.subr.bf16.mxu1 %v2960_v0  ;;  %v2034_v0 = vrot.slane %v3569_v9, 2  ;;  %v2025_v9 = vrot.slane %v3573_v28, 2  ;;  %v2005_v28 = vld [vmem:[#allocation2 + $0x88] sm:$0x3] }
 0x507   :  { %v2046_v24 = vrot.slane %v2005_v28, 2 }
 0x508   :  { %v2035_v3 = vsel %vm816_vm13, %v2033_v17, %v2034_v0 }
 0x509   :  { %2963 = vmatpush1.bf16.msra.mxu1 %v2962_v10  ;;  %v1996_v10 = vld [vmem:[#allocation2 + $0x10] sm:$0xfc] }
 0x50a   :  { %2965 = vmatprep.subr.bf16.mxu1 %v2964_v12  ;;  %v2043_v12 = vsel %vm816_vm13, %v2034_v0, %v2042_v4  ;;  %v2024_v14 = vrot.slane %v1996_v10, 2 }
 0x50c   :  { %v2026_v16 = vsel %vm816_vm13, %v2024_v14, %v2025_v9 }
 0x50d   :  { %2967 = vmatpush1.bf16.msra.mxu1 %v2966_v19  ;;  %v2002_v19 = vld [vmem:[#allocation2 + $0x58] sm:$0xfc] }
 0x50e   :  { %2969 = vmatprep.subr.bf16.mxu1 %v2968_v20  ;;  %v2032_v20 = vsel %vm816_vm13, %v2025_v9, %v2031_v18  ;;  %v2039_v22 = vrot.slane %v2002_v19, 2 }
 0x510   :  { %v2041_v23 = vsel %vm816_vm13, %v2039_v22, %v2040_v21 }
 0x511   :  { %2971 = vmatpush1.bf16.msra.mxu1 %v2970_v25  ;;  %v2047_v25 = vsel %vm816_vm13, %v2040_v21, %v2046_v24 }
 0x512   :  { %2973 = vmatprep.subr.bf16.mxu1 %v2972_v26 }
 0x515   :  { %2975 = vmatpush1.bf16.msra.mxu1 %v2974_v53 }
 0x516   :  { %2977 = vmatprep.subr.bf16.mxu1 %v2976_v5 }
 0x519   :  { %2979 = vmatpush1.bf16.msra.mxu1 %v2978_v34 }
 0x51a   :  { %2981 = vmatprep.subr.bf16.mxu1 %v2980_v60 }
 0x51c   :  { %2202 = vmatmul.mubr.f32.vlgmr.msra.gmra.mrb[0].mxu1 %v2020_v50 }
 0x51d   :  { %2207 = vmatprep.mubr.f32.mxu1 %v2030_v8  ;;  %2983 = vmatpush1.bf16.msra.mxu1 %v2982_v42 }
 0x51e   :  { %2985 = vmatprep.subr.bf16.mxu1 %v2984_v43 }
 0x520   :  { %2208 = vmatmul.mubr.f32.gmra.mrb[2].mxu1 %v2028_v58 }
 0x521   :  { %2213 = vmatprep.mubr.f32.mxu1 %v2038_v62  ;;  %2987 = vmatpush1.bf16.msra.mxu1 %v2986_v54 }
 0x524   :  { %2214 = vmatmul.mubr.f32.gmra.mrb[4].mxu1 %v2035_v3 }
 0x525   :  { %2219 = vmatprep.mubr.f32.mxu1 %v2045_v46 }
 0x528   :  { %2220 = vmatmul.mubr.f32.gmra.mrb[6].mxu1 %v2043_v12 }
 0x529   :  { %2290 = vmatprep.mubr.f32.mxu1 %v3181_v1 }
 0x52c   :  { %2552 = vmatmul.mubr.msk.f32.vlgmr.msra.gmra.mrb[0].mxu1 %vm417_vm12, %v2026_v16 }
 0x52d   :  { %2296 = vmatprep.mubr.f32.mxu1 %v3181_v1 }
 0x530   :  { %2553 = vmatmul.mubr.msk.f32.gmra.mrb[2].mxu1 %vm417_vm12, %v2032_v20 }
 0x531   :  { %2302 = vmatprep.mubr.f32.mxu1 %v3181_v1 }
 0x534   :  { %2554 = vmatmul.mubr.msk.f32.gmra.mrb[4].mxu1 %vm417_vm12, %v2041_v23 }
 0x535   :  { %2308 = vmatprep.mubr.f32.mxu1 %v3181_v1 }
 0x538   :  { %2555 = vmatmul.mubr.msk.f32.gmra.mrb[6].mxu1 %vm417_vm12, %v2047_v25 }
 0x5ff   :  { %v3637_v26 = vpop.f32.mrb[0].mxu1 }
 0x600   :  { %v3639_v36 = vpop.f32.mrb[1].mxu1  ;;  %v2341_v13 = vmul.f32 %v3637_v26, %v3637_v26 }
 0x601   :  { %v2342_v53 = vmul.f32 %v3639_v36, %v3639_v36 }
 0x603   :  { %v3641_v27 = vpop.f32.mrb[2].mxu1 }
 0x604   :  { %v2323_v48 = vadd.f32 %v3641_v27, %v3637_v26  ;;  %v2343_v29 = vmul.f32 %v3641_v27, %v3641_v27  ;;  %v3649_v1 = vpop.f32.mrb[3].mxu1 }
 0x605   :  { %v2332_v5 = vadd.f32 %v3649_v1, %v3639_v36  ;;  %v2344_v41 = vmul.f32 %v3649_v1, %v3649_v1 }
 0x606   :  { %v2349_v30 = vadd.f32 %v2343_v29, %v2341_v13 }
 0x607   :  { %v2358_v31 = vadd.f32 %v2344_v41, %v2342_v53  ;;  %v3657_v49 = vpop.f32.mrb[4].mxu1 }
 0x608   :  { %v2324_v34 = vadd.f32 %v2323_v48, %v3657_v49  ;;  %v2345_v63 = vmul.f32 %v3657_v49, %v3657_v49  ;;  %v3662_v33 = vpop.f32.mrb[5].mxu1 }
 0x609   :  { %v2333_v60 = vadd.f32 %v2332_v5, %v3662_v33  ;;  %v2346_v47 = vmul.f32 %v3662_v33, %v3662_v33 }
 0x60a   :  { %v2350_v11 = vadd.f32 %v2349_v30, %v2345_v63 }
 0x60b   :  { %v2359_v35 = vadd.f32 %v2358_v31, %v2346_v47  ;;  %v3667_v7 = vpop.f32.mrb[6].mxu1 }
 0x60c   :  { %v2325_v38 = vadd.f32 %v2324_v34, %v3667_v7  ;;  %v2347_v39 = vmul.f32 %v3667_v7, %v3667_v7  ;;  %v3672_v40 = vpop.f32.mrb[7].mxu1 }
 0x60d   :  { %v2334_v42 = vadd.f32 %v2333_v60, %v3672_v40  ;;  %v2348_v55 = vmul.f32 %v3672_v40, %v3672_v40 }
 0x60e   :  { %v2326_v59 = vrot.slane %v2325_v38, 4  ;;  %v2351_v43 = vadd.f32 %v2350_v11, %v2347_v39 }
 0x60f   :  { %v2335_v45 = vrot.slane %v2334_v42, 4  ;;  %v2360_v6 = vadd.f32 %v2359_v35, %v2348_v55 }
 0x610   :  { %v2327_v50 = vadd.f32 %v2326_v59, %v2325_v38  ;;  %v2352_v8 = vrot.slane %v2351_v43, 4 }
 0x611   :  { %v2336_v44 = vadd.f32 %v2335_v45, %v2334_v42  ;;  %v2361_v51 = vrot.slane %v2360_v6, 4 }
 0x612   :  { %v2328_v52 = vrot.slane %v2327_v50, 2  ;;  %v2353_v54 = vadd.f32 %v2352_v8, %v2351_v43 }
 0x613   :  { %v2337_v56 = vrot.slane %v2336_v44, 2  ;;  %v2362_v57 = vadd.f32 %v2361_v51, %v2360_v6 }
 0x614   :  { %v2329_v58 = vadd.f32 %v2328_v52, %v2327_v50  ;;  %v2354_v0 = vrot.slane %v2353_v54, 2 }
 0x615   :  { %v2338_v62 = vadd.f32 %v2337_v56, %v2336_v44  ;;  %v2363_v32 = vrot.slane %v2362_v57, 2 }
 0x616   :  { %v2330_v2 = vrot.slane %v2329_v58, 1  ;;  %v2355_v17 = vadd.f32 %v2354_v0, %v2353_v54 }
 0x617   :  { %v2339_v3 = vrot.slane %v2338_v62, 1  ;;  %v2364_v4 = vadd.f32 %v2363_v32, %v2362_v57 }
 0x618   :  { %v2331_v46 = vadd.f32 %v2330_v2, %v2329_v58  ;;  %v2356_v10 = vrot.slane %v2355_v17, 1 }
 0x619   :  { %v2340_v12 = vadd.f32 %v2339_v3, %v2338_v62  ;;  %v2365_v9 = vrot.slane %v2364_v4, 1  ;;  %v2435_v3 = vsub.s32 6, %v3504_v61 }
 0x61a   :  { %2367 = vrot.lane.b32.xlu0 %v2331_v46, %s3179_s28  ;;  %v2357_v14 = vadd.f32 %v2356_v10, %v2355_v17  ;;  %v2431_v17 = vsub.s32 2, %v3504_v61 }
 0x61b   :  { %2369 = vrot.lane.b32.xlu1 %v2340_v12, %s3179_s28  ;;  %v2366_v15 = vadd.f32 %v2365_v9, %v2364_v4 }
 0x61e   :  { %2393 = vrot.lane.b32.xlu0 %v2357_v14, %s3179_s28 }
 0x61f   :  { %2395 = vrot.lane.b32.xlu1 %v2366_v15, %s3179_s28 }
 0x68c   :  { %v2368_v16 = vpop.permute.xlu0 %2367 }
 0x68d   :  { %v2370_v18 = vpop.permute.xlu1 %2369 }
 0x68e   :  { %v2371_v19 = vsel %vm1172_vm14, %v2368_v16, %v2370_v18  ;;  %v2372_v20 = vsel %vm1172_vm14, %v2370_v18, %v2368_v16  ;;  %v2466_v16 = vsub.s32 3, %v3504_v61  ;;  %v2470_v18 = vsub.s32 7, %v3504_v61 }
 0x68f   :  { %v2373_v21 = vadd.f32 %v2372_v20, %v2331_v46  ;;  %v2374_v28 = vadd.f32 %v2371_v19, %v2340_v12 }
 0x690   :  { %v2394_v22 = vpop.permute.xlu0 %2393 }
 0x691   :  { %2375 = vrot.lane.b32.xlu0 %v2373_v21, %s3182_s2  ;;  %2377 = vrot.lane.b32.xlu1 %v2374_v28, %s3182_s2  ;;  %v2396_v23 = vpop.permute.xlu1 %2395 }
 0x692   :  { %v2397_v24 = vsel %vm1172_vm14, %v2394_v22, %v2396_v23  ;;  %v2398_v25 = vsel %vm1172_vm14, %v2396_v23, %v2394_v22 }
 0x693   :  { %v2399_v13 = vadd.f32 %v2398_v25, %v2357_v14  ;;  %v2400_v48 = vadd.f32 %v2397_v24, %v2366_v15 }
 0x695   :  { %2401 = vrot.lane.b32.xlu0 %v2399_v13, %s3182_s2  ;;  %2403 = vrot.lane.b32.xlu1 %v2400_v48, %s3182_s2 }
 0x703   :  { %v2376_v29 = vpop.permute.xlu0 %2375  ;;  %v2378_v53 = vpop.permute.xlu1 %2377 }
 0x704   :  { %v2379_v5 = vsel %vm1181_vm15, %v2376_v29, %v2378_v53  ;;  %v2380_v41 = vsel %vm1181_vm15, %v2378_v53, %v2376_v29 }
 0x705   :  { %v2381_v30 = vadd.f32 %v2380_v41, %v2373_v21  ;;  %v2382_v31 = vadd.f32 %v2379_v5, %v2374_v28  ;;  %v2490_v5 = vld [vmem:[#allocation3] sm:$0xff]  ;;  %v2491_v41 = vld [vmem:[#allocation3 + $0x8] sm:$0xff] }
 0x707   :  { %v2402_v34 = vpop.permute.xlu0 %2401  ;;  %2383 = vrot.lane.b32.xlu0 %v2381_v30, %s3183_s25  ;;  %2385 = vrot.lane.b32.xlu1 %v2382_v31, %s3183_s25  ;;  %v2404_v63 = vpop.permute.xlu1 %2403 }
 0x708   :  { %v2405_v60 = vsel %vm1181_vm15, %v2402_v34, %v2404_v63  ;;  %v2406_v47 = vsel %vm1181_vm15, %v2404_v63, %v2402_v34  ;;  %v2492_v63 = vld [vmem:[#allocation3 + $0x10] sm:$0xff] }
 0x709   :  { %v2407_v11 = vadd.f32 %v2406_v47, %v2399_v13  ;;  %v2408_v35 = vadd.f32 %v2405_v60, %v2400_v48  ;;  %v2494_v60 = vld [vmem:[#allocation3 + $0x20] sm:$0xff] }
 0x70b   :  { %2409 = vrot.lane.b32.xlu0 %v2407_v11, %s3183_s25  ;;  %2411 = vrot.lane.b32.xlu1 %v2408_v35, %s3183_s25 }
 0x779   :  { %v2384_v38 = vpop.permute.xlu0 %2383  ;;  %v2386_v39 = vpop.permute.xlu1 %2385 }
 0x77a   :  { %v2387_v42 = vsel %vm1190_vm0, %v2384_v38, %v2386_v39  ;;  %v2388_v55 = vsel %vm1190_vm0, %v2386_v39, %v2384_v38  ;;  %v2497_v38 = vld [vmem:[#allocation3 + $0x38] sm:$0xff] }
 0x77b   :  { %v2389_v59 = vadd.f32 %v2388_v55, %v2381_v30  ;;  %v2390_v43 = vadd.f32 %v2387_v42, %v2382_v31 }
 0x77d   :  { %v2391_v45 = vadd.f32 %v2390_v43, %v2389_v59  ;;  %v2410_v6 = vpop.permute.xlu0 %2409  ;;  %v2412_v50 = vpop.permute.xlu1 %2411 }
 0x77e   :  { %v2413_v8 = vsel %vm1190_vm0, %v2410_v6, %v2412_v50  ;;  %v2414_v44 = vsel %vm1190_vm0, %v2412_v50, %v2410_v6 }
 0x77f   :  { %v2392_v51 = vmul.f32 0.001953125, %v2391_v45  ;;  %v2415_v52 = vadd.f32 %v2414_v44, %v2407_v11  ;;  %v2416_v54 = vadd.f32 %v2413_v8, %v2408_v35  ;;  %v2496_v35 = vld [vmem:[#allocation3 + $0x30] sm:$0xff] }
 0x781   :  { %v2417_v56 = vadd.f32 %v2416_v54, %v2415_v52  ;;  %v2419_v57 = vmul.f32 %v2392_v51, %v2392_v51 }
 0x783   :  { %v2418_v58 = vmul.f32 0.001953125, %v2417_v56 }
 0x785   :  { %v2420_v0 = vsub.f32 %v2418_v58, %v2419_v57 }
 0x787   :  { %v2421_v62 = vadd.f32 1e-05, %v2420_v0 }
 0x789   :  { %3079 = vrsqrt.f32 %v2421_v62 }
 0x793   :  { %v3080_v32 = vpop.eup %3079 }
 0x794   :  { %v2424_v2 = vcombine.low %v3080_v32, %v3080_v32 }
 0x796   :  { %v2425_v4 = vrot.slane %v2424_v2, 6 }
 0x798   :  { %v2427_v46 = vmul.f32 %v3081_v37, %v2425_v4 }
 0x79a   :  { %v2432_v10 = vrot.slane %v2427_v46, %v2431_v17  ;;  %v2436_v12 = vrot.slane %v2427_v46, %v2435_v3 }
 0x79c   :  { %v2439_v9 = vmul.f32 %v2432_v10, %v2392_v51  ;;  %v2440_v14 = vmul.f32 %v2436_v12, %v2392_v51  ;;  %v2450_v20 = vrot.slane %v2432_v10, %v2431_v17  ;;  %v2454_v21 = vrot.slane %v2436_v12, %v2431_v17 }
 0x79e   :  { %v2443_v15 = vcombine.low %v2439_v9, %v2440_v14  ;;  %v2455_v24 = vmul.f32 %v2450_v20, %v3637_v26  ;;  %v2456_v25 = vmul.f32 %v2454_v21, %v3639_v36  ;;  %v2457_v13 = vmul.f32 %v2450_v20, %v3641_v27  ;;  %v2493_v26 = vld [vmem:[#allocation3 + $0x18] sm:$0xff] }
 0x79f   :  { %v2458_v48 = vmul.f32 %v2454_v21, %v3649_v1  ;;  %v2459_v61 = vmul.f32 %v2450_v20, %v3657_v49  ;;  %v2460_v30 = vmul.f32 %v2454_v21, %v3662_v33  ;;  %v2461_v31 = vmul.f32 %v2450_v20, %v3667_v7  ;;  %v2495_v1 = vld [vmem:[#allocation3 + $0x28] sm:$0xff] }
 0x7a0   :  { %v2444_v19 = vrot.slane %v2443_v15, 5  ;;  %v2462_v34 = vmul.f32 %v2454_v21, %v3672_v40 }
 0x7a2   :  { %v2446_v28 = vsub.f32 %v3081_v37, %v2444_v19 }
 0x7a4   :  { %v2467_v22 = vrot.slane %v2446_v28, %v2466_v16  ;;  %v2471_v23 = vrot.slane %v2446_v28, %v2470_v18 }
 0x7a6   :  { %v2477_v29 = vrot.slane %v2467_v22, %v2466_v16  ;;  %v2481_v53 = vrot.slane %v2471_v23, %v2466_v16 }
 0x7a8   :  { %v2482_v36 = vadd.f32 %v2477_v29, %v2455_v24  ;;  %v2483_v47 = vadd.f32 %v2481_v53, %v2456_v25  ;;  %v2484_v27 = vadd.f32 %v2477_v29, %v2457_v13  ;;  %v2485_v11 = vadd.f32 %v2481_v53, %v2458_v48 }
 0x7a9   :  { %v2486_v39 = vadd.f32 %v2477_v29, %v2459_v61  ;;  %v2487_v49 = vadd.f32 %v2481_v53, %v2460_v30  ;;  %v2488_v42 = vadd.f32 %v2477_v29, %v2461_v31  ;;  %v2489_v33 = vadd.f32 %v2481_v53, %v2462_v34 }
 0x7aa   :  { %v2498_v55 = vadd.f32 %v2490_v5, %v2482_v36  ;;  %v2499_v7 = vadd.f32 %v2491_v41, %v2483_v47  ;;  %v2500_v59 = vadd.f32 %v2492_v63, %v2484_v27  ;;  %v2501_v40 = vadd.f32 %v2493_v26, %v2485_v11 }
 0x7ab   :  { %v2502_v43 = vadd.f32 %v2494_v60, %v2486_v39  ;;  %v2503_v45 = vadd.f32 %v2495_v1, %v2487_v49  ;;  %v2504_v6 = vadd.f32 %v2496_v35, %v2488_v42  ;;  %v2505_v50 = vadd.f32 %v2497_v38, %v2489_v33 }
 0x7ac   :  { %2506 = vst [vmem:[#allocation9] sm:$0xff] %v2498_v55  ;;  %2507 = vst [vmem:[#allocation9 + $0x8] sm:$0xff] %v2499_v7 }
 0x7ad   :  { %2508 = vst [vmem:[#allocation9 + $0x10] sm:$0xff] %v2500_v59  ;;  %2509 = vst [vmem:[#allocation9 + $0x18] sm:$0xff] %v2501_v40 }
 0x7ae   :  { %2510 = vst [vmem:[#allocation9 + $0x20] sm:$0xff] %v2502_v43  ;;  %2511 = vst [vmem:[#allocation9 + $0x28] sm:$0xff] %v2503_v45 }
 0x7af   :  { %2512 = vst [vmem:[#allocation9 + $0x30] sm:$0xff] %v2504_v6  ;;  %2513 = vst [vmem:[#allocation9 + $0x38] sm:$0xff] %v2505_v50 }
 0x7b0   :  { %3159 = shalt.err (!%p3156_p0)
}
 0x7b1   :  { %s3160_s10 = scalar_lea.hbm %s3747_s4, 1024 }
 0x7b2   :  { %p3161_p1 = scmp.ne.s32.totalorder %s3747_s4, %s3160_s10  ;;  %p3164_p2 = scmp.lt.u32.totalorder %s3160_s10, %s3747_s4 }
 0x7b4   :  { %p3166_p3 = pnand %p3164_p2, %p3161_p1 }
 0x7b6   :  { %3169 = shalt.err (!%p3166_p3)
}
 0x7b7   :  { %2525 = dma.vmem_to_hbm [thread:$0]  %s2520_s6, 1024, %s3747_s4, [#allocation5], %s3178_s27, %s3178_s27, %s3179_s28  }
 0x7b8   :  { %3174 = dma.done.wait [#allocation5], 1024  }
 0x7b9   :  { %3175 = vsyncadd [#allocation5], 4294966272 }
 0x7ba   :  { %2529 = vsyncpa [#allocation4], 1 }
 0x7bb   :  { %2530 = vsyncpa [#allocation7], 1 }
 0x7bc   :  { %2531 = vsyncpa [#allocation5], 1 }

</bundles_post_ra>
